<compile_context>
chip_gen: v7x
topology: tpu7x:2x2x1
jax: 0.10.0
libtpu: 0.0.40
codegen_flags: <defaults>
</compile_context>

<pallas_src>
import functools
import math

import jax
import jax.numpy as jnp
from jax.experimental import pallas as pl
from jax.experimental.pallas import tpu as pltpu


# ---------------------------------------------------------------------------
# Kernel 1: fused space-to-depth conv (4x4, stride 2, pad 1) + bias + ReLU.
# xs[B, OH+1, OW+1, 4C] is the space-to-depth view of the padded NHWC input,
# so   out[b, oh, ow, :] = sum_{dh,dw in {0,1}} xs[b, oh+dh, ow+dw, :] @ W[2dh+dw]
# ---------------------------------------------------------------------------
def _conv_s2d_kernel(x_ref, w_ref, b_ref, o_ref, *, block_oh, ow, oc):
    b = pl.program_id(0)
    oh0 = pl.program_id(1) * block_oh
    nrows = block_oh * ow

    # Band of the resident s2d input: [block_oh+1, OW+1, 4C] (bf16).
    slab = x_ref[b, pl.ds(oh0, block_oh + 1), :, :]

    acc = jnp.zeros((nrows, oc), jnp.float32)
    for dh in range(2):
        for dw in range(2):
            win = slab[dh:dh + block_oh, dw:dw + ow, :]   # [block_oh, OW, 4C]
            win = win.reshape(nrows, win.shape[-1])       # rows = (oh, ow)
            acc = acc + jnp.dot(win, w_ref[2 * dh + dw],
                                preferred_element_type=jnp.float32)

    acc = jnp.maximum(acc + b_ref[...], 0.0)              # f32 epilogue
    o_ref[...] = acc.astype(o_ref.dtype)


def conv4x4_s2_relu(x_nhwc, w_s2d, b_row, *, out_dtype=jnp.bfloat16):
    """x_nhwc: [B,H,W,C] bf16; w_s2d: [4, 4C, OC] bf16; b_row: [1, OC] f32."""
    B, H, W, C = x_nhwc.shape
    OH, OW = H // 2, W // 2
    OC = w_s2d.shape[-1]

    # pad=1 then space-to-depth by 2 (cheap XLA glue, no data replication).
    xp = jnp.pad(x_nhwc, ((0, 0), (1, 1), (1, 1), (0, 0)))
    xs = (xp.reshape(B, OH + 1, 2, OW + 1, 2, C)
            .transpose(0, 1, 3, 2, 4, 5)
            .reshape(B, OH + 1, OW + 1, 4 * C))

    n_oh = 2 if OH % 2 == 0 else 1          # >=2 steps/image for megacore
    block_oh = OH // n_oh
    block_rows = block_oh * OW
    grid = (B, n_oh)

    kernel = functools.partial(_conv_s2d_kernel,
                               block_oh=block_oh, ow=OW, oc=OC)
    out = pl.pallas_call(
        kernel,
        out_shape=jax.ShapeDtypeStruct((B * OH * OW, OC), out_dtype),
        grid=grid,
        in_specs=[
            pl.BlockSpec(xs.shape, lambda bi, i: (0, 0, 0, 0)),    # resident
            pl.BlockSpec(w_s2d.shape, lambda bi, i: (0, 0, 0)),
            pl.BlockSpec(b_row.shape, lambda bi, i: (0, 0)),
        ],
        out_specs=pl.BlockSpec((block_rows, OC),
                               lambda bi, i: (bi * n_oh + i, 0)),
        compiler_params=pltpu.CompilerParams(
            dimension_semantics=("parallel", "parallel")),
    )(xs, w_s2d, b_row)
    # TODO(synk): conv1/conv2 have OC < 128 so their output stores are masked
    # (not lane-dense); packing rows into a (block_rows//4, 4*OC) view needs an
    # in-kernel minor-dim reshape and is skipped to keep lowering risk-free.
    return out.reshape(B, OH, OW, OC)


# ---------------------------------------------------------------------------
# Kernel 2: K-tiled GEMM + bias for the final Linear (f32 VMEM accumulator).
# ---------------------------------------------------------------------------
def _linear_kernel(x_ref, w_ref, b_ref, o_ref, acc_ref):
    @pl.when(pl.program_id(1) == 0)
    def _():
        acc_ref[...] = jnp.zeros_like(acc_ref)

    acc_ref[...] += jnp.dot(x_ref[...], w_ref[...],
                            preferred_element_type=jnp.float32)

    @pl.when(pl.program_id(1) == pl.num_programs(1) - 1)
    def _():
        o_ref[...] = (acc_ref[...] + b_ref[...]).astype(o_ref.dtype)


def linear_bias(x, w, b_row):
    """x: [M,K] bf16, w: [K,N] bf16, b_row: [1,N] f32 -> [M,N] f32."""
    M, K = x.shape
    K2, N = w.shape
    assert K == K2

    block_m = M
    for bm in (1024, 512, 256):
        if M % bm == 0:
            block_m = bm
            break
    # K-tiling keeps the per-step slab small even on v7x's 64 MiB VMEM.
    block_k = 2048 if (K > 2048 and K % 2048 == 0) else K
    grid = (M // block_m, K // block_k)

    return pl.pallas_call(
        _linear_kernel,
        out_shape=jax.ShapeDtypeStruct((M, N), jnp.float32),
        grid=grid,
        in_specs=[
            pl.BlockSpec((block_m, block_k), lambda i, k: (i, k)),
            pl.BlockSpec((block_k, N), lambda i, k: (k, 0)),
            pl.BlockSpec((1, N), lambda i, k: (0, 0)),
        ],
        out_specs=pl.BlockSpec((block_m, N), lambda i, k: (i, 0)),
        scratch_shapes=[pltpu.VMEM((block_m, N), jnp.float32)],
        compiler_params=pltpu.CompilerParams(
            dimension_semantics=("parallel", "arbitrary")),
    )(x, w, b_row)


# ---------------------------------------------------------------------------
# One-time parameter repacking: torch layout -> kernel layout (bf16).
# ---------------------------------------------------------------------------
def prepare_params(p):
    def conv_w(w):
        OC, C, KH, KW = w.shape
        assert KH == 4 and KW == 4
        # W'[2dh+dw, p*2C + q*C + c, oc] = w[oc, c, 2dh+p, 2dw+q]
        wr = w.reshape(OC, C, 2, 2, 2, 2).transpose(2, 4, 3, 5, 1, 0)
        return wr.reshape(4, 4 * C, OC).astype(jnp.bfloat16)

    out_dim, K = p["wfc"].shape
    c3 = p["w3"].shape[0]
    s = int(round(math.sqrt(K // c3)))
    assert c3 * s * s == K
    # torch flattens NCHW (c,h,w); our features are NHWC (h,w,c) -> permute cols.
    wfc = (p["wfc"].reshape(out_dim, c3, s, s)
                   .transpose(2, 3, 1, 0)
                   .reshape(K, out_dim).astype(jnp.bfloat16))

    return {
        "w1": conv_w(p["w1"]), "b1": p["b1"].reshape(1, -1).astype(jnp.float32),
        "w2": conv_w(p["w2"]), "b2": p["b2"].reshape(1, -1).astype(jnp.float32),
        "w3": conv_w(p["w3"]), "b3": p["b3"].reshape(1, -1).astype(jnp.float32),
        "wfc": wfc, "bfc": p["bfc"].reshape(1, -1).astype(jnp.float32),
    }


# ---------------------------------------------------------------------------
# ImageEncoder forward (NHWC internally, torch semantics at the boundaries).
# ---------------------------------------------------------------------------
def image_encoder_forward(x_nchw, kp):
    B = x_nchw.shape[0]
    h = jnp.transpose(x_nchw, (0, 2, 3, 1)).astype(jnp.bfloat16)  # NHWC, bf16
    h = conv4x4_s2_relu(h, kp["w1"], kp["b1"])
    h = conv4x4_s2_relu(h, kp["w2"], kp["b2"])
    h = conv4x4_s2_relu(h, kp["w3"], kp["b3"])
    feat = h.reshape(B, -1)     # NHWC flatten; FC weight pre-permuted to match
    return linear_bias(feat, kp["wfc"], kp["bfc"])


# ---------------------------------------------------------------------------
# Torch-layout init + pure-JAX f32 reference (lax.conv) for correctness.
# ---------------------------------------------------------------------------
def init_params(key, out_dim):
    ks = jax.random.split(key, 8)

    def uni(k, shape, fan_in):
        bound = 1.0 / jnp.sqrt(fan_in)
        return jax.random.uniform(k, shape, jnp.float32, -bound, bound)

    return {
        "w1": uni(ks[0], (32, 3, 4, 4), 3 * 16),
        "b1": uni(ks[1], (32,), 3 * 16),
        "w2": uni(ks[2], (64, 32, 4, 4), 32 * 16),
        "b2": uni(ks[3], (64,), 32 * 16),
        "w3": uni(ks[4], (128, 64, 4, 4), 64 * 16),
        "b3": uni(ks[5], (128,), 64 * 16),
        "wfc": uni(ks[6], (out_dim, 128 * 8 * 8), 128 * 8 * 8),
        "bfc": uni(ks[7], (out_dim,), 128 * 8 * 8),
    }


def reference_forward(x, params):
    def conv(h, w, b):
        y = jax.lax.conv_general_dilated(
            h, w, window_strides=(2, 2), padding=((1, 1), (1, 1)),
            dimension_numbers=("NCHW", "OIHW", "NCHW"))
        return jax.nn.relu(y + b[None, :, None, None])

    h = conv(x, params["w1"], params["b1"])
    h = conv(h, params["w2"], params["b2"])
    h = conv(h, params["w3"], params["b3"])
    feat = h.reshape(x.shape[0], -1)
    return feat @ params["wfc"].T + params["bfc"]


if __name__ == "__main__":
    # fc expects 128*8*8 features => 64x64 input spatial (64 -> 32 -> 16 -> 8).
    B, C, H, W = 2, 3, 64, 64
    out_dim = 32

    key = jax.random.PRNGKey(0)
    kx, kp = jax.random.split(key)
    x = jax.random.normal(kx, (B, C, H, W), jnp.float32)
    params = init_params(kp, out_dim)
    kparams = prepare_params(params)      # one-time weight repack (bf16)

    fwd = jax.jit(image_encoder_forward)
    out = jax.block_until_ready(fwd(x, kparams))
    assert out.shape == (B, out_dim), out.shape

    ref = reference_forward(x, params)
    # bf16 MXU inputs (f32 accumulation) -> tolerance looser than the f32 path.
    err = float(jnp.max(jnp.abs(out - ref)))
    assert jnp.allclose(out, ref, atol=3e-2, rtol=3e-2), err

    print("KERNEL_OK")
</pallas_src>

<mosaic_0001>
module attributes {stable_mosaic.version = 11 : i64} {
  func.func @_conv_s2d_kernel(%arg0: i32, %arg1: i32, %arg2: memref<2x33x33x12xbf16, #tpu.memory_space<vmem>>, %arg3: memref<4x12x32xbf16, #tpu.memory_space<vmem>>, %arg4: memref<1x32xf32, #tpu.memory_space<vmem>>, %arg5: memref<512x32xbf16, #tpu.memory_space<vmem>>) attributes {dimension_semantics = [#tpu.dimension_semantics<parallel>, #tpu.dimension_semantics<parallel>], iteration_bounds = array<i64: 2, 2>, scalar_prefetch = 0 : i64, scratch_operands = 0 : i64, tpu.core_type = #tpu.core_type<tc>, window_params = [{pipeline_mode = #tpu.pipeline_mode<synchronous>, transform_indices = @transform_0, window_bounds = array<i64: 2, 33, 33, 12>}, {pipeline_mode = #tpu.pipeline_mode<synchronous>, transform_indices = @transform_1, window_bounds = array<i64: 4, 12, 32>}, {pipeline_mode = #tpu.pipeline_mode<synchronous>, transform_indices = @transform_2, window_bounds = array<i64: 1, 32>}, {transform_indices = @transform_3, window_bounds = array<i64: 512, 32>}]} {
    %c16_i32 = arith.constant 16 : i32
    %0 = arith.muli %arg1, %c16_i32 : i32
    %1 = arith.index_cast %arg0 : i32 to index
    %2 = arith.index_cast %0 : i32 to index
    %c0 = arith.constant 0 : index
    %c0_0 = arith.constant 0 : index
    %3 = vector.load %arg2[%1, %2, %c0, %c0_0] : memref<2x33x33x12xbf16, #tpu.memory_space<vmem>>, vector<1x17x33x12xbf16>
    %4 = vector.shape_cast %3 : vector<1x17x33x12xbf16> to vector<17x33x12xbf16>
    %cst = arith.constant 0.000000e+00 : f32
    %5 = vector.broadcast %cst : f32 to vector<512x32xf32>
    %6 = vector.extract_strided_slice %4 {offsets = [0, 0, 0], sizes = [16, 32, 12], strides = [1, 1, 1]} : vector<17x33x12xbf16> to vector<16x32x12xbf16>
    %7 = vector.shape_cast %6 : vector<16x32x12xbf16> to vector<512x12xbf16>
    %c0_1 = arith.constant 0 : index
    %c0_2 = arith.constant 0 : index
    %c0_3 = arith.constant 0 : index
    %8 = vector.load %arg3[%c0_1, %c0_2, %c0_3] : memref<4x12x32xbf16, #tpu.memory_space<vmem>>, vector<1x12x32xbf16>
    %9 = vector.shape_cast %8 : vector<1x12x32xbf16> to vector<12x32xbf16>
    %cst_4 = arith.constant dense<0.000000e+00> : vector<512x32xf32>
    %10 = tpu.matmul %7, %9, %cst_4 {dimension_numbers = #tpu.dot_dimension_numbers<[1], [0], [0], [1], [0, 0, 1, 1], [], []>} : vector<512x12xbf16>, vector<12x32xbf16>, vector<512x32xf32> -> vector<512x32xf32>
    %11 = arith.addf %5, %10 : vector<512x32xf32>
    %12 = vector.extract_strided_slice %4 {offsets = [0, 1, 0], sizes = [16, 32, 12], strides = [1, 1, 1]} : vector<17x33x12xbf16> to vector<16x32x12xbf16>
    %13 = vector.shape_cast %12 : vector<16x32x12xbf16> to vector<512x12xbf16>
    %c1 = arith.constant 1 : index
    %c0_5 = arith.constant 0 : index
    %c0_6 = arith.constant 0 : index
    %14 = vector.load %arg3[%c1, %c0_5, %c0_6] : memref<4x12x32xbf16, #tpu.memory_space<vmem>>, vector<1x12x32xbf16>
    %15 = vector.shape_cast %14 : vector<1x12x32xbf16> to vector<12x32xbf16>
    %cst_7 = arith.constant dense<0.000000e+00> : vector<512x32xf32>
    %16 = tpu.matmul %13, %15, %cst_7 {dimension_numbers = #tpu.dot_dimension_numbers<[1], [0], [0], [1], [0, 0, 1, 1], [], []>} : vector<512x12xbf16>, vector<12x32xbf16>, vector<512x32xf32> -> vector<512x32xf32>
    %17 = arith.addf %11, %16 : vector<512x32xf32>
    %18 = vector.extract_strided_slice %4 {offsets = [1, 0, 0], sizes = [16, 32, 12], strides = [1, 1, 1]} : vector<17x33x12xbf16> to vector<16x32x12xbf16>
    %19 = vector.shape_cast %18 : vector<16x32x12xbf16> to vector<512x12xbf16>
    %c2 = arith.constant 2 : index
    %c0_8 = arith.constant 0 : index
    %c0_9 = arith.constant 0 : index
    %20 = vector.load %arg3[%c2, %c0_8, %c0_9] : memref<4x12x32xbf16, #tpu.memory_space<vmem>>, vector<1x12x32xbf16>
    %21 = vector.shape_cast %20 : vector<1x12x32xbf16> to vector<12x32xbf16>
    %cst_10 = arith.constant dense<0.000000e+00> : vector<512x32xf32>
    %22 = tpu.matmul %19, %21, %cst_10 {dimension_numbers = #tpu.dot_dimension_numbers<[1], [0], [0], [1], [0, 0, 1, 1], [], []>} : vector<512x12xbf16>, vector<12x32xbf16>, vector<512x32xf32> -> vector<512x32xf32>
    %23 = arith.addf %17, %22 : vector<512x32xf32>
    %24 = vector.extract_strided_slice %4 {offsets = [1, 1, 0], sizes = [16, 32, 12], strides = [1, 1, 1]} : vector<17x33x12xbf16> to vector<16x32x12xbf16>
    %25 = vector.shape_cast %24 : vector<16x32x12xbf16> to vector<512x12xbf16>
    %c3 = arith.constant 3 : index
    %c0_11 = arith.constant 0 : index
    %c0_12 = arith.constant 0 : index
    %26 = vector.load %arg3[%c3, %c0_11, %c0_12] : memref<4x12x32xbf16, #tpu.memory_space<vmem>>, vector<1x12x32xbf16>
    %27 = vector.shape_cast %26 : vector<1x12x32xbf16> to vector<12x32xbf16>
    %cst_13 = arith.constant dense<0.000000e+00> : vector<512x32xf32>
    %28 = tpu.matmul %25, %27, %cst_13 {dimension_numbers = #tpu.dot_dimension_numbers<[1], [0], [0], [1], [0, 0, 1, 1], [], []>} : vector<512x12xbf16>, vector<12x32xbf16>, vector<512x32xf32> -> vector<512x32xf32>
    %29 = arith.addf %23, %28 : vector<512x32xf32>
    %c0_14 = arith.constant 0 : index
    %c0_15 = arith.constant 0 : index
    %30 = vector.load %arg4[%c0_14, %c0_15] : memref<1x32xf32, #tpu.memory_space<vmem>>, vector<1x32xf32>
    %31 = vector.broadcast %30 : vector<1x32xf32> to vector<512x32xf32>
    %32 = arith.addf %29, %31 : vector<512x32xf32>
    %cst_16 = arith.constant 0.000000e+00 : f32
    %33 = vector.broadcast %cst_16 : f32 to vector<512x32xf32>
    %34 = arith.maximumf %32, %33 : vector<512x32xf32>
    %35 = arith.truncf %34 : vector<512x32xf32> to vector<512x32xbf16>
    %c0_17 = arith.constant 0 : index
    %c0_18 = arith.constant 0 : index
    %36 = vector.load %arg5[%c0_17, %c0_18] : memref<512x32xbf16, #tpu.memory_space<vmem>>, vector<512x32xbf16>
    tpu.vector_store %arg5[%c0_17, %c0_18], %35 {strides = array<i32>} : memref<512x32xbf16, #tpu.memory_space<vmem>>, vector<512x32xbf16>,
    return
  }
  func.func @transform_0(%arg0: i32, %arg1: i32) -> (i32, i32, i32, i32) {
    %c0_i32 = arith.constant 0 : i32
    %c0_i32_0 = arith.constant 0 : i32
    %c0_i32_1 = arith.constant 0 : i32
    %c0_i32_2 = arith.constant 0 : i32
    %c0_i32_3 = arith.constant 0 : i32
    return %c0_i32, %c0_i32_0, %c0_i32_1, %c0_i32_2 : i32, i32, i32, i32
  }
  func.func @transform_1(%arg0: i32, %arg1: i32) -> (i32, i32, i32) {
    %c0_i32 = arith.constant 0 : i32
    %c0_i32_0 = arith.constant 0 : i32
    %c0_i32_1 = arith.constant 0 : i32
    %c0_i32_2 = arith.constant 0 : i32
    return %c0_i32, %c0_i32_0, %c0_i32_1 : i32, i32, i32
  }
  func.func @transform_2(%arg0: i32, %arg1: i32) -> (i32, i32) {
    %c0_i32 = arith.constant 0 : i32
    %c0_i32_0 = arith.constant 0 : i32
    %c0_i32_1 = arith.constant 0 : i32
    return %c0_i32, %c0_i32_0 : i32, i32
  }
  func.func @transform_3(%arg0: i32, %arg1: i32) -> (i32, i32) {
    %c2_i32 = arith.constant 2 : i32
    %0 = arith.muli %arg0, %c2_i32 : i32
    %1 = arith.addi %0, %arg1 : i32
    %c0_i32 = arith.constant 0 : i32
    %c0_i32_0 = arith.constant 0 : i32
    return %1, %c0_i32 : i32, i32
  }
}

module attributes {stable_mosaic.version = 11 : i64} {
  func.func @_conv_s2d_kernel(%arg0: i32, %arg1: i32, %arg2: memref<2x17x17x128xbf16, #tpu.memory_space<vmem>>, %arg3: memref<4x128x64xbf16, #tpu.memory_space<vmem>>, %arg4: memref<1x64xf32, #tpu.memory_space<vmem>>, %arg5: memref<128x64xbf16, #tpu.memory_space<vmem>>) attributes {dimension_semantics = [#tpu.dimension_semantics<parallel>, #tpu.dimension_semantics<parallel>], iteration_bounds = array<i64: 2, 2>, scalar_prefetch = 0 : i64, scratch_operands = 0 : i64, tpu.core_type = #tpu.core_type<tc>, window_params = [{pipeline_mode = #tpu.pipeline_mode<synchronous>, transform_indices = @transform_0, window_bounds = array<i64: 2, 17, 17, 128>}, {pipeline_mode = #tpu.pipeline_mode<synchronous>, transform_indices = @transform_1, window_bounds = array<i64: 4, 128, 64>}, {pipeline_mode = #tpu.pipeline_mode<synchronous>, transform_indices = @transform_2, window_bounds = array<i64: 1, 64>}, {transform_indices = @transform_3, window_bounds = array<i64: 128, 64>}]} {
    %c8_i32 = arith.constant 8 : i32
    %0 = arith.muli %arg1, %c8_i32 : i32
    %1 = arith.index_cast %arg0 : i32 to index
    %2 = arith.index_cast %0 : i32 to index
    %c0 = arith.constant 0 : index
    %c0_0 = arith.constant 0 : index
    %3 = vector.load %arg2[%1, %2, %c0, %c0_0] : memref<2x17x17x128xbf16, #tpu.memory_space<vmem>>, vector<1x9x17x128xbf16>
    %4 = vector.shape_cast %3 : vector<1x9x17x128xbf16> to vector<9x17x128xbf16>
    %cst = arith.constant 0.000000e+00 : f32
    %5 = vector.broadcast %cst : f32 to vector<128x64xf32>
    %6 = vector.extract_strided_slice %4 {offsets = [0, 0, 0], sizes = [8, 16, 128], strides = [1, 1, 1]} : vector<9x17x128xbf16> to vector<8x16x128xbf16>
    %7 = vector.shape_cast %6 : vector<8x16x128xbf16> to vector<128x128xbf16>
    %c0_1 = arith.constant 0 : index
    %c0_2 = arith.constant 0 : index
    %c0_3 = arith.constant 0 : index
    %8 = vector.load %arg3[%c0_1, %c0_2, %c0_3] : memref<4x128x64xbf16, #tpu.memory_space<vmem>>, vector<1x128x64xbf16>
    %9 = vector.shape_cast %8 : vector<1x128x64xbf16> to vector<128x64xbf16>
    %cst_4 = arith.constant dense<0.000000e+00> : vector<128x64xf32>
    %10 = tpu.matmul %7, %9, %cst_4 {dimension_numbers = #tpu.dot_dimension_numbers<[1], [0], [0], [1], [0, 0, 1, 1], [], []>} : vector<128x128xbf16>, vector<128x64xbf16>, vector<128x64xf32> -> vector<128x64xf32>
    %11 = arith.addf %5, %10 : vector<128x64xf32>
    %12 = vector.extract_strided_slice %4 {offsets = [0, 1, 0], sizes = [8, 16, 128], strides = [1, 1, 1]} : vector<9x17x128xbf16> to vector<8x16x128xbf16>
    %13 = vector.shape_cast %12 : vector<8x16x128xbf16> to vector<128x128xbf16>
    %c1 = arith.constant 1 : index
    %c0_5 = arith.constant 0 : index
    %c0_6 = arith.constant 0 : index
    %14 = vector.load %arg3[%c1, %c0_5, %c0_6] : memref<4x128x64xbf16, #tpu.memory_space<vmem>>, vector<1x128x64xbf16>
    %15 = vector.shape_cast %14 : vector<1x128x64xbf16> to vector<128x64xbf16>
    %cst_7 = arith.constant dense<0.000000e+00> : vector<128x64xf32>
    %16 = tpu.matmul %13, %15, %cst_7 {dimension_numbers = #tpu.dot_dimension_numbers<[1], [0], [0], [1], [0, 0, 1, 1], [], []>} : vector<128x128xbf16>, vector<128x64xbf16>, vector<128x64xf32> -> vector<128x64xf32>
    %17 = arith.addf %11, %16 : vector<128x64xf32>
    %18 = vector.extract_strided_slice %4 {offsets = [1, 0, 0], sizes = [8, 16, 128], strides = [1, 1, 1]} : vector<9x17x128xbf16> to vector<8x16x128xbf16>
    %19 = vector.shape_cast %18 : vector<8x16x128xbf16> to vector<128x128xbf16>
    %c2 = arith.constant 2 : index
    %c0_8 = arith.constant 0 : index
    %c0_9 = arith.constant 0 : index
    %20 = vector.load %arg3[%c2, %c0_8, %c0_9] : memref<4x128x64xbf16, #tpu.memory_space<vmem>>, vector<1x128x64xbf16>
    %21 = vector.shape_cast %20 : vector<1x128x64xbf16> to vector<128x64xbf16>
    %cst_10 = arith.constant dense<0.000000e+00> : vector<128x64xf32>
    %22 = tpu.matmul %19, %21, %cst_10 {dimension_numbers = #tpu.dot_dimension_numbers<[1], [0], [0], [1], [0, 0, 1, 1], [], []>} : vector<128x128xbf16>, vector<128x64xbf16>, vector<128x64xf32> -> vector<128x64xf32>
    %23 = arith.addf %17, %22 : vector<128x64xf32>
    %24 = vector.extract_strided_slice %4 {offsets = [1, 1, 0], sizes = [8, 16, 128], strides = [1, 1, 1]} : vector<9x17x128xbf16> to vector<8x16x128xbf16>
    %25 = vector.shape_cast %24 : vector<8x16x128xbf16> to vector<128x128xbf16>
    %c3 = arith.constant 3 : index
    %c0_11 = arith.constant 0 : index
    %c0_12 = arith.constant 0 : index
    %26 = vector.load %arg3[%c3, %c0_11, %c0_12] : memref<4x128x64xbf16, #tpu.memory_space<vmem>>, vector<1x128x64xbf16>
    %27 = vector.shape_cast %26 : vector<1x128x64xbf16> to vector<128x64xbf16>
    %cst_13 = arith.constant dense<0.000000e+00> : vector<128x64xf32>
    %28 = tpu.matmul %25, %27, %cst_13 {dimension_numbers = #tpu.dot_dimension_numbers<[1], [0], [0], [1], [0, 0, 1, 1], [], []>} : vector<128x128xbf16>, vector<128x64xbf16>, vector<128x64xf32> -> vector<128x64xf32>
    %29 = arith.addf %23, %28 : vector<128x64xf32>
    %c0_14 = arith.constant 0 : index
    %c0_15 = arith.constant 0 : index
    %30 = vector.load %arg4[%c0_14, %c0_15] : memref<1x64xf32, #tpu.memory_space<vmem>>, vector<1x64xf32>
    %31 = vector.broadcast %30 : vector<1x64xf32> to vector<128x64xf32>
    %32 = arith.addf %29, %31 : vector<128x64xf32>
    %cst_16 = arith.constant 0.000000e+00 : f32
    %33 = vector.broadcast %cst_16 : f32 to vector<128x64xf32>
    %34 = arith.maximumf %32, %33 : vector<128x64xf32>
    %35 = arith.truncf %34 : vector<128x64xf32> to vector<128x64xbf16>
    %c0_17 = arith.constant 0 : index
    %c0_18 = arith.constant 0 : index
    %36 = vector.load %arg5[%c0_17, %c0_18] : memref<128x64xbf16, #tpu.memory_space<vmem>>, vector<128x64xbf16>
    tpu.vector_store %arg5[%c0_17, %c0_18], %35 {strides = array<i32>} : memref<128x64xbf16, #tpu.memory_space<vmem>>, vector<128x64xbf16>,
    return
  }
  func.func @transform_0(%arg0: i32, %arg1: i32) -> (i32, i32, i32, i32) {
    %c0_i32 = arith.constant 0 : i32
    %c0_i32_0 = arith.constant 0 : i32
    %c0_i32_1 = arith.constant 0 : i32
    %c0_i32_2 = arith.constant 0 : i32
    %c0_i32_3 = arith.constant 0 : i32
    return %c0_i32, %c0_i32_0, %c0_i32_1, %c0_i32_2 : i32, i32, i32, i32
  }
  func.func @transform_1(%arg0: i32, %arg1: i32) -> (i32, i32, i32) {
    %c0_i32 = arith.constant 0 : i32
    %c0_i32_0 = arith.constant 0 : i32
    %c0_i32_1 = arith.constant 0 : i32
    %c0_i32_2 = arith.constant 0 : i32
    return %c0_i32, %c0_i32_0, %c0_i32_1 : i32, i32, i32
  }
  func.func @transform_2(%arg0: i32, %arg1: i32) -> (i32, i32) {
    %c0_i32 = arith.constant 0 : i32
    %c0_i32_0 = arith.constant 0 : i32
    %c0_i32_1 = arith.constant 0 : i32
    return %c0_i32, %c0_i32_0 : i32, i32
  }
  func.func @transform_3(%arg0: i32, %arg1: i32) -> (i32, i32) {
    %c2_i32 = arith.constant 2 : i32
    %0 = arith.muli %arg0, %c2_i32 : i32
    %1 = arith.addi %0, %arg1 : i32
    %c0_i32 = arith.constant 0 : i32
    %c0_i32_0 = arith.constant 0 : i32
    return %1, %c0_i32 : i32, i32
  }
}

module attributes {stable_mosaic.version = 11 : i64} {
  func.func @_conv_s2d_kernel(%arg0: i32, %arg1: i32, %arg2: memref<2x9x9x256xbf16, #tpu.memory_space<vmem>>, %arg3: memref<4x256x128xbf16, #tpu.memory_space<vmem>>, %arg4: memref<1x128xf32, #tpu.memory_space<vmem>>, %arg5: memref<32x128xbf16, #tpu.memory_space<vmem>>) attributes {dimension_semantics = [#tpu.dimension_semantics<parallel>, #tpu.dimension_semantics<parallel>], iteration_bounds = array<i64: 2, 2>, scalar_prefetch = 0 : i64, scratch_operands = 0 : i64, tpu.core_type = #tpu.core_type<tc>, window_params = [{pipeline_mode = #tpu.pipeline_mode<synchronous>, transform_indices = @transform_0, window_bounds = array<i64: 2, 9, 9, 256>}, {pipeline_mode = #tpu.pipeline_mode<synchronous>, transform_indices = @transform_1, window_bounds = array<i64: 4, 256, 128>}, {pipeline_mode = #tpu.pipeline_mode<synchronous>, transform_indices = @transform_2, window_bounds = array<i64: 1, 128>}, {transform_indices = @transform_3, window_bounds = array<i64: 32, 128>}]} {
    %c4_i32 = arith.constant 4 : i32
    %0 = arith.muli %arg1, %c4_i32 : i32
    %1 = arith.index_cast %arg0 : i32 to index
    %2 = arith.index_cast %0 : i32 to index
    %c0 = arith.constant 0 : index
    %c0_0 = arith.constant 0 : index
    %3 = vector.load %arg2[%1, %2, %c0, %c0_0] : memref<2x9x9x256xbf16, #tpu.memory_space<vmem>>, vector<1x5x9x256xbf16>
    %4 = vector.shape_cast %3 : vector<1x5x9x256xbf16> to vector<5x9x256xbf16>
    %cst = arith.constant 0.000000e+00 : f32
    %5 = vector.broadcast %cst : f32 to vector<32x128xf32>
    %6 = vector.extract_strided_slice %4 {offsets = [0, 0, 0], sizes = [4, 8, 256], strides = [1, 1, 1]} : vector<5x9x256xbf16> to vector<4x8x256xbf16>
    %7 = vector.shape_cast %6 : vector<4x8x256xbf16> to vector<32x256xbf16>
    %c0_1 = arith.constant 0 : index
    %c0_2 = arith.constant 0 : index
    %c0_3 = arith.constant 0 : index
    %8 = vector.load %arg3[%c0_1, %c0_2, %c0_3] : memref<4x256x128xbf16, #tpu.memory_space<vmem>>, vector<1x256x128xbf16>
    %9 = vector.shape_cast %8 : vector<1x256x128xbf16> to vector<256x128xbf16>
    %cst_4 = arith.constant dense<0.000000e+00> : vector<32x128xf32>
    %10 = tpu.matmul %7, %9, %cst_4 {dimension_numbers = #tpu.dot_dimension_numbers<[1], [0], [0], [1], [0, 0, 1, 1], [], []>} : vector<32x256xbf16>, vector<256x128xbf16>, vector<32x128xf32> -> vector<32x128xf32>
    %11 = arith.addf %5, %10 : vector<32x128xf32>
    %12 = vector.extract_strided_slice %4 {offsets = [0, 1, 0], sizes = [4, 8, 256], strides = [1, 1, 1]} : vector<5x9x256xbf16> to vector<4x8x256xbf16>
    %13 = vector.shape_cast %12 : vector<4x8x256xbf16> to vector<32x256xbf16>
    %c1 = arith.constant 1 : index
    %c0_5 = arith.constant 0 : index
    %c0_6 = arith.constant 0 : index
    %14 = vector.load %arg3[%c1, %c0_5, %c0_6] : memref<4x256x128xbf16, #tpu.memory_space<vmem>>, vector<1x256x128xbf16>
    %15 = vector.shape_cast %14 : vector<1x256x128xbf16> to vector<256x128xbf16>
    %cst_7 = arith.constant dense<0.000000e+00> : vector<32x128xf32>
    %16 = tpu.matmul %13, %15, %cst_7 {dimension_numbers = #tpu.dot_dimension_numbers<[1], [0], [0], [1], [0, 0, 1, 1], [], []>} : vector<32x256xbf16>, vector<256x128xbf16>, vector<32x128xf32> -> vector<32x128xf32>
    %17 = arith.addf %11, %16 : vector<32x128xf32>
    %18 = vector.extract_strided_slice %4 {offsets = [1, 0, 0], sizes = [4, 8, 256], strides = [1, 1, 1]} : vector<5x9x256xbf16> to vector<4x8x256xbf16>
    %19 = vector.shape_cast %18 : vector<4x8x256xbf16> to vector<32x256xbf16>
    %c2 = arith.constant 2 : index
    %c0_8 = arith.constant 0 : index
    %c0_9 = arith.constant 0 : index
    %20 = vector.load %arg3[%c2, %c0_8, %c0_9] : memref<4x256x128xbf16, #tpu.memory_space<vmem>>, vector<1x256x128xbf16>
    %21 = vector.shape_cast %20 : vector<1x256x128xbf16> to vector<256x128xbf16>
    %cst_10 = arith.constant dense<0.000000e+00> : vector<32x128xf32>
    %22 = tpu.matmul %19, %21, %cst_10 {dimension_numbers = #tpu.dot_dimension_numbers<[1], [0], [0], [1], [0, 0, 1, 1], [], []>} : vector<32x256xbf16>, vector<256x128xbf16>, vector<32x128xf32> -> vector<32x128xf32>
    %23 = arith.addf %17, %22 : vector<32x128xf32>
    %24 = vector.extract_strided_slice %4 {offsets = [1, 1, 0], sizes = [4, 8, 256], strides = [1, 1, 1]} : vector<5x9x256xbf16> to vector<4x8x256xbf16>
    %25 = vector.shape_cast %24 : vector<4x8x256xbf16> to vector<32x256xbf16>
    %c3 = arith.constant 3 : index
    %c0_11 = arith.constant 0 : index
    %c0_12 = arith.constant 0 : index
    %26 = vector.load %arg3[%c3, %c0_11, %c0_12] : memref<4x256x128xbf16, #tpu.memory_space<vmem>>, vector<1x256x128xbf16>
    %27 = vector.shape_cast %26 : vector<1x256x128xbf16> to vector<256x128xbf16>
    %cst_13 = arith.constant dense<0.000000e+00> : vector<32x128xf32>
    %28 = tpu.matmul %25, %27, %cst_13 {dimension_numbers = #tpu.dot_dimension_numbers<[1], [0], [0], [1], [0, 0, 1, 1], [], []>} : vector<32x256xbf16>, vector<256x128xbf16>, vector<32x128xf32> -> vector<32x128xf32>
    %29 = arith.addf %23, %28 : vector<32x128xf32>
    %c0_14 = arith.constant 0 : index
    %c0_15 = arith.constant 0 : index
    %30 = vector.load %arg4[%c0_14, %c0_15] : memref<1x128xf32, #tpu.memory_space<vmem>>, vector<1x128xf32>
    %31 = vector.broadcast %30 : vector<1x128xf32> to vector<32x128xf32>
    %32 = arith.addf %29, %31 : vector<32x128xf32>
    %cst_16 = arith.constant 0.000000e+00 : f32
    %33 = vector.broadcast %cst_16 : f32 to vector<32x128xf32>
    %34 = arith.maximumf %32, %33 : vector<32x128xf32>
    %35 = arith.truncf %34 : vector<32x128xf32> to vector<32x128xbf16>
    %c0_17 = arith.constant 0 : index
    %c0_18 = arith.constant 0 : index
    %36 = vector.load %arg5[%c0_17, %c0_18] : memref<32x128xbf16, #tpu.memory_space<vmem>>, vector<32x128xbf16>
    tpu.vector_store %arg5[%c0_17, %c0_18], %35 {strides = array<i32>} : memref<32x128xbf16, #tpu.memory_space<vmem>>, vector<32x128xbf16>,
    return
  }
  func.func @transform_0(%arg0: i32, %arg1: i32) -> (i32, i32, i32, i32) {
    %c0_i32 = arith.constant 0 : i32
    %c0_i32_0 = arith.constant 0 : i32
    %c0_i32_1 = arith.constant 0 : i32
    %c0_i32_2 = arith.constant 0 : i32
    %c0_i32_3 = arith.constant 0 : i32
    return %c0_i32, %c0_i32_0, %c0_i32_1, %c0_i32_2 : i32, i32, i32, i32
  }
  func.func @transform_1(%arg0: i32, %arg1: i32) -> (i32, i32, i32) {
    %c0_i32 = arith.constant 0 : i32
    %c0_i32_0 = arith.constant 0 : i32
    %c0_i32_1 = arith.constant 0 : i32
    %c0_i32_2 = arith.constant 0 : i32
    return %c0_i32, %c0_i32_0, %c0_i32_1 : i32, i32, i32
  }
  func.func @transform_2(%arg0: i32, %arg1: i32) -> (i32, i32) {
    %c0_i32 = arith.constant 0 : i32
    %c0_i32_0 = arith.constant 0 : i32
    %c0_i32_1 = arith.constant 0 : i32
    return %c0_i32, %c0_i32_0 : i32, i32
  }
  func.func @transform_3(%arg0: i32, %arg1: i32) -> (i32, i32) {
    %c2_i32 = arith.constant 2 : i32
    %0 = arith.muli %arg0, %c2_i32 : i32
    %1 = arith.addi %0, %arg1 : i32
    %c0_i32 = arith.constant 0 : i32
    %c0_i32_0 = arith.constant 0 : i32
    return %1, %c0_i32 : i32, i32
  }
}

module attributes {stable_mosaic.version = 11 : i64} {
  func.func @_linear_kernel(%arg0: i32, %arg1: i32, %arg2: memref<2x2048xbf16, #tpu.memory_space<vmem>>, %arg3: memref<2048x32xbf16, #tpu.memory_space<vmem>>, %arg4: memref<1x32xf32, #tpu.memory_space<vmem>>, %arg5: memref<2x32xf32, #tpu.memory_space<vmem>>, %arg6: memref<2x32xf32, #tpu.memory_space<vmem>>) attributes {dimension_semantics = [#tpu.dimension_semantics<parallel>, #tpu.dimension_semantics<arbitrary>], iteration_bounds = array<i64: 1, 4>, scalar_prefetch = 0 : i64, scratch_operands = 1 : i64, tpu.core_type = #tpu.core_type<tc>, window_params = [{transform_indices = @transform_0, window_bounds = array<i64: 2, 2048>}, {transform_indices = @transform_1, window_bounds = array<i64: 2048, 32>}, {pipeline_mode = #tpu.pipeline_mode<synchronous>, transform_indices = @transform_2, window_bounds = array<i64: 1, 32>}, {transform_indices = @transform_3, window_bounds = array<i64: 2, 32>}]} {
    %c0_i32 = arith.constant 0 : i32
    %0 = arith.cmpi eq, %arg1, %c0_i32 : i32
    %1 = arith.extui %0 : i1 to i32
    %c0_i32_0 = arith.constant 0 : i32
    %2 = arith.cmpi ne, %1, %c0_i32_0 : i32
    scf.if %2 {
      %cst_9 = arith.constant 0.000000e+00 : f32
      %12 = vector.broadcast %cst_9 : f32 to vector<2x32xf32>
      %c0_10 = arith.constant 0 : index
      %c0_11 = arith.constant 0 : index
      %13 = vector.load %arg6[%c0_10, %c0_11] : memref<2x32xf32, #tpu.memory_space<vmem>>, vector<2x32xf32>
      tpu.vector_store %arg6[%c0_10, %c0_11], %12 {strides = array<i32>} : memref<2x32xf32, #tpu.memory_space<vmem>>, vector<2x32xf32>,
    } else {
    }
    %c0 = arith.constant 0 : index
    %c0_1 = arith.constant 0 : index
    %3 = vector.load %arg6[%c0, %c0_1] : memref<2x32xf32, #tpu.memory_space<vmem>>, vector<2x32xf32>
    %c0_2 = arith.constant 0 : index
    %c0_3 = arith.constant 0 : index
    %4 = vector.load %arg2[%c0_2, %c0_3] : memref<2x2048xbf16, #tpu.memory_space<vmem>>, vector<2x2048xbf16>
    %c0_4 = arith.constant 0 : index
    %c0_5 = arith.constant 0 : index
    %5 = vector.load %arg3[%c0_4, %c0_5] : memref<2048x32xbf16, #tpu.memory_space<vmem>>, vector<2048x32xbf16>
    %cst = arith.constant dense<0.000000e+00> : vector<2x32xf32>
    %6 = tpu.matmul %4, %5, %cst {dimension_numbers = #tpu.dot_dimension_numbers<[1], [0], [0], [1], [0, 0, 1, 1], [], []>} : vector<2x2048xbf16>, vector<2048x32xbf16>, vector<2x32xf32> -> vector<2x32xf32>
    %7 = arith.addf %3, %6 : vector<2x32xf32>
    %c0_6 = arith.constant 0 : index
    %c0_7 = arith.constant 0 : index
    %8 = vector.load %arg6[%c0_6, %c0_7] : memref<2x32xf32, #tpu.memory_space<vmem>>, vector<2x32xf32>
    tpu.vector_store %arg6[%c0_6, %c0_7], %7 {strides = array<i32>} : memref<2x32xf32, #tpu.memory_space<vmem>>, vector<2x32xf32>,
    %c3_i32 = arith.constant 3 : i32
    %9 = arith.cmpi eq, %arg1, %c3_i32 : i32
    %10 = arith.extui %9 : i1 to i32
    %c0_i32_8 = arith.constant 0 : i32
    %11 = arith.cmpi ne, %10, %c0_i32_8 : i32
    scf.if %11 {
      %c0_9 = arith.constant 0 : index
      %c0_10 = arith.constant 0 : index
      %12 = vector.load %arg6[%c0_9, %c0_10] : memref<2x32xf32, #tpu.memory_space<vmem>>, vector<2x32xf32>
      %c0_11 = arith.constant 0 : index
      %c0_12 = arith.constant 0 : index
      %13 = vector.load %arg4[%c0_11, %c0_12] : memref<1x32xf32, #tpu.memory_space<vmem>>, vector<1x32xf32>
      %14 = vector.broadcast %13 : vector<1x32xf32> to vector<2x32xf32>
      %15 = arith.addf %12, %14 : vector<2x32xf32>
      %c0_13 = arith.constant 0 : index
      %c0_14 = arith.constant 0 : index
      %16 = vector.load %arg5[%c0_13, %c0_14] : memref<2x32xf32, #tpu.memory_space<vmem>>, vector<2x32xf32>
      tpu.vector_store %arg5[%c0_13, %c0_14], %15 {strides = array<i32>} : memref<2x32xf32, #tpu.memory_space<vmem>>, vector<2x32xf32>,
    } else {
    }
    return
  }
  func.func @transform_0(%arg0: i32, %arg1: i32) -> (i32, i32) {
    %c0_i32 = arith.constant 0 : i32
    return %arg0, %arg1 : i32, i32
  }
  func.func @transform_1(%arg0: i32, %arg1: i32) -> (i32, i32) {
    %c0_i32 = arith.constant 0 : i32
    %c0_i32_0 = arith.constant 0 : i32
    return %arg1, %c0_i32 : i32, i32
  }
  func.func @transform_2(%arg0: i32, %arg1: i32) -> (i32, i32) {
    %c0_i32 = arith.constant 0 : i32
    %c0_i32_0 = arith.constant 0 : i32
    %c0_i32_1 = arith.constant 0 : i32
    return %c0_i32, %c0_i32_0 : i32, i32
  }
  func.func @transform_3(%arg0: i32, %arg1: i32) -> (i32, i32) {
    %c0_i32 = arith.constant 0 : i32
    %c0_i32_0 = arith.constant 0 : i32
    return %arg0, %c0_i32 : i32, i32
  }
}

</mosaic_0001>

<bundles_post_ra>
// kernel: image_encoder_forward.4
= control target key start
LH: loop header
LB: loop body
LE: loop exit
PB: predicated region body
PF: predicated region fallthrough
CT: control target
= control target key end

     0   :  { %s4426_s12 = smov 0   ;;  %s4428_s13 = smov 0   ;;  %s5860_s0 = inlined_call_operand.vmem [shape: bf16[2,33,33,12], index: 0, kind: input, shape index: {}]   ;;  %s5861_s1 = inlined_call_operand.vmem [shape: bf16[4,12,32], index: 1, kind: input, shape index: {}]   ;;  %s5862_s2 = inlined_call_operand.vmem [shape: f32[1,32], index: 2, kind: input, shape index: {}]   ;;  %s5863_s3 = inlined_call_operand.vmem [shape: bf16[2048,32], index: 3, kind: output, shape index: {}]  }
   0x1   :  { %s4430_s14 = smov 0   ;;  %s4432_s15 = smov 0  }
   0x2   :  { %s4434_s16 = smov 0  }
   0x3 LB: > { %s22_s17 = sadd.s32 1, %s4396_s14  ;;  %s25_s18 = sadd.s32 1, %s4400_s15  ;;  %s4404_s16 = sphi %s4434_s16, %s13_s16   ;;  %s4400_s15 = sphi %s4432_s15, %s5969_s15   ;;  %s4396_s14 = sphi %s4430_s14, %s5968_s14   ;;  %s4392_s13 = sphi %s4428_s13, %s5967_s13   ;;  %s4388_s12 = sphi %s4426_s12, %s5966_s12  }
   0x4   : > { %p23_p0 = scmp.ge.s32.totalorder %s22_s17, 2  ;;  %p3350_p1 = scmp.ge.s32.totalorder %s4404_s16, 1 }
   0x5   : > { %p143_p2 = scmp.lt.s32.totalorder %s4404_s16, 5 }
   0x6   : > { %s5971_s17 = smov (%p23_p0, %s22_s17), 0  ;;  %s5973_s18 = smov (!%p23_p0, %s25_s18), %s4400_s15 }
   0x7   : > { %p144_p3 = pnand %p3350_p1, %p143_p2  ;;  %p27_p4 = scmp.ge.s32.totalorder %s5973_s18, 2 }
   0x9   : > { %s5975_s18 = smov (%p27_p4, %s5973_s18), 0  ;;  %147 = sbr.rel (%p144_p3) target bundleno = 525 (0x20d), region = 32 }
  0x10   : > { %vm1176_vm0 = vcmask 1045504   ;;  %s3355_s19 = smul.u32 80, %s4388_s12  ;;  %v4326_v0 = vld [vmem:[%s5861_s1 + $0x10] sm:$0x3f]   ;;  %v4329_v1 = vld [vmem:[%s5861_s1 + $0x8] sm:$0x3f]  }
  0x11   : > { %s177_s22 = smul.u32 165, %s4392_s13  ;;  %4284 = vmatprep.subr.msk.bf16.mxu0 %vm1176_vm0, %v4326_v0  ;;  %v2047_v2 = vsel %vm1176_vm0, %v4326_v0, 0  ;;  %vm1079_vm1 = vcmask 97280   ;;  %4282 = vmatprep.subr.msk.bf16.mxu1 %vm1176_vm0, %v4329_v1  ;;  %v1178_v3 = vsel %vm1176_vm0, %v4329_v1, 0  ;;  %v4475_v4 = vld [vmem:[%s5861_s1] sm:$0x3f]  }
  0x12   : > { %3959 = vmatpush3.bf16.msra.mxu0 %v2047_v2  ;;  %3827 = vmatpush3.bf16.msra.mxu1 %v1178_v3  ;;  %v4485_v5 = vld [vmem:[%s5861_s1 + $0x18] sm:$0x3f]   ;;  %vm268_vm2 = vsmask.f32 3328  ;;  %vm269_vm3 = vsmask.f32 7440 }
  0x13   : > { %s178_s25 = sadd.s32 %s3355_s19, %s177_s22  ;;  %4283 = vmatprep.subr.msk.bf16.mxu1 %vm1176_vm0, %v4475_v4  ;;  %4285 = vmatprep.subr.msk.bf16.mxu0 %vm1176_vm0, %v4485_v5  ;;  %vm4551_vm4 = vmor %vm268_vm2, %vm269_vm3  ;;  %s3351_s7 = sshll.u32 %s4392_s13, 1  ;;  %vm3213_vm5 = vcmask 257024  }
  0x14   : > { %s3356_s26 = sshll.u32 %s178_s25, 2  ;;  %s165_s8 = sadd.s32 %s4388_s12, %s3351_s7 }
  0x15   : > { %s4480_s4 = scalar_lea.vmem %s5860_s0, %s3356_s26  ;;  %s3352_s9 = sshll.u32 %s165_s8, 6 }
  0x16   : > { %v186_v6 = vld [vmem:[%s4480_s4 + $0x14] sm:$0xf]  ;;  %v187_v7 = vld [vmem:[%s4480_s4 + $0x18] sm:$0xf]  ;;  %v188_v8 = vld [vmem:[%s4480_s4 + $0x1c] sm:$0xf] }
  0x17   : > { %v316_v9 = vshrl.u32 %v186_v6, 16  ;;  %v319_v10 = vshll.u32 %v186_v6, 16  ;;  %v325_v11 = vshll.u32 %v187_v7, 16  ;;  %v329_v12 = vshrl.u32 %v187_v7, 16  ;;  %v189_v13 = vld [vmem:[%s4480_s4 + $0x20] sm:$0xf] }
  0x18   : > { %v4495_v14 = vcombine.low %v186_v6, %v187_v7  ;;  %v335_v15 = vshll.u32 %v188_v8, 16  ;;  %v339_v16 = vshrl.u32 %v188_v8, 16  ;;  %v345_v17 = vshll.u32 %v189_v13, 16  ;;  %v191_v22 = vld [vmem:[%s4480_s4 + $0x28] sm:$0xf]  ;;  %p167_p5 = scmp.lt.s32.totalorder %s3352_s9, 255 }
  0x19   : > { %v318_v18 = vrot.slane %v316_v9, 4  ;;  %v321_v19 = vrot.slane %v319_v10, 5  ;;  %v4497_v20 = vrot.slane %v325_v11, 5  ;;  %v331_v21 = vrot.slane %v329_v12, 4  ;;  %v192_v26 = vld [vmem:[%s4480_s4 + $0x2c] sm:$0xf] }
  0x1a   : > { %3960 = vmatprep.mubr.msk.bf16.mxu0 %vm1079_vm1, %v4495_v14  ;;  %v4502_v23 = vrot.slane %v335_v15, 5  ;;  %v4504_v24 = vrot.slane %v339_v16, 4  ;;  %v349_v25 = vshrl.u32 %v189_v13, 16  ;;  %v4508_v29 = vcombine.low %v188_v8, %v189_v13  ;;  %v181_v31 = vld [vmem:[%s4480_s4] sm:$0xf]  ;;  %s5977_s9 = smov (!%p167_p5, %s3352_s9), 255 }
  0x1b   : > { %v322_v27 = vor.u32 %v321_v19, %v318_v18  ;;  %v332_v28 = vor.u32 %v331_v21, %v4497_v20  ;;  %v360_v30 = vshrl.u32 %v191_v22, 16  ;;  %v182_v32 = vld [vmem:[%s4480_s4 + $0x4] sm:$0xf]  ;;  %v4512_v33 = vrot.slane %v345_v17, 5  ;;  %v4517_v37 = vld [vmem:[%s4480_s4 + $0x8] sm:$0xf] }
  0x1c   : > { %v4514_v34 = vrot.slane %v349_v25, 4  ;;  %v363_v35 = vshll.u32 %v191_v22, 16  ;;  %v369_v36 = vshll.u32 %v192_v26, 16  ;;  %3961 = vmatmul.mubr.msk.bf16.vlgmr.msra.gmra.mrb[0].mxu0 %vm1079_vm1, %v4508_v29  ;;  %v373_v40 = vshrl.u32 %v192_v26, 16  ;;  %v4534_v45 = vld [vmem:[%s4480_s4 + $0xc] sm:$0xf] }
  0x1d   : > { %v4519_v38 = vrot.slane %v322_v27, 4  ;;  %v4521_v39 = vrot.slane %v332_v28, 4  ;;  %v4525_v41 = vcombine.low %v191_v22, %v192_v26  ;;  %v4527_v42 = vrot.slane %v360_v30, 4  ;;  %v193_v51 = vld [vmem:[%s4480_s4 + $0x30] sm:$0xf]  ;;  %s3353_s12 = sshll.u32 %s5977_s9, 2 }
  0x1e   : > { %v4529_v43 = vrot.slane %v363_v35, 5  ;;  %v4531_v44 = vrot.slane %v369_v36, 5  ;;  %v272_v46 = vshrl.u32 %v181_v31, 16  ;;  %v275_v47 = vshll.u32 %v181_v31, 16  ;;  %v194_v55 = vld [vmem:[%s4480_s4 + $0x34] sm:$0xf]  ;;  %s5520_s20 = scalar_lea.vmem %s5863_s3, %s3353_s12 }
  0x1f   : > { %3964 = vmatprep.mubr.msk.bf16.mxu0 %vm1079_vm1, %v4525_v41  ;;  %v281_v48 = vshll.u32 %v182_v32, 16  ;;  %v285_v49 = vshrl.u32 %v182_v32, 16  ;;  %v291_v50 = vshll.u32 %v4517_v37, 16  ;;  %v295_v53 = vshrl.u32 %v4517_v37, 16  ;;  %v185_v7 = vld [vmem:[%s4480_s4 + $0x10] sm:$0x1] }
  0x20   : > { %v274_v52 = vrot.slane %v272_v46, 4  ;;  %v379_v56 = vshll.u32 %v193_v51, 16  ;;  %v277_v57 = vrot.slane %v275_v47, 5  ;;  %v4544_v61 = vrot.slane %v373_v40, 4  ;;  %v196_v30 = vld [vmem:[%s4480_s4 + $0x3c] sm:$0xf] }
  0x21   : > { %v283_v58 = vrot.slane %v281_v48, 5  ;;  %v287_v59 = vrot.slane %v285_v49, 4  ;;  %v293_v60 = vrot.slane %v291_v50, 5  ;;  %v297_v62 = vrot.slane %v295_v53, 4  ;;  %v197_v31 = vld [vmem:[%s4480_s4 + $0x40] sm:$0xf] }
  0x22   : > { %v383_v63 = vshrl.u32 %v193_v51, 16  ;;  %v389_v0 = vshll.u32 %v194_v55, 16  ;;  %v278_v1 = vor.u32 %v277_v57, %v274_v52  ;;  %v393_v3 = vshrl.u32 %v194_v55, 16  ;;  %v198_v52 = vld [vmem:[%s4480_s4 + $0x44] sm:$0xf] }
  0x23   : > { %v288_v2 = vor.u32 %v287_v59, %v283_v58  ;;  %v4546_v6 = vcombine.low %v193_v51, %v194_v55  ;;  %v298_v9 = vor.u32 %v297_v62, %v293_v60  ;;  %v4555_v10 = vrot.slane %v379_v56, 5  ;;  %v199_v53 = vld [vmem:[%s4480_s4 + $0x48] sm:$0xf] }
  0x24   : > { %v4557_v11 = vrot.slane %v383_v63, 4  ;;  %v301_v12 = vshll.u32 %v4534_v45, 16  ;;  %v279_v13 = vrot.slane %v278_v1, 4  ;;  %v4560_v16 = vrot.slane %v389_v0, 5 }
  0x25   : > { %v289_v15 = vrot.slane %v288_v2, 4  ;;  %3965 = vmatmul.mubr.msk.bf16.gmra.mrb[4].mxu0 %vm1079_vm1, %v4546_v6  ;;  %v305_v17 = vshrl.u32 %v4534_v45, 16  ;;  %v299_v18 = vrot.slane %v298_v9, 4  ;;  %v4565_v19 = vrot.slane %v393_v3, 4  ;;  %v201_v2 = vld [vmem:[%s4480_s4 + $0x50] sm:$0xf] }
  0x26   : > { %v303_v21 = vrot.slane %v301_v12, 5  ;;  %v311_v22 = vshll.u32 %v185_v7, 16  ;;  %v284_v25 = vsel %vm4551_vm4, %v279_v13, %v283_v58  ;;  %v2467_v28 = vsel %vm1176_vm0, %v4485_v5, 0  ;;  %v202_v13 = vld [vmem:[%s4480_s4 + $0x54] sm:$0xf] }
  0x27   : > { %v294_v26 = vsel %vm4551_vm4, %v289_v15, %v293_v60  ;;  %v307_v27 = vrot.slane %v305_v17, 4  ;;  %v1731_v36 = vsel %vm1176_vm0, %v4475_v4, 0  ;;  %4025 = vmatpush3.bf16.msra.mxu0 %v2467_v28  ;;  %v404_v40 = vshrl.u32 %v196_v30, 16 }
  0x28   : > { %v3359_v32 = vcombine.low %v284_v25, %v294_v26  ;;  %v313_v35 = vrot.slane %v311_v22, 5  ;;  %v407_v47 = vshll.u32 %v196_v30, 16  ;;  %v413_v48 = vshll.u32 %v197_v31, 16 }
  0x29   : > { %v308_v46 = vor.u32 %v307_v27, %v303_v21  ;;  %v417_v49 = vshrl.u32 %v197_v31, 16  ;;  %v304_v5 = vsel %vm4551_vm4, %v299_v18, %v303_v21  ;;  %v4580_v50 = vcombine.low %v196_v30, %v197_v31 }
  0x2a   : > { %3828 = vmatprep.mubr.msk.bf16.mxu1 %vm1079_vm1, %v3359_v32  ;;  %v328_v51 = vsel %vm4551_vm4, %v4519_v38, %v4497_v20  ;;  %v338_v4 = vsel %vm4551_vm4, %v4521_v39, %v4502_v23  ;;  %v4592_v56 = vrot.slane %v404_v40, 4  ;;  %v4594_v57 = vrot.slane %v407_v47, 5  ;;  %v190_v39 = vld [vmem:[%s4480_s4 + $0x24] sm:$0x1]  ;;  %v204_v40 = vld [vmem:[%s4480_s4 + $0x5c] sm:$0xf] }
  0x2b   : > { %v309_v55 = vrot.slane %v308_v46, 4  ;;  %v4596_v58 = vrot.slane %v413_v48, 5  ;;  %v4598_v59 = vrot.slane %v417_v49, 4  ;;  %3968 = vmatprep.mubr.msk.bf16.mxu0 %vm1079_vm1, %v4580_v50  ;;  %v423_v20 = vshll.u32 %v198_v52, 16 }
  0x2c   : > { %v427_v38 = vshrl.u32 %v198_v52, 16  ;;  %v433_v60 = vshll.u32 %v199_v53, 16  ;;  %v4605_v63 = vcombine.low %v328_v51, %v338_v4  ;;  %v4607_v0 = vcombine.low %v198_v52, %v199_v53  ;;  %v195_v52 = vld [vmem:[%s4480_s4 + $0x38] sm:$0x1] }
  0x2d   : > { %v314_v62 = vsel %vm4551_vm4, %v309_v55, %v313_v35  ;;  %v342_v1 = vor.u32 %v4504_v24, %v4502_v23  ;;  %v4612_v7 = vrot.slane %v423_v20, 5  ;;  %v437_v12 = vshrl.u32 %v199_v53, 16 }
  0x2e   : > { %v3360_v3 = vcombine.low %v304_v5, %v314_v62  ;;  %v4614_v9 = vrot.slane %v427_v38, 4  ;;  %v4617_v15 = vrot.slane %v433_v60, 5  ;;  %3969 = vmatmul.mubr.msk.bf16.gmra.mrb[8].mxu0 %vm1079_vm1, %v4607_v0  ;;  %v352_v18 = vor.u32 %v4514_v34, %v4512_v33  ;;  %v203_v34 = vld [vmem:[%s4480_s4 + $0x58] sm:$0xf] }
  0x2f   : > { %v343_v17 = vrot.slane %v342_v1, 4  ;;  %v355_v21 = vshll.u32 %v190_v39, 16  ;;  %v448_v23 = vshrl.u32 %v201_v2, 16  ;;  %v451_v24 = vshll.u32 %v201_v2, 16 }
  0x30   : > { %3829 = vmatmul.mubr.msk.bf16.vlgmr.msra.gmra.mrb[0].mxu1 %vm1079_vm1, %v3360_v3  ;;  %v457_v22 = vshll.u32 %v202_v13, 16  ;;  %v461_v25 = vshrl.u32 %v202_v13, 16  ;;  %v353_v27 = vrot.slane %v352_v18, 4  ;;  %v4629_v30 = vcombine.low %v201_v2, %v202_v13  ;;  %v206_v3 = vld [vmem:[%s4480_s4 + $0x64] sm:$0xf] }
  0x31   : > { %3893 = vmatpush3.bf16.msra.mxu1 %v1731_v36  ;;  %3832 = vmatprep.mubr.msk.bf16.mxu1 %vm1079_vm1, %v4605_v63  ;;  %v348_v26 = vsel %vm4551_vm4, %v343_v17, %v4512_v33  ;;  %v357_v28 = vrot.slane %v355_v21, 5  ;;  %v4632_v31 = vrot.slane %v437_v12, 4  ;;  %v4634_v32 = vrot.slane %v448_v23, 4  ;;  %v207_v12 = vld [vmem:[%s4480_s4 + $0x68] sm:$0xf] }
  0x32   : > { %v4636_v35 = vrot.slane %v451_v24, 5  ;;  %v4638_v36 = vrot.slane %v457_v22, 5  ;;  %3972 = vmatprep.mubr.msk.bf16.mxu0 %vm1079_vm1, %v4629_v30  ;;  %v366_v33 = vor.u32 %v4529_v43, %v4527_v42  ;;  %v376_v47 = vor.u32 %v4544_v61, %v4531_v44 }
  0x33   : > { %v358_v46 = vsel %vm4551_vm4, %v353_v27, %v357_v28  ;;  %v467_v48 = vshll.u32 %v203_v34, 16  ;;  %v4651_v5 = vrot.slane %v461_v25, 4  ;;  %v471_v51 = vshrl.u32 %v203_v34, 16  ;;  %v209_v27 = vld [vmem:[%s4480_s4 + $0x70] sm:$0xf] }
  0x34   : > { %v4649_v49 = vcombine.low %v348_v26, %v358_v46  ;;  %v477_v4 = vshll.u32 %v204_v40, 16  ;;  %v367_v53 = vrot.slane %v366_v33, 4  ;;  %v377_v55 = vrot.slane %v376_v47, 4  ;;  %v208_v26 = vld [vmem:[%s4480_s4 + $0x6c] sm:$0xf] }
  0x35   : > { %v481_v20 = vshrl.u32 %v204_v40, 16  ;;  %v4654_v38 = vcombine.low %v203_v34, %v204_v40  ;;  %v4656_v60 = vrot.slane %v467_v48, 5  ;;  %v4658_v42 = vrot.slane %v471_v51, 4 }
  0x36   : > { %v4660_v43 = vrot.slane %v477_v4, 5  ;;  %v386_v61 = vor.u32 %v4557_v11, %v4555_v10  ;;  %v372_v39 = vsel %vm4551_vm4, %v367_v53, %v4531_v44  ;;  %v382_v62 = vsel %vm4551_vm4, %v377_v55, %v4555_v10  ;;  %v200_v55 = vld [vmem:[%s4480_s4 + $0x4c] sm:$0x1] }
  0x37   : > { %3973 = vmatmul.mubr.msk.bf16.gmra.mrb[12].mxu0 %vm1079_vm1, %v4654_v38  ;;  %v396_v1 = vor.u32 %v4565_v19, %v4560_v16  ;;  %v399_v2 = vshll.u32 %v195_v52, 16  ;;  %v4678_v11 = vcombine.low %v372_v39, %v382_v62  ;;  %v492_v13 = vshrl.u32 %v206_v3, 16 }
  0x38   : > { %3833 = vmatmul.mubr.msk.bf16.gmra.mrb[4].mxu1 %vm1079_vm1, %v4649_v49  ;;  %v387_v44 = vrot.slane %v386_v61, 4  ;;  %v495_v17 = vshll.u32 %v206_v3, 16  ;;  %v501_v21 = vshll.u32 %v207_v12, 16  ;;  %v505_v23 = vshrl.u32 %v207_v12, 16 }
  0x39   : > { %v397_v10 = vrot.slane %v396_v1, 4  ;;  %v401_v18 = vrot.slane %v399_v2, 5  ;;  %3836 = vmatprep.mubr.msk.bf16.mxu1 %vm1079_vm1, %v4678_v11  ;;  %v4682_v19 = vrot.slane %v481_v20, 4  ;;  %v4687_v22 = vrot.slane %v492_v13, 4  ;;  %v211_v2 = vld [vmem:[%s4480_s4 + $0x78] sm:$0xf] }
  0x3a   : > { %v392_v24 = vsel %vm4551_vm4, %v387_v44, %v4560_v16  ;;  %v4689_v25 = vcombine.low %v206_v3, %v207_v12  ;;  %v4695_v34 = vrot.slane %v495_v17, 5  ;;  %v4697_v40 = vrot.slane %v501_v21, 5  ;;  %v212_v12 = vld [vmem:[%s4480_s4 + $0x7c] sm:$0xf] }
  0x3b   : > { %v402_v28 = vsel %vm4551_vm4, %v397_v10, %v401_v18  ;;  %v410_v46 = vor.u32 %v4594_v57, %v4592_v56  ;;  %v420_v16 = vor.u32 %v4598_v59, %v4596_v58  ;;  %v511_v47 = vshll.u32 %v208_v26, 16 }
  0x3c   : > { %5899 = vst [vmem:[#allocation2_spill] sm:$0xff] %v4689_v25  ;;  %v4701_v33 = vcombine.low %v392_v24, %v402_v28  ;;  %3976 = vmatprep.mubr.msk.bf16.mxu0 %vm1079_vm1, %v4689_v25  ;;  %v515_v48 = vshrl.u32 %v208_v26, 16  ;;  %v4707_v51 = vrot.slane %v505_v23, 4  ;;  %v521_v52 = vshll.u32 %v209_v27, 16 }
  0x3d   : > { %v411_v4 = vrot.slane %v410_v46, 4  ;;  %v4709_v53 = vcombine.low %v208_v26, %v209_v27  ;;  %v421_v56 = vrot.slane %v420_v16, 4  ;;  %v4712_v57 = vrot.slane %v511_v47, 5  ;;  %v213_v46 = vld [vmem:[%s4480_s4 + $0x80] sm:$0xf] }
  0x3e   : > { %v525_v20 = vshrl.u32 %v209_v27, 16  ;;  %v430_v61 = vor.u32 %v4614_v9, %v4612_v7  ;;  %v4719_v39 = vrot.slane %v515_v48, 4  ;;  %v4721_v62 = vrot.slane %v521_v52, 5  ;;  %v214_v16 = vld [vmem:[%s4480_s4 + $0x84] sm:$0xf] }
  0x3f   : > { %5900 = vst [vmem:[#allocation3_spill] sm:$0xff] %v4709_v53  ;;  %v416_v59 = vsel %vm4551_vm4, %v411_v4, %v4596_v58  ;;  %3977 = vmatmul.mubr.msk.bf16.gmra.mrb[16].mxu0 %vm1079_vm1, %v4709_v53  ;;  %v440_v1 = vor.u32 %v4632_v31, %v4617_v15  ;;  %v426_v9 = vsel %vm4551_vm4, %v421_v56, %v4612_v7  ;;  %v443_v58 = vshll.u32 %v200_v55, 16 }
  0x40   : > { %3837 = vmatmul.mubr.msk.bf16.gmra.mrb[8].mxu1 %vm1079_vm1, %v4701_v33  ;;  %v431_v3 = vrot.slane %v430_v61, 4  ;;  %v536_v44 = vshrl.u32 %v211_v2, 16  ;;  %v4734_v13 = vcombine.low %v416_v59, %v426_v9  ;;  %v539_v10 = vshll.u32 %v211_v2, 16 }
  0x41   : > { %v441_v17 = vrot.slane %v440_v1, 4  ;;  %v545_v18 = vshll.u32 %v212_v12, 16  ;;  %v4736_v31 = vrot.slane %v525_v20, 4  ;;  %v445_v23 = vrot.slane %v443_v58, 5 }
  0x42   : > { %v436_v21 = vsel %vm4551_vm4, %v431_v3, %v4617_v15  ;;  %v549_v24 = vshrl.u32 %v212_v12, 16  ;;  %3840 = vmatprep.mubr.msk.bf16.mxu1 %vm1079_vm1, %v4734_v13  ;;  %v4743_v7 = vrot.slane %v536_v44, 4  ;;  %v4745_v26 = vrot.slane %v539_v10, 5 }
  0x43   : > { %v4747_v27 = vcombine.low %v211_v2, %v212_v12  ;;  %v454_v28 = vor.u32 %v4636_v35, %v4634_v32  ;;  %v446_v15 = vsel %vm4551_vm4, %v441_v17, %v445_v23  ;;  %v4755_v47 = vrot.slane %v545_v18, 5  ;;  %v205_v32 = vld [vmem:[%s4480_s4 + $0x60] sm:$0x1]  ;;  %v216_v17 = vld [vmem:[%s4480_s4 + $0x8c] sm:$0xf] }
  0x44   : > { %v464_v48 = vor.u32 %v4651_v5, %v4638_v36  ;;  %v555_v4 = vshll.u32 %v213_v46, 16  ;;  %v4759_v52 = vcombine.low %v436_v21, %v446_v15  ;;  %v559_v56 = vshrl.u32 %v213_v46, 16 }
  0x45   : > { %5901 = vst [vmem:[#allocation4_spill] sm:$0xff] %v4747_v27  ;;  %3980 = vmatprep.mubr.msk.bf16.mxu0 %vm1079_vm1, %v4747_v27  ;;  %v455_v55 = vrot.slane %v454_v28, 4  ;;  %v565_v20 = vshll.u32 %v214_v16, 16  ;;  %v4764_v35 = vrot.slane %v549_v24, 4  ;;  %v4768_v1 = vcombine.low %v213_v46, %v214_v16 }
  0x46   : > { %v465_v61 = vrot.slane %v464_v48, 4  ;;  %v4766_v59 = vrot.slane %v555_v4, 5  ;;  %v4773_v2 = vrot.slane %v559_v56, 4  ;;  %v569_v9 = vshrl.u32 %v214_v16, 16  ;;  %v218_v4 = vld [vmem:[%s4480_s4 + $0x94] sm:$0xf] }
  0x47   : > { %5902 = vst [vmem:[#allocation5_spill] sm:$0xff] %v4768_v1  ;;  %v460_v5 = vsel %vm4551_vm4, %v455_v55, %v4638_v36  ;;  %v474_v3 = vor.u32 %v4658_v42, %v4656_v60  ;;  %v4782_v12 = vrot.slane %v565_v20, 5  ;;  %3981 = vmatmul.mubr.msk.bf16.gmra.mrb[20].mxu0 %vm1079_vm1, %v4768_v1  ;;  %v484_v36 = vor.u32 %v4682_v19, %v4660_v43  ;;  %v217_v42 = vld [vmem:[%s4480_s4 + $0x90] sm:$0xf]  ;;  %v219_v55 = vld [vmem:[%s4480_s4 + $0x98] sm:$0xf] }
  0x48   : > { %3841 = vmatmul.mubr.msk.bf16.gmra.mrb[12].mxu1 %vm1079_vm1, %v4759_v52  ;;  %v470_v58 = vsel %vm4551_vm4, %v465_v61, %v4656_v60  ;;  %v487_v44 = vshll.u32 %v205_v32, 16  ;;  %v580_v21 = vshrl.u32 %v216_v17, 16  ;;  %v583_v23 = vshll.u32 %v216_v17, 16 }
  0x49   : > { %v4790_v10 = vcombine.low %v460_v5, %v470_v58  ;;  %v475_v18 = vrot.slane %v474_v3, 4  ;;  %v485_v24 = vrot.slane %v484_v36, 4  ;;  %v589_v28 = vshll.u32 %v217_v42, 16 }
  0x4a   : > { %v489_v60 = vrot.slane %v487_v44, 5  ;;  %v593_v46 = vshrl.u32 %v217_v42, 16  ;;  %v4794_v16 = vrot.slane %v569_v9, 4  ;;  %v4799_v15 = vrot.slane %v580_v21, 4 }
  0x4b   : > { %3844 = vmatprep.mubr.msk.bf16.mxu1 %vm1079_vm1, %v4790_v10  ;;  %v480_v19 = vsel %vm4551_vm4, %v475_v18, %v4660_v43  ;;  %v4801_v48 = vcombine.low %v216_v17, %v217_v42  ;;  %v4807_v20 = vrot.slane %v583_v23, 5  ;;  %v4809_v32 = vrot.slane %v589_v28, 5  ;;  %v210_v42 = vld [vmem:[%s4480_s4 + $0x74] sm:$0x1]  ;;  %v221_v28 = vld [vmem:[%s4480_s4 + $0xa0] sm:$0xf] }
  0x4c   : > { %v490_v56 = vsel %vm4551_vm4, %v485_v24, %v489_v60  ;;  %v498_v61 = vor.u32 %v4695_v34, %v4687_v22  ;;  %v508_v43 = vor.u32 %v4707_v51, %v4697_v40  ;;  %v599_v9 = vshll.u32 %v218_v4, 16 }
  0x4d   : > { %5903 = vst [vmem:[#allocation6_spill] sm:$0xff] %v4801_v48  ;;  %v4813_v5 = vcombine.low %v480_v19, %v490_v56  ;;  %3984 = vmatprep.mubr.msk.bf16.mxu0 %vm1079_vm1, %v4801_v48  ;;  %v603_v3 = vshrl.u32 %v218_v4, 16  ;;  %v4819_v58 = vrot.slane %v593_v46, 4  ;;  %v609_v44 = vshll.u32 %v219_v55, 16 }
  0x4e   : > { %v499_v36 = vrot.slane %v498_v61, 4  ;;  %v4821_v17 = vcombine.low %v218_v4, %v219_v55  ;;  %v509_v22 = vrot.slane %v508_v43, 4  ;;  %v4824_v34 = vrot.slane %v599_v9, 5  ;;  %v222_v4 = vld [vmem:[%s4480_s4 + $0xa4] sm:$0xf] }
  0x4f   : > { %v613_v18 = vshrl.u32 %v219_v55, 16  ;;  %v518_v21 = vor.u32 %v4719_v39, %v4712_v57  ;;  %v4833_v23 = vrot.slane %v603_v3, 4  ;;  %v4835_v24 = vrot.slane %v609_v44, 5 }
  0x50   : > { %5904 = vst [vmem:[#allocation7_spill] sm:$0xff] %v4821_v17  ;;  %3845 = vmatmul.mubr.msk.bf16.gmra.mrb[16].mxu1 %vm1079_vm1, %v4813_v5  ;;  %v504_v51 = vsel %vm4551_vm4, %v499_v36, %v4697_v40  ;;  %3985 = vmatmul.mubr.msk.bf16.gmra.mrb[24].mxu0 %vm1079_vm1, %v4821_v17  ;;  %v528_v60 = vor.u32 %v4736_v31, %v4721_v62  ;;  %v531_v19 = vshll.u32 %v210_v42, 16  ;;  %v624_v40 = vshrl.u32 %v221_v28, 16 }
  0x51   : > { %v514_v39 = vsel %vm4551_vm4, %v509_v22, %v4712_v57  ;;  %v519_v46 = vrot.slane %v518_v21, 4  ;;  %v627_v61 = vshll.u32 %v221_v28, 16  ;;  %v633_v43 = vshll.u32 %v222_v4, 16  ;;  %v224_v21 = vld [vmem:[%s4480_s4 + $0xac] sm:$0xf] }
  0x52   : > { %v4846_v55 = vcombine.low %v504_v51, %v514_v39  ;;  %v529_v56 = vrot.slane %v528_v60, 4  ;;  %v4848_v9 = vrot.slane %v613_v18, 4  ;;  %v533_v3 = vrot.slane %v531_v19, 5  ;;  %v223_v18 = vld [vmem:[%s4480_s4 + $0xa8] sm:$0xf] }
  0x53   : > { %v524_v31 = vsel %vm4551_vm4, %v519_v46, %v4721_v62  ;;  %v637_v36 = vshrl.u32 %v222_v4, 16  ;;  %v4855_v57 = vrot.slane %v624_v40, 4  ;;  %v4857_v44 = vrot.slane %v627_v61, 5 }
  0x54   : > { %3848 = vmatprep.mubr.msk.bf16.mxu1 %vm1079_vm1, %v4846_v55  ;;  %v4859_v42 = vcombine.low %v221_v28, %v222_v4  ;;  %v542_v22 = vor.u32 %v4745_v26, %v4743_v7  ;;  %v534_v62 = vsel %vm4551_vm4, %v529_v56, %v533_v3  ;;  %v4867_v51 = vrot.slane %v633_v43, 5  ;;  %v215_v7 = vld [vmem:[%s4480_s4 + $0x88] sm:$0x1] }
  0x55   : > { %v552_v60 = vor.u32 %v4764_v35, %v4755_v47  ;;  %v643_v39 = vshll.u32 %v223_v18, 16  ;;  %v4871_v46 = vcombine.low %v524_v31, %v534_v62  ;;  %v647_v19 = vshrl.u32 %v223_v18, 16 }
  0x56   : > { %5905 = vst [vmem:[#allocation8_spill] sm:$0xff] %v4859_v42  ;;  %3988 = vmatprep.mubr.msk.bf16.mxu0 %vm1079_vm1, %v4859_v42  ;;  %v543_v28 = vrot.slane %v542_v22, 4  ;;  %v653_v4 = vshll.u32 %v224_v21, 16  ;;  %v4876_v26 = vrot.slane %v637_v36, 4  ;;  %v4880_v61 = vcombine.low %v223_v18, %v224_v21 }
  0x57   : > { %v553_v40 = vrot.slane %v552_v60, 4  ;;  %v4878_v56 = vrot.slane %v643_v39, 5  ;;  %v4887_v43 = vrot.slane %v647_v19, 4  ;;  %v657_v31 = vshrl.u32 %v224_v21, 16  ;;  %v227_v21 = vld [vmem:[%s4480_s4 + $0xb8] sm:$0xf] }
  0x58   : > { %5906 = vst [vmem:[#allocation9_spill] sm:$0xff] %v4880_v61  ;;  %3849 = vmatmul.mubr.msk.bf16.gmra.mrb[20].mxu1 %vm1079_vm1, %v4871_v46  ;;  %v548_v35 = vsel %vm4551_vm4, %v543_v28, %v4755_v47  ;;  %v562_v3 = vor.u32 %v4773_v2, %v4766_v59  ;;  %v4894_v22 = vrot.slane %v653_v4, 5  ;;  %3989 = vmatmul.mubr.msk.bf16.gmra.mrb[28].mxu0 %vm1079_vm1, %v4880_v61  ;;  %v575_v62 = vshll.u32 %v215_v7, 16  ;;  %v226_v47 = vld [vmem:[%s4480_s4 + $0xb4] sm:$0xf] }
  0x59   : > { %v558_v36 = vsel %vm4551_vm4, %v553_v40, %v4766_v59  ;;  %v572_v18 = vor.u32 %v4794_v16, %v4782_v12  ;;  %v668_v39 = vshrl.u32 %v226_v47, 16  ;;  %v671_v28 = vshll.u32 %v226_v47, 16 }
  0x5a   : > { %v4902_v60 = vcombine.low %v548_v35, %v558_v36  ;;  %v563_v2 = vrot.slane %v562_v3, 4  ;;  %v577_v59 = vrot.slane %v575_v62, 5  ;;  %v677_v4 = vshll.u32 %v227_v21, 16  ;;  %v228_v3 = vld [vmem:[%s4480_s4 + $0xbc] sm:$0xf] }
  0x5b   : > { %v573_v19 = vrot.slane %v572_v18, 4  ;;  %v681_v40 = vshrl.u32 %v227_v21, 16  ;;  %v4906_v54 = vrot.slane %v657_v31, 4  ;;  %v4911_v7 = vrot.slane %v668_v39, 4  ;;  %v229_v36 = vld [vmem:[%s4480_s4 + $0xc0] sm:$0xf] }
  0x5c   : > { %3852 = vmatprep.mubr.msk.bf16.mxu1 %vm1079_vm1, %v4902_v60  ;;  %v568_v16 = vsel %vm4551_vm4, %v563_v2, %v4782_v12  ;;  %v4913_v35 = vcombine.low %v226_v47, %v227_v21  ;;  %v4919_v62 = vrot.slane %v671_v28, 5  ;;  %v4921_v61 = vrot.slane %v677_v4, 5 }
  0x5d   : > { %v578_v18 = vsel %vm4551_vm4, %v573_v19, %v577_v59  ;;  %v586_v31 = vor.u32 %v4807_v20, %v4799_v15  ;;  %v596_v12 = vor.u32 %v4819_v58, %v4809_v32  ;;  %v687_v47 = vshll.u32 %v228_v3, 16  ;;  %v220_v59 = vld [vmem:[%s4480_s4 + $0x9c] sm:$0x1] }
  0x5e   : > { %5907 = vst [vmem:[#allocation10_spill] sm:$0xff] %v4913_v35  ;;  %v4925_v42 = vcombine.low %v568_v16, %v578_v18  ;;  %3992 = vmatprep.mubr.msk.bf16.mxu0 %vm1079_vm1, %v4913_v35  ;;  %v691_v21 = vshrl.u32 %v228_v3, 16  ;;  %v4931_v2 = vrot.slane %v681_v40, 4  ;;  %v697_v28 = vshll.u32 %v229_v36, 16 }
  0x5f   : > { %v587_v39 = vrot.slane %v586_v31, 4  ;;  %v4933_v19 = vcombine.low %v228_v3, %v229_v36  ;;  %v597_v15 = vrot.slane %v596_v12, 4  ;;  %v4938_v20 = vrot.slane %v687_v47, 5  ;;  %v231_v31 = vld [vmem:[%s4480_s4 + $0xc8] sm:$0xf] }
  0x60   : > { %3853 = vmatmul.mubr.msk.bf16.gmra.mrb[24].mxu1 %vm1079_vm1, %v4925_v42  ;;  %v701_v4 = vshrl.u32 %v229_v36, 16  ;;  %v606_v58 = vor.u32 %v4833_v23, %v4824_v34  ;;  %v4945_v16 = vrot.slane %v691_v21, 4  ;;  %v4947_v3 = vrot.slane %v697_v28, 5  ;;  %v232_v47 = vld [vmem:[%s4480_s4 + $0xcc] sm:$0xf] }
  0x61   : > { %5908 = vst [vmem:[#allocation11_spill] sm:$0xff] %v4933_v19  ;;  %v592_v40 = vsel %vm4551_vm4, %v587_v39, %v4809_v32  ;;  %3993 = vmatmul.mubr.msk.bf16.gmra.mrb[32].mxu0 %vm1079_vm1, %v4933_v19  ;;  %v616_v18 = vor.u32 %v4848_v9, %v4835_v24  ;;  %v602_v36 = vsel %vm4551_vm4, %v597_v15, %v4824_v34  ;;  %v619_v12 = vshll.u32 %v220_v59, 16 }
  0x62   : > { %v607_v23 = vrot.slane %v606_v58, 4  ;;  %v712_v32 = vshrl.u32 %v231_v31, 16  ;;  %v4958_v21 = vcombine.low %v592_v40, %v602_v36  ;;  %v715_v28 = vshll.u32 %v231_v31, 16  ;;  %v233_v58 = vld [vmem:[%s4480_s4 + $0xd0] sm:$0xf] }
  0x63   : > { %v617_v39 = vrot.slane %v616_v18, 4  ;;  %v721_v35 = vshll.u32 %v232_v47, 16  ;;  %v4960_v19 = vrot.slane %v701_v4, 4  ;;  %v621_v17 = vrot.slane %v619_v12, 5  ;;  %v234_v40 = vld [vmem:[%s4480_s4 + $0xd4] sm:$0xf] }
  0x64   : > { %v612_v9 = vsel %vm4551_vm4, %v607_v23, %v4835_v24  ;;  %v725_v48 = vshrl.u32 %v232_v47, 16  ;;  %3856 = vmatprep.mubr.msk.bf16.mxu1 %vm1079_vm1, %v4958_v21  ;;  %v4967_v34 = vrot.slane %v712_v32, 4  ;;  %v4969_v59 = vrot.slane %v715_v28, 5 }
  0x65   : > { %v4971_v15 = vcombine.low %v231_v31, %v232_v47  ;;  %v630_v4 = vor.u32 %v4857_v44, %v4855_v57  ;;  %v622_v24 = vsel %vm4551_vm4, %v617_v39, %v621_v17  ;;  %v4979_v18 = vrot.slane %v721_v35, 5  ;;  %v225_v57 = vld [vmem:[%s4480_s4 + $0xb0] sm:$0x1] }
  0x66   : > { %v640_v36 = vor.u32 %v4876_v26, %v4867_v51  ;;  %v731_v23 = vshll.u32 %v233_v58, 16  ;;  %v4983_v12 = vcombine.low %v612_v9, %v622_v24  ;;  %v735_v47 = vshrl.u32 %v233_v58, 16 }
  0x67   : > { %5909 = vst [vmem:[#allocation12_spill] sm:$0xff] %v4971_v15  ;;  %3996 = vmatprep.mubr.msk.bf16.mxu0 %vm1079_vm1, %v4971_v15  ;;  %v631_v31 = vrot.slane %v630_v4, 4  ;;  %v741_v32 = vshll.u32 %v234_v40, 16  ;;  %v4988_v44 = vrot.slane %v725_v48, 4  ;;  %v4992_v39 = vcombine.low %v233_v58, %v234_v40 }
  0x68   : > { %v641_v17 = vrot.slane %v640_v36, 4  ;;  %v4990_v35 = vrot.slane %v731_v23, 5  ;;  %3857 = vmatmul.mubr.msk.bf16.gmra.mrb[28].mxu1 %vm1079_vm1, %v4983_v12  ;;  %v4999_v28 = vrot.slane %v735_v47, 4  ;;  %v745_v9 = vshrl.u32 %v234_v40, 16  ;;  %v237_v40 = vld [vmem:[%s4480_s4 + $0xe0] sm:$0xf] }
  0x69   : > { %5910 = vst [vmem:[#allocation13_spill] sm:$0xff] %v4992_v39  ;;  %v636_v26 = vsel %vm4551_vm4, %v631_v31, %v4867_v51  ;;  %v650_v4 = vor.u32 %v4887_v43, %v4878_v56  ;;  %v5006_v24 = vrot.slane %v741_v32, 5  ;;  %3997 = vmatmul.mubr.msk.bf16.gmra.mrb[36].mxu0 %vm1079_vm1, %v4992_v39  ;;  %v660_v58 = vor.u32 %v4906_v54, %v4894_v22  ;;  %v236_v51 = vld [vmem:[%s4480_s4 + $0xdc] sm:$0xf] }
  0x6a   : > { %v646_v48 = vsel %vm4551_vm4, %v641_v17, %v4878_v56  ;;  %v663_v36 = vshll.u32 %v225_v57, 16  ;;  %v756_v31 = vshrl.u32 %v236_v51, 16  ;;  %v759_v47 = vshll.u32 %v236_v51, 16 }
  0x6b   : > { %v5014_v23 = vcombine.low %v636_v26, %v646_v48  ;;  %v651_v43 = vrot.slane %v650_v4, 4  ;;  %v661_v15 = vrot.slane %v660_v58, 4  ;;  %v765_v32 = vshll.u32 %v237_v40, 16  ;;  %v238_v4 = vld [vmem:[%s4480_s4 + $0xe4] sm:$0xf] }
  0x6c   : > { %v665_v56 = vrot.slane %v663_v36, 5  ;;  %v769_v17 = vshrl.u32 %v237_v40, 16  ;;  %v5018_v39 = vrot.slane %v745_v9, 4  ;;  %v5023_v57 = vrot.slane %v756_v31, 4  ;;  %v239_v48 = vld [vmem:[%s4480_s4 + $0xe8] sm:$0xf] }
  0x6d   : > { %5911 = vst [vmem:[#allocation14_spill] sm:$0xff] %v5014_v23  ;;  %3860 = vmatprep.mubr.msk.bf16.mxu1 %vm1079_vm1, %v5014_v23  ;;  %v656_v54 = vsel %vm4551_vm4, %v651_v43, %v4894_v22  ;;  %v5025_v26 = vcombine.low %v236_v51, %v237_v40  ;;  %v5031_v36 = vrot.slane %v759_v47, 5  ;;  %v5033_v1 = vrot.slane %v765_v32, 5 }
  0x6e   : > { %v666_v58 = vsel %vm4551_vm4, %v661_v15, %v665_v56  ;;  %v674_v9 = vor.u32 %v4919_v62, %v4911_v7  ;;  %v684_v22 = vor.u32 %v4931_v2, %v4921_v61  ;;  %v775_v51 = vshll.u32 %v238_v4, 16  ;;  %v230_v56 = vld [vmem:[%s4480_s4 + $0xc4] sm:$0x1] }
  0x6f   : > { %5912 = vst [vmem:[#allocation15_spill] sm:$0xff] %v5025_v26  ;;  %v5037_v27 = vcombine.low %v656_v54, %v666_v58  ;;  %4000 = vmatprep.mubr.msk.bf16.mxu0 %vm1079_vm1, %v5025_v26  ;;  %v779_v40 = vshrl.u32 %v238_v4, 16  ;;  %v5043_v43 = vrot.slane %v769_v17, 4  ;;  %v785_v31 = vshll.u32 %v239_v48, 16 }
  0x70   : > { %v675_v15 = vrot.slane %v674_v9, 4  ;;  %v5045_v47 = vcombine.low %v238_v4, %v239_v48  ;;  %v685_v7 = vrot.slane %v684_v22, 4  ;;  %v5050_v62 = vrot.slane %v775_v51, 5  ;;  %v241_v9 = vld [vmem:[%s4480_s4 + $0xf0] sm:$0xf] }
  0x71   : > { %5913 = vst [vmem:[#allocation16_spill] sm:$0xff] %v5037_v27  ;;  %3861 = vmatmul.mubr.msk.bf16.gmra.mrb[32].mxu1 %vm1079_vm1, %v5037_v27  ;;  %v789_v32 = vshrl.u32 %v239_v48, 16  ;;  %v694_v2 = vor.u32 %v4945_v16, %v4938_v20  ;;  %v5057_v54 = vrot.slane %v779_v40, 4  ;;  %v5059_v4 = vrot.slane %v785_v31, 5  ;;  %v242_v51 = vld [vmem:[%s4480_s4 + $0xf4] sm:$0xf] }
  0x72   : > { %5914 = vst [vmem:[#allocation17_spill] sm:$0xff] %v5045_v47  ;;  %v680_v17 = vsel %vm4551_vm4, %v675_v15, %v4921_v61  ;;  %4001 = vmatmul.mubr.msk.bf16.gmra.mrb[40].mxu0 %vm1079_vm1, %v5045_v47  ;;  %v704_v58 = vor.u32 %v4960_v19, %v4947_v3  ;;  %v690_v48 = vsel %vm4551_vm4, %v685_v7, %v4938_v20  ;;  %v707_v22 = vshll.u32 %v230_v56, 16 }
  0x73   : > { %v695_v16 = vrot.slane %v694_v2, 4  ;;  %v800_v61 = vshrl.u32 %v241_v9, 16  ;;  %v5070_v40 = vcombine.low %v680_v17, %v690_v48  ;;  %v803_v31 = vshll.u32 %v241_v9, 16  ;;  %v243_v2 = vld [vmem:[%s4480_s4 + $0xf8] sm:$0xf] }
  0x74   : > { %v705_v15 = vrot.slane %v704_v58, 4  ;;  %v809_v26 = vshll.u32 %v242_v51, 16  ;;  %v5072_v47 = vrot.slane %v789_v32, 4  ;;  %v709_v53 = vrot.slane %v707_v22, 5  ;;  %v244_v17 = vld [vmem:[%s4480_s4 + $0xfc] sm:$0xf] }
  0x75   : > { %5915 = vst [vmem:[#allocation18_spill] sm:$0xff] %v5070_v40  ;;  %v700_v19 = vsel %vm4551_vm4, %v695_v16, %v4947_v3  ;;  %v813_v27 = vshrl.u32 %v242_v51, 16  ;;  %3864 = vmatprep.mubr.msk.bf16.mxu1 %vm1079_vm1, %v5070_v40  ;;  %v5079_v20 = vrot.slane %v800_v61, 4  ;;  %v5081_v56 = vrot.slane %v803_v31, 5 }
  0x76   : > { %v5083_v7 = vcombine.low %v241_v9, %v242_v51  ;;  %v718_v32 = vor.u32 %v4969_v59, %v4967_v34  ;;  %v710_v3 = vsel %vm4551_vm4, %v705_v15, %v709_v53  ;;  %v5091_v58 = vrot.slane %v809_v26, 5  ;;  %v235_v34 = vld [vmem:[%s4480_s4 + $0xd8] sm:$0x1] }
  0x77   : > { %v728_v48 = vor.u32 %v4988_v44, %v4979_v18  ;;  %v819_v16 = vshll.u32 %v243_v2, 16  ;;  %v5095_v22 = vcombine.low %v700_v19, %v710_v3  ;;  %v823_v51 = vshrl.u32 %v243_v2, 16 }
  0x78   : > { %5916 = vst [vmem:[#allocation19_spill] sm:$0xff] %v5083_v7  ;;  %4004 = vmatprep.mubr.msk.bf16.mxu0 %vm1079_vm1, %v5083_v7  ;;  %v719_v9 = vrot.slane %v718_v32, 4  ;;  %v829_v61 = vshll.u32 %v244_v17, 16  ;;  %v5100_v59 = vrot.slane %v813_v27, 4  ;;  %v5104_v15 = vcombine.low %v243_v2, %v244_v17 }
  0x79   : > { %5917 = vst [vmem:[#allocation20_spill] sm:$0xff] %v5095_v22  ;;  %v729_v53 = vrot.slane %v728_v48, 4  ;;  %v5102_v26 = vrot.slane %v819_v16, 5  ;;  %3865 = vmatmul.mubr.msk.bf16.gmra.mrb[36].mxu1 %vm1079_vm1, %v5095_v22  ;;  %v5111_v31 = vrot.slane %v823_v51, 4  ;;  %v833_v19 = vshrl.u32 %v244_v17, 16 }
  0x7a   : > { %5918 = vst [vmem:[#allocation21_spill] sm:$0xff] %v5104_v15  ;;  %v724_v44 = vsel %vm4551_vm4, %v719_v9, %v4979_v18  ;;  %v738_v32 = vor.u32 %v4999_v28, %v4990_v35  ;;  %v5118_v3 = vrot.slane %v829_v61, 5  ;;  %4005 = vmatmul.mubr.msk.bf16.gmra.mrb[44].mxu0 %vm1079_vm1, %v5104_v15  ;;  %v748_v2 = vor.u32 %v5018_v39, %v5006_v24  ;;  %v246_v18 = vld [vmem:[%s4480_s4 + $0x104] sm:$0xf]  ;;  %v247_v17 = vld [vmem:[%s4480_s4 + $0x108] sm:$0xf] }
  0x7b   : > { %v734_v27 = vsel %vm4551_vm4, %v729_v53, %v4990_v35  ;;  %v751_v48 = vshll.u32 %v235_v34, 16  ;;  %v844_v9 = vshrl.u32 %v246_v18, 16  ;;  %v847_v51 = vshll.u32 %v246_v18, 16 }
  0x7c   : > { %v5126_v16 = vcombine.low %v724_v44, %v734_v27  ;;  %v739_v28 = vrot.slane %v738_v32, 4  ;;  %v749_v7 = vrot.slane %v748_v2, 4  ;;  %v853_v61 = vshll.u32 %v247_v17, 16  ;;  %v248_v32 = vld [vmem:[%s4480_s4 + $0x10c] sm:$0xf] }
  0x7d   : > { %v753_v35 = vrot.slane %v751_v48, 5  ;;  %v857_v53 = vshrl.u32 %v247_v17, 16  ;;  %v5130_v15 = vrot.slane %v833_v19, 4  ;;  %v5135_v34 = vrot.slane %v844_v9, 4  ;;  %v249_v27 = vld [vmem:[%s4480_s4 + $0x110] sm:$0xf] }
  0x7e   : > { %5919 = vst [vmem:[#allocation22_spill] sm:$0xff] %v5126_v16  ;;  %3868 = vmatprep.mubr.msk.bf16.mxu1 %vm1079_vm1, %v5126_v16  ;;  %v744_v39 = vsel %vm4551_vm4, %v739_v28, %v5006_v24  ;;  %v5137_v44 = vcombine.low %v246_v18, %v247_v17  ;;  %v5143_v48 = vrot.slane %v847_v51, 5  ;;  %v5145_v22 = vrot.slane %v853_v61, 5 }
  0x7f   : > { %v754_v2 = vsel %vm4551_vm4, %v749_v7, %v753_v35  ;;  %v762_v19 = vor.u32 %v5031_v36, %v5023_v57  ;;  %v772_v24 = vor.u32 %v5043_v43, %v5033_v1  ;;  %v863_v18 = vshll.u32 %v248_v32, 16  ;;  %v240_v35 = vld [vmem:[%s4480_s4 + $0xec] sm:$0x1] }
  0x80   : > { %5920 = vst [vmem:[#allocation23_spill] sm:$0xff] %v5137_v44  ;;  %v5149_v16 = vcombine.low %v744_v39, %v754_v2  ;;  %4008 = vmatprep.mubr.msk.bf16.mxu0 %vm1079_vm1, %v5137_v44  ;;  %v867_v17 = vshrl.u32 %v248_v32, 16  ;;  %v5155_v28 = vrot.slane %v857_v53, 4  ;;  %v873_v9 = vshll.u32 %v249_v27, 16 }
  0x81   : > { %v763_v7 = vrot.slane %v762_v19, 4  ;;  %v5157_v51 = vcombine.low %v248_v32, %v249_v27  ;;  %v773_v57 = vrot.slane %v772_v24, 4  ;;  %v5162_v36 = vrot.slane %v863_v18, 5  ;;  %v251_v19 = vld [vmem:[%s4480_s4 + $0x118] sm:$0xf] }
  0x82   : > { %5921 = vst [vmem:[#allocation24_spill] sm:$0xff] %v5149_v16  ;;  %3869 = vmatmul.mubr.msk.bf16.gmra.mrb[40].mxu1 %vm1079_vm1, %v5149_v16  ;;  %v877_v61 = vshrl.u32 %v249_v27, 16  ;;  %v782_v43 = vor.u32 %v5057_v54, %v5050_v62  ;;  %v5169_v39 = vrot.slane %v867_v17, 4  ;;  %v5171_v32 = vrot.slane %v873_v9, 5  ;;  %v252_v18 = vld [vmem:[%s4480_s4 + $0x11c] sm:$0xf] }
  0x83   : > { %5922 = vst [vmem:[#allocation25_spill] sm:$0xff] %v5157_v51  ;;  %v768_v53 = vsel %vm4551_vm4, %v763_v7, %v5033_v1  ;;  %4009 = vmatmul.mubr.msk.bf16.gmra.mrb[48].mxu0 %vm1079_vm1, %v5157_v51  ;;  %v792_v2 = vor.u32 %v5072_v47, %v5059_v4  ;;  %v778_v27 = vsel %vm4551_vm4, %v773_v57, %v5050_v62  ;;  %v795_v24 = vshll.u32 %v240_v35, 16 }
  0x84   : > { %v783_v54 = vrot.slane %v782_v43, 4  ;;  %v888_v1 = vshrl.u32 %v251_v19, 16  ;;  %v5182_v17 = vcombine.low %v768_v53, %v778_v27  ;;  %v891_v9 = vshll.u32 %v251_v19, 16  ;;  %v253_v43 = vld [vmem:[%s4480_s4 + $0x120] sm:$0xf] }
  0x85   : > { %v793_v7 = vrot.slane %v792_v2, 4  ;;  %v897_v44 = vshll.u32 %v252_v18, 16  ;;  %v5184_v51 = vrot.slane %v877_v61, 4  ;;  %v797_v16 = vrot.slane %v795_v24, 5  ;;  %v254_v53 = vld [vmem:[%s4480_s4 + $0x124] sm:$0xf] }
  0x86   : > { %5923 = vst [vmem:[#allocation26_spill] sm:$0xff] %v5182_v17  ;;  %v788_v47 = vsel %vm4551_vm4, %v783_v54, %v5059_v4  ;;  %v901_v40 = vshrl.u32 %v252_v18, 16  ;;  %3872 = vmatprep.mubr.msk.bf16.mxu1 %vm1079_vm1, %v5182_v17  ;;  %v5191_v62 = vrot.slane %v888_v1, 4  ;;  %v5193_v35 = vrot.slane %v891_v9, 5 }
  0x87   : > { %v5195_v57 = vcombine.low %v251_v19, %v252_v18  ;;  %v806_v61 = vor.u32 %v5081_v56, %v5079_v20  ;;  %v798_v4 = vsel %vm4551_vm4, %v793_v7, %v797_v16  ;;  %v5203_v2 = vrot.slane %v897_v44, 5  ;;  %v245_v20 = vld [vmem:[%s4480_s4 + $0x100] sm:$0x1] }
  0x88   : > { %v816_v27 = vor.u32 %v5100_v59, %v5091_v58  ;;  %v907_v54 = vshll.u32 %v253_v43, 16  ;;  %v5207_v24 = vcombine.low %v788_v47, %v798_v4  ;;  %v911_v18 = vshrl.u32 %v253_v43, 16 }
  0x89   : > { %5924 = vst [vmem:[#allocation27_spill] sm:$0xff] %v5195_v57  ;;  %4012 = vmatprep.mubr.msk.bf16.mxu0 %vm1079_vm1, %v5195_v57  ;;  %v807_v19 = vrot.slane %v806_v61, 4  ;;  %v917_v1 = vshll.u32 %v254_v53, 16  ;;  %v5212_v56 = vrot.slane %v901_v40, 4  ;;  %v5216_v7 = vcombine.low %v253_v43, %v254_v53 }
  0x8a   : > { %5925 = vst [vmem:[#allocation28_spill] sm:$0xff] %v5207_v24  ;;  %v817_v16 = vrot.slane %v816_v27, 4  ;;  %v5214_v44 = vrot.slane %v907_v54, 5  ;;  %3873 = vmatmul.mubr.msk.bf16.gmra.mrb[44].mxu1 %vm1079_vm1, %v5207_v24  ;;  %v5223_v9 = vrot.slane %v911_v18, 4  ;;  %v921_v47 = vshrl.u32 %v254_v53, 16 }
  0x8b   : > { %5926 = vst [vmem:[#allocation29_spill] sm:$0xff] %v5216_v7  ;;  %v812_v59 = vsel %vm4551_vm4, %v807_v19, %v5091_v58  ;;  %v826_v61 = vor.u32 %v5111_v31, %v5102_v26  ;;  %v5230_v4 = vrot.slane %v917_v1, 5  ;;  %4013 = vmatmul.mubr.msk.bf16.gmra.mrb[52].mxu0 %vm1079_vm1, %v5216_v7  ;;  %v836_v43 = vor.u32 %v5130_v15, %v5118_v3  ;;  %v256_v58 = vld [vmem:[%s4480_s4 + $0x12c] sm:$0xf]  ;;  %v257_v53 = vld [vmem:[%s4480_s4 + $0x130] sm:$0xf] }
  0x8c   : > { %v822_v40 = vsel %vm4551_vm4, %v817_v16, %v5102_v26  ;;  %v839_v27 = vshll.u32 %v245_v20, 16  ;;  %v932_v19 = vshrl.u32 %v256_v58, 16  ;;  %v935_v18 = vshll.u32 %v256_v58, 16 }
  0x8d   : > { %v5238_v54 = vcombine.low %v812_v59, %v822_v40  ;;  %v827_v31 = vrot.slane %v826_v61, 4  ;;  %v837_v57 = vrot.slane %v836_v43, 4  ;;  %v941_v1 = vshll.u32 %v257_v53, 16  ;;  %v258_v61 = vld [vmem:[%s4480_s4 + $0x134] sm:$0xf] }
  0x8e   : > { %v841_v26 = vrot.slane %v839_v27, 5  ;;  %v945_v16 = vshrl.u32 %v257_v53, 16  ;;  %v5242_v7 = vrot.slane %v921_v47, 4  ;;  %v5247_v20 = vrot.slane %v932_v19, 4  ;;  %v259_v40 = vld [vmem:[%s4480_s4 + $0x138] sm:$0xf] }
  0x8f   : > { %5927 = vst [vmem:[#allocation30_spill] sm:$0xff] %v5238_v54  ;;  %3876 = vmatprep.mubr.msk.bf16.mxu1 %vm1079_vm1, %v5238_v54  ;;  %v832_v15 = vsel %vm4551_vm4, %v827_v31, %v5118_v3  ;;  %v5249_v59 = vcombine.low %v256_v58, %v257_v53  ;;  %v5255_v27 = vrot.slane %v935_v18, 5  ;;  %v5257_v54 = vrot.slane %v941_v1, 5  ;;  %v250_v31 = vld [vmem:[%s4480_s4 + $0x114] sm:$0x1] }
  0x90   : > { %v842_v43 = vsel %vm4551_vm4, %v837_v57, %v841_v26  ;;  %v850_v47 = vor.u32 %v5143_v48, %v5135_v34  ;;  %v860_v3 = vor.u32 %v5155_v28, %v5145_v22  ;;  %v951_v58 = vshll.u32 %v258_v61, 16  ;;  %v261_v19 = vld [vmem:[%s4480_s4 + $0x140] sm:$0xf]  ;;  %v262_v34 = vld [vmem:[%s4480_s4 + $0x144] sm:$0xf] }
  0x91   : > { %5928 = vst [vmem:[#allocation31_spill] sm:$0xff] %v5249_v59  ;;  %v5261_v24 = vcombine.low %v832_v15, %v842_v43  ;;  %4016 = vmatprep.mubr.msk.bf16.mxu0 %vm1079_vm1, %v5249_v59  ;;  %v955_v53 = vshrl.u32 %v258_v61, 16  ;;  %v5269_v57 = vrot.slane %v945_v16, 4  ;;  %v961_v26 = vshll.u32 %v259_v40, 16 }
  0x92   : > { %v851_v18 = vrot.slane %v850_v47, 4  ;;  %v5271_v1 = vcombine.low %v258_v61, %v259_v40  ;;  %v861_v48 = vrot.slane %v860_v3, 4  ;;  %v5276_v15 = vrot.slane %v951_v58, 5 }
  0x93   : > { %5929 = vst [vmem:[#allocation32_spill] sm:$0xff] %v5261_v24  ;;  %3877 = vmatmul.mubr.msk.bf16.gmra.mrb[48].mxu1 %vm1079_vm1, %v5261_v24  ;;  %v965_v43 = vshrl.u32 %v259_v40, 16  ;;  %v870_v28 = vor.u32 %v5169_v39, %v5162_v36  ;;  %v5283_v47 = vrot.slane %v955_v53, 4  ;;  %v5285_v61 = vrot.slane %v961_v26, 5  ;;  %v263_v24 = vld [vmem:[%s4480_s4 + $0x148] sm:$0xf] }
  0x94   : > { %5930 = vst [vmem:[#allocation33_spill] sm:$0xff] %v5271_v1  ;;  %v856_v16 = vsel %vm4551_vm4, %v851_v18, %v5145_v22  ;;  %4017 = vmatmul.mubr.msk.bf16.gmra.mrb[56].mxu0 %vm1079_vm1, %v5271_v1  ;;  %v880_v3 = vor.u32 %v5184_v51, %v5171_v32  ;;  %v866_v40 = vsel %vm4551_vm4, %v861_v48, %v5162_v36  ;;  %v883_v39 = vshll.u32 %v250_v31, 16  ;;  %v264_v26 = vld [vmem:[%s4480_s4 + $0x14c] sm:$0xf] }
  0x95   : > { %v871_v58 = vrot.slane %v870_v28, 4  ;;  %v3491_v59 = vcombine.low %v261_v19, %v262_v34  ;;  %v5295_v17 = vcombine.low %v856_v16, %v866_v40  ;;  %v2403_v53 = vshrl.u32 %v261_v19, 16 }
  0x96   : > { %v881_v22 = vrot.slane %v880_v3, 4  ;;  %v2406_v18 = vshll.u32 %v261_v19, 16  ;;  %v885_v25 = vrot.slane %v883_v39, 5  ;;  %v2412_v51 = vshll.u32 %v262_v34, 16 }
  0x97   : > { %5931 = vst [vmem:[#allocation34_spill] sm:$0xff] %v5295_v17  ;;  %v876_v1 = vsel %vm4551_vm4, %v871_v58, %v5171_v32  ;;  %4020 = vmatprep.mubr.msk.bf16.mxu0 %vm1079_vm1, %v3491_v59  ;;  %v2416_v23 = vshrl.u32 %v262_v34, 16  ;;  %3880 = vmatprep.mubr.msk.bf16.mxu1 %vm1079_vm1, %v5295_v17  ;;  %v967_v36 = vrot.slane %v965_v43, 4  ;;  %v2405_v31 = vrot.slane %v2403_v53, 4  ;;  %v255_v17 = vld [vmem:[%s4480_s4 + $0x128] sm:$0x1] }
  0x98   : > { %v894_v48 = vor.u32 %v5193_v35, %v5191_v62  ;;  %v904_v19 = vor.u32 %v5212_v56, %v5203_v2  ;;  %v886_v32 = vsel %vm4551_vm4, %v881_v22, %v885_v25  ;;  %v2408_v28 = vrot.slane %v2406_v18, 5  ;;  %v260_v56 = vld [vmem:[%s4480_s4 + $0x13c] sm:$0x1] }
  0x99   : > { %v2414_v16 = vrot.slane %v2412_v51, 5  ;;  %v3492_v59 = vcombine.low %v263_v24, %v264_v26  ;;  %v5310_v34 = vcombine.low %v876_v1, %v886_v32  ;;  %v2422_v58 = vshll.u32 %v263_v24, 16 }
  0x9a   : > { %v895_v3 = vrot.slane %v894_v48, 4  ;;  %v905_v40 = vrot.slane %v904_v19, 4  ;;  %v2418_v43 = vrot.slane %v2416_v23, 4  ;;  %v2426_v39 = vshrl.u32 %v263_v24, 16 }
  0x9b   : > { %v2432_v53 = vshll.u32 %v264_v26, 16  ;;  %v914_v62 = vor.u32 %v5223_v9, %v5214_v44  ;;  %3881 = vmatmul.mubr.msk.bf16.gmra.mrb[52].mxu1 %vm1079_vm1, %v5310_v34  ;;  %v2436_v23 = vshrl.u32 %v264_v26, 16  ;;  %v924_v24 = vor.u32 %v5242_v7, %v5230_v4 }
  0x9c   : > { %v900_v25 = vsel %vm4551_vm4, %v895_v3, %v5203_v2  ;;  %v910_v35 = vsel %vm4551_vm4, %v905_v40, %v5214_v44  ;;  %4021 = vmatmul.mubr.msk.bf16.gmra.mrb[60].mxu0 %vm1079_vm1, %v3492_v59  ;;  %v2424_v9 = vrot.slane %v2422_v58, 5  ;;  %v2428_v22 = vrot.slane %v2426_v39, 4 }
  0x9d   : > { %v5327_v1 = vcombine.low %v900_v25, %v910_v35  ;;  %v2434_v18 = vrot.slane %v2432_v53, 5  ;;  %4026 = vmatprep.mubr.msk.bf16.mxu0 %vm1079_vm1, %v4605_v63  ;;  %v915_v2 = vrot.slane %v914_v62, 4  ;;  %v925_v51 = vrot.slane %v924_v24, 4  ;;  %v265_v53 = vld [vmem:[%s4480_s4 + $0x150] sm:$0x1] }
  0x9e   : > { %v927_v48 = vshll.u32 %v255_v17, 16  ;;  %v938_v44 = vor.u32 %v5255_v27, %v5247_v20  ;;  %v948_v7 = vor.u32 %v5269_v57, %v5257_v54  ;;  %v958_v26 = vor.u32 %v5283_v47, %v5276_v15 }
  0x9f   : > { %3884 = vmatprep.mubr.msk.bf16.mxu1 %vm1079_vm1, %v5327_v1  ;;  %v968_v19 = vor.u32 %v967_v36, %v5285_v61  ;;  %v971_v32 = vshll.u32 %v260_v56, 16  ;;  %v2438_v63 = vrot.slane %v2436_v23, 4  ;;  %v920_v17 = vsel %vm4551_vm4, %v915_v2, %v5230_v4 }
  0xa0   : > { %v929_v59 = vrot.slane %v927_v48, 5  ;;  %v939_v20 = vrot.slane %v938_v44, 4  ;;  %v949_v27 = vrot.slane %v948_v7, 4  ;;  %v959_v3 = vrot.slane %v958_v26, 4  ;;  %v4364_v44 = vld [vmem:[%s4480_s4] sm:$0xf] }
  0xa1   : > { %v969_v40 = vrot.slane %v968_v19, 4  ;;  %v973_v58 = vrot.slane %v971_v32, 5  ;;  %v2409_v36 = vor.u32 %v2408_v28, %v2405_v31  ;;  %v2419_v39 = vor.u32 %v2418_v43, %v2414_v16  ;;  %v4365_v7 = vld [vmem:[%s4480_s4 + $0x4] sm:$0xf]  ;;  %v5957_v32 = vld [vmem:[#allocation17_spill] sm:$0xff] }
  0xa2   : > { %v930_v57 = vsel %vm4551_vm4, %v925_v51, %v929_v59  ;;  %v944_v47 = vsel %vm4551_vm4, %v939_v20, %v5257_v54  ;;  %v954_v4 = vsel %vm4551_vm4, %v949_v27, %v5276_v15  ;;  %v2429_v54 = vor.u32 %v2428_v22, %v2424_v9  ;;  %v5962_v59 = vld [vmem:[#allocation27_spill] sm:$0xff]  ;;  %v5963_v20 = vld [vmem:[#allocation29_spill] sm:$0xff] }
  0xa3   : > { %v5349_v62 = vcombine.low %v920_v17, %v930_v57  ;;  %v5354_v25 = vcombine.low %v944_v47, %v954_v4  ;;  %v2410_v35 = vrot.slane %v2409_v36, 4  ;;  %v2420_v23 = vrot.slane %v2419_v39, 4  ;;  %v5961_v17 = vld [vmem:[#allocation25_spill] sm:$0xff]  ;;  %v5964_v27 = vld [vmem:[#allocation31_spill] sm:$0xff] }
  0xa4   : > { %4027 = vmatmul.mubr.msk.bf16.vlgmr.msra.gmra.mrb[0].mxu0 %vm1079_vm1, %v4649_v49  ;;  %v2439_v31 = vor.u32 %v2438_v63, %v2434_v18  ;;  %v2442_v28 = vshll.u32 %v265_v53, 16  ;;  %v964_v49 = vsel %vm4551_vm4, %v959_v3, %v5285_v61  ;;  %v974_v15 = vsel %vm4551_vm4, %v969_v40, %v973_v58  ;;  %v5958_v63 = vld [vmem:[#allocation19_spill] sm:$0xff]  ;;  %v5965_v3 = vld [vmem:[#allocation33_spill] sm:$0xff] }
  0xa5   : > { %3885 = vmatmul.mubr.msk.bf16.gmra.mrb[56].mxu1 %vm1079_vm1, %v5349_v62  ;;  %4030 = vmatprep.mubr.msk.bf16.mxu0 %vm1079_vm1, %v4678_v11  ;;  %v2415_v43 = vsel %vm4551_vm4, %v2410_v35, %v2414_v16  ;;  %v2425_v11 = vsel %vm4551_vm4, %v2420_v23, %v2424_v9  ;;  %v2430_v56 = vrot.slane %v2429_v54, 4  ;;  %v3390_v51 = vcombine.low %v964_v49, %v974_v15  ;;  %v5954_v16 = vld [vmem:[#allocation12_spill] sm:$0xff]  ;;  %v5955_v9 = vld [vmem:[#allocation13_spill] sm:$0xff]  ;;  %v5508_v35 = vld [vmem:[%s5862_s2] ss:$0 sm:$0xff] }
  0xa6   : > { %3888 = vmatprep.mubr.msk.bf16.mxu1 %vm1079_vm1, %v5354_v25  ;;  %v5373_v24 = vcombine.low %v2415_v43, %v2425_v11  ;;  %v2440_v22 = vrot.slane %v2439_v31, 4  ;;  %v2444_v2 = vrot.slane %v2442_v28, 5  ;;  %v3424_v26 = vcombine.low %v4364_v44, %v4365_v7 }
  0xa7   : > { %v2435_v48 = vsel %vm4551_vm4, %v2430_v56, %v2434_v18  ;;  %v5932_v8 = vcombine.low %v4517_v37, %v4534_v45  ;;  %v5935_v37 = vld [vmem:[#allocation16_spill] sm:$0xff]  ;;  %v5937_v45 = vld [vmem:[#allocation18_spill] sm:$0xff]  ;;  %v5956_v18 = vld [vmem:[#allocation15_spill] sm:$0xff] }
  0xa8   : > { %v2445_v61 = vsel %vm4551_vm4, %v2440_v22, %v2444_v2 }
  0xa9   : > { %v3529_v19 = vcombine.low %v2435_v48, %v2445_v61 }
  0xac   : > { %4031 = vmatmul.mubr.msk.bf16.gmra.mrb[4].mxu0 %vm1079_vm1, %v4701_v33  ;;  %v5943_v33 = vld [vmem:[#allocation24_spill] sm:$0xff] }
  0xad   : > { %3889 = vmatmul.mubr.msk.bf16.gmra.mrb[60].mxu1 %vm1079_vm1, %v3390_v51  ;;  %4034 = vmatprep.mubr.msk.bf16.mxu0 %vm1079_vm1, %v4734_v13  ;;  %v5944_v13 = vld [vmem:[#allocation7_spill] sm:$0xff] }
  0xae   : > { %3894 = vmatprep.mubr.msk.bf16.mxu1 %vm1079_vm1, %v3424_v26 }
  0xb4   : > { %4035 = vmatmul.mubr.msk.bf16.gmra.mrb[8].mxu0 %vm1079_vm1, %v4759_v52  ;;  %v5945_v52 = vld [vmem:[#allocation26_spill] sm:$0xff] }
  0xb5   : > { %3895 = vmatmul.mubr.msk.bf16.vlgmr.msra.gmra.mrb[0].mxu1 %vm1079_vm1, %v5932_v8  ;;  %4038 = vmatprep.mubr.msk.bf16.mxu0 %vm1079_vm1, %v4790_v10  ;;  %v5946_v10 = vld [vmem:[#allocation8_spill] sm:$0xff] }
  0xb6   : > { %3898 = vmatprep.mubr.msk.bf16.mxu1 %vm1079_vm1, %v4495_v14  ;;  %v5933_v14 = vld [vmem:[#allocation14_spill] sm:$0xff] }
  0xbc   : > { %4039 = vmatmul.mubr.msk.bf16.gmra.mrb[12].mxu0 %vm1079_vm1, %v4813_v5  ;;  %v5947_v5 = vld [vmem:[#allocation28_spill] sm:$0xff] }
  0xbd   : > { %3899 = vmatmul.mubr.msk.bf16.gmra.mrb[4].mxu1 %vm1079_vm1, %v4508_v29  ;;  %4042 = vmatprep.mubr.msk.bf16.mxu0 %vm1079_vm1, %v4846_v55  ;;  %v5934_v29 = vld [vmem:[#allocation2_spill] sm:$0xff]  ;;  %v5948_v55 = vld [vmem:[#allocation9_spill] sm:$0xff] }
  0xbe   : > { %3902 = vmatprep.mubr.msk.bf16.mxu1 %vm1079_vm1, %v4525_v41  ;;  %v5936_v41 = vld [vmem:[#allocation3_spill] sm:$0xff] }
  0xc4   : > { %4043 = vmatmul.mubr.msk.bf16.gmra.mrb[16].mxu0 %vm1079_vm1, %v4871_v46  ;;  %v5950_v46 = vld [vmem:[#allocation10_spill] sm:$0xff] }
  0xc5   : > { %3903 = vmatmul.mubr.msk.bf16.gmra.mrb[8].mxu1 %vm1079_vm1, %v4546_v6  ;;  %4046 = vmatprep.mubr.msk.bf16.mxu0 %vm1079_vm1, %v4902_v60  ;;  %v5938_v6 = vld [vmem:[#allocation4_spill] sm:$0xff] }
  0xc6   : > { %3906 = vmatprep.mubr.msk.bf16.mxu1 %vm1079_vm1, %v4580_v50  ;;  %v5939_v50 = vld [vmem:[#allocation20_spill] sm:$0xff] }
  0xc7   : > { %v5951_v60 = vld [vmem:[#allocation32_spill] sm:$0xff] }
  0xcc   : > { %4047 = vmatmul.mubr.msk.bf16.gmra.mrb[20].mxu0 %vm1079_vm1, %v4925_v42  ;;  %v5949_v42 = vld [vmem:[#allocation30_spill] sm:$0xff] }
  0xcd   : > { %3907 = vmatmul.mubr.msk.bf16.gmra.mrb[12].mxu1 %vm1079_vm1, %v4607_v0  ;;  %4050 = vmatprep.mubr.msk.bf16.mxu0 %vm1079_vm1, %v4958_v21  ;;  %v5940_v0 = vld [vmem:[#allocation5_spill] sm:$0xff]  ;;  %v5952_v21 = vld [vmem:[#allocation11_spill] sm:$0xff] }
  0xce   : > { %3910 = vmatprep.mubr.msk.bf16.mxu1 %vm1079_vm1, %v4629_v30  ;;  %v5941_v30 = vld [vmem:[#allocation22_spill] sm:$0xff] }
  0xd4   : > { %4051 = vmatmul.mubr.msk.bf16.gmra.mrb[24].mxu0 %vm1079_vm1, %v4983_v12  ;;  %v5953_v12 = vld [vmem:[#allocation34_spill] sm:$0xff] }
  0xd5   : > { %3911 = vmatmul.mubr.msk.bf16.gmra.mrb[16].mxu1 %vm1079_vm1, %v4654_v38  ;;  %4054 = vmatprep.mubr.msk.bf16.mxu0 %vm1079_vm1, %v5933_v14  ;;  %v5942_v38 = vld [vmem:[#allocation6_spill] sm:$0xff] }
  0xd6   : > { %3914 = vmatprep.mubr.msk.bf16.mxu1 %vm1079_vm1, %v5934_v29 }
  0xdc   : > { %4055 = vmatmul.mubr.msk.bf16.gmra.mrb[28].mxu0 %vm1079_vm1, %v5935_v37 }
  0xdd   : > { %3915 = vmatmul.mubr.msk.bf16.gmra.mrb[20].mxu1 %vm1079_vm1, %v5936_v41  ;;  %4058 = vmatprep.mubr.msk.bf16.mxu0 %vm1079_vm1, %v5937_v45 }
  0xde   : > { %3918 = vmatprep.mubr.msk.bf16.mxu1 %vm1079_vm1, %v5938_v6 }
  0xe4   : > { %4059 = vmatmul.mubr.msk.bf16.gmra.mrb[32].mxu0 %vm1079_vm1, %v5939_v50 }
  0xe5   : > { %3919 = vmatmul.mubr.msk.bf16.gmra.mrb[24].mxu1 %vm1079_vm1, %v5940_v0  ;;  %4062 = vmatprep.mubr.msk.bf16.mxu0 %vm1079_vm1, %v5941_v30 }
  0xe6   : > { %3922 = vmatprep.mubr.msk.bf16.mxu1 %vm1079_vm1, %v5942_v38 }
  0xec   : > { %4063 = vmatmul.mubr.msk.bf16.gmra.mrb[36].mxu0 %vm1079_vm1, %v5943_v33 }
  0xed   : > { %3923 = vmatmul.mubr.msk.bf16.gmra.mrb[28].mxu1 %vm1079_vm1, %v5944_v13  ;;  %4066 = vmatprep.mubr.msk.bf16.mxu0 %vm1079_vm1, %v5945_v52 }
  0xee   : > { %3926 = vmatprep.mubr.msk.bf16.mxu1 %vm1079_vm1, %v5946_v10 }
  0xf4   : > { %4067 = vmatmul.mubr.msk.bf16.gmra.mrb[40].mxu0 %vm1079_vm1, %v5947_v5 }
  0xf5   : > { %3927 = vmatmul.mubr.msk.bf16.gmra.mrb[32].mxu1 %vm1079_vm1, %v5948_v55  ;;  %4070 = vmatprep.mubr.msk.bf16.mxu0 %vm1079_vm1, %v5949_v42 }
  0xf6   : > { %3930 = vmatprep.mubr.msk.bf16.mxu1 %vm1079_vm1, %v5950_v46 }
  0xfc   : > { %4071 = vmatmul.mubr.msk.bf16.gmra.mrb[44].mxu0 %vm1079_vm1, %v5951_v60 }
  0xfd   : > { %3931 = vmatmul.mubr.msk.bf16.gmra.mrb[36].mxu1 %vm1079_vm1, %v5952_v21  ;;  %4074 = vmatprep.mubr.msk.bf16.mxu0 %vm1079_vm1, %v5953_v12 }
  0xfe   : > { %3934 = vmatprep.mubr.msk.bf16.mxu1 %vm1079_vm1, %v5954_v16 }
 0x104   : > { %4075 = vmatmul.mubr.msk.bf16.gmra.mrb[48].mxu0 %vm1079_vm1, %v5310_v34  ;;  %v5959_v34 = vld [vmem:[#allocation21_spill] sm:$0xff] }
 0x105   : > { %3935 = vmatmul.mubr.msk.bf16.gmra.mrb[40].mxu1 %vm1079_vm1, %v5955_v9  ;;  %4078 = vmatprep.mubr.msk.bf16.mxu0 %vm1079_vm1, %v5327_v1  ;;  %v5960_v1 = vld [vmem:[#allocation23_spill] sm:$0xff] }
 0x106   : > { %3938 = vmatprep.mubr.msk.bf16.mxu1 %vm1079_vm1, %v5956_v18 }
 0x10c   : > { %4079 = vmatmul.mubr.msk.bf16.gmra.mrb[52].mxu0 %vm1079_vm1, %v5349_v62 }
 0x10d   : > { %3939 = vmatmul.mubr.msk.bf16.gmra.mrb[44].mxu1 %vm1079_vm1, %v5957_v32  ;;  %4082 = vmatprep.mubr.msk.bf16.mxu0 %vm1079_vm1, %v5354_v25 }
 0x10e   : > { %3942 = vmatprep.mubr.msk.bf16.mxu1 %vm1079_vm1, %v5958_v63 }
 0x114   : > { %4083 = vmatmul.mubr.msk.bf16.gmra.mrb[56].mxu0 %vm1079_vm1, %v3390_v51 }
 0x115   : > { %3943 = vmatmul.mubr.msk.bf16.gmra.mrb[48].mxu1 %vm1079_vm1, %v5959_v34  ;;  %4086 = vmatprep.mubr.msk.bf16.mxu0 %vm1079_vm1, %v5373_v24 }
 0x116   : > { %3946 = vmatprep.mubr.msk.bf16.mxu1 %vm1079_vm1, %v5960_v1 }
 0x11c   : > { %4087 = vmatmul.mubr.msk.bf16.gmra.mrb[60].mxu0 %vm1079_vm1, %v3529_v19 }
 0x11d   : > { %3947 = vmatmul.mubr.msk.bf16.gmra.mrb[52].mxu1 %vm1079_vm1, %v5961_v17 }
 0x11e   : > { %3950 = vmatprep.mubr.msk.bf16.mxu1 %vm1079_vm1, %v5962_v59 }
 0x125   : > { %3951 = vmatmul.mubr.msk.bf16.gmra.mrb[56].mxu1 %vm1079_vm1, %v5963_v20 }
 0x126   : > { %3954 = vmatprep.mubr.msk.bf16.mxu1 %vm1079_vm1, %v5964_v27 }
 0x12d   : > { %3955 = vmatmul.mubr.msk.bf16.gmra.mrb[60].mxu1 %vm1079_vm1, %v5965_v3 }
 0x177   : > { %v4028_v40 = vpop.f32.mrb[0].mxu0 }
 0x178   : > { %v2503_v58 = vpop.f32.mrb[1].mxu0 }
 0x179   : > { %v4029_v57 = vpop.f32.mrb[2].mxu0 }
 0x17a   : > { %v2506_v47 = vpop.f32.mrb[3].mxu0 }
 0x17f   : > { %v4032_v36 = vpop.f32.mrb[4].mxu0 }
 0x180   : > { %v2519_v39 = vpop.f32.mrb[5].mxu0 }
 0x181   : > { %v4033_v53 = vpop.f32.mrb[6].mxu0 }
 0x182   : > { %v2522_v62 = vpop.f32.mrb[7].mxu0 }
 0x187   : > { %v4036_v4 = vpop.f32.mrb[8].mxu0 }
 0x188   : > { %v3896_v25 = vpop.f32.mrb[0].mxu1  ;;  %v2535_v23 = vpop.f32.mrb[9].mxu0 }
 0x189   : > { %v4090_v54 = vadd.f32 %v4028_v40, %v3896_v25  ;;  %v1767_v31 = vpop.f32.mrb[1].mxu1  ;;  %v5510_v28 = vpop.f32.mrb[10].mxu0 }
 0x18a   : > { %v4091_v49 = vadd.f32 %v2503_v58, %v1767_v31  ;;  %v3897_v15 = vpop.f32.mrb[2].mxu1  ;;  %v5512_v43 = vpop.f32.mrb[11].mxu0 }
 0x18b   : > { %v2831_v11 = vadd.f32 %v4090_v54, %v5508_v35  ;;  %v4092_v24 = vadd.f32 %v4029_v57, %v3897_v15  ;;  %v1770_v56 = vpop.f32.mrb[3].mxu1 }
 0x18c   : > { %v2829_v22 = vadd.f32 %v4091_v49, %v5508_v35  ;;  %v4093_v2 = vadd.f32 %v2506_v47, %v1770_v56 }
 0x18d   : > { %v2895_v51 = vmax.f32 %v2831_v11, 0.0  ;;  %v2832_v48 = vadd.f32 %v4092_v24, %v5508_v35 }
 0x18e   : > { %v2893_v61 = vmax.f32 %v2829_v22, 0.0  ;;  %v2830_v44 = vadd.f32 %v4093_v2, %v5508_v35 }
 0x18f   : > { %v3632_v7 = vpack.c.bf16 %v2895_v51, %v2895_v51  ;;  %v2896_v26 = vmax.f32 %v2832_v48, 0.0  ;;  %v5523_v19 = vpop.f32.mrb[12].mxu0 }
 0x190   : > { %v3630_v8 = vpack.c.bf16 %v2893_v61, %v2893_v61  ;;  %v2894_v14 = vmax.f32 %v2830_v44, 0.0  ;;  %v3900_v29 = vpop.f32.mrb[4].mxu1  ;;  %v5525_v37 = vpop.f32.mrb[13].mxu0 }
 0x191   : > { %3216 = vst.msk [vmem:[%s5520_s20 + $0x8] sm:$0xf] %vm3213_vm5, %v3632_v7  ;;  %v3633_v41 = vpack.c.bf16 %v2896_v26, %v2896_v26  ;;  %v4094_v45 = vadd.f32 %v4032_v36, %v3900_v29  ;;  %v1783_v6 = vpop.f32.mrb[5].mxu1  ;;  %v5529_v50 = vpop.f32.mrb[14].mxu0 }
 0x192   : > { %3214 = vst.msk [vmem:[%s5520_s20] sm:$0xf] %vm3213_vm5, %v3630_v8  ;;  %v3631_v0 = vpack.c.bf16 %v2894_v14, %v2894_v14  ;;  %v4095_v30 = vadd.f32 %v2519_v39, %v1783_v6  ;;  %v3901_v38 = vpop.f32.mrb[6].mxu1  ;;  %v5533_v33 = vpop.f32.mrb[15].mxu0 }
 0x193   : > { %3217 = vst.msk [vmem:[%s5520_s20 + $0xc] sm:$0xf] %vm3213_vm5, %v3633_v41  ;;  %v2835_v13 = vadd.f32 %v4094_v45, %v5508_v35  ;;  %v4096_v52 = vadd.f32 %v4033_v53, %v3901_v38  ;;  %v1786_v10 = vpop.f32.mrb[7].mxu1 }
 0x194   : > { %3215 = vst.msk [vmem:[%s5520_s20 + $0x4] sm:$0xf] %vm3213_vm5, %v3631_v0  ;;  %v2833_v5 = vadd.f32 %v4095_v30, %v5508_v35  ;;  %v4097_v55 = vadd.f32 %v2522_v62, %v1786_v10 }
 0x195   : > { %v2899_v42 = vmax.f32 %v2835_v13, 0.0  ;;  %v2836_v46 = vadd.f32 %v4096_v52, %v5508_v35 }
 0x196   : > { %v2897_v60 = vmax.f32 %v2833_v5, 0.0  ;;  %v2834_v21 = vadd.f32 %v4097_v55, %v5508_v35 }
 0x197   : > { %v3636_v12 = vpack.c.bf16 %v2899_v42, %v2899_v42  ;;  %v2900_v16 = vmax.f32 %v2836_v46, 0.0  ;;  %v5543_v9 = vpop.f32.mrb[16].mxu0 }
 0x198   : > { %v3634_v18 = vpack.c.bf16 %v2897_v60, %v2897_v60  ;;  %v2898_v32 = vmax.f32 %v2834_v21, 0.0  ;;  %v3904_v63 = vpop.f32.mrb[8].mxu1  ;;  %v5545_v34 = vpop.f32.mrb[17].mxu0 }
 0x199   : > { %3220 = vst.msk [vmem:[%s5520_s20 + $0x18] sm:$0xf] %vm3213_vm5, %v3636_v12  ;;  %v3637_v1 = vpack.c.bf16 %v2900_v16, %v2900_v16  ;;  %v4098_v17 = vadd.f32 %v4036_v4, %v3904_v63  ;;  %v1799_v59 = vpop.f32.mrb[9].mxu1  ;;  %v5549_v20 = vpop.f32.mrb[18].mxu0 }
 0x19a   : > { %3218 = vst.msk [vmem:[%s5520_s20 + $0x10] sm:$0xf] %vm3213_vm5, %v3634_v18  ;;  %v3635_v27 = vpack.c.bf16 %v2898_v32, %v2898_v32  ;;  %v4099_v3 = vadd.f32 %v2535_v23, %v1799_v59  ;;  %v3905_v40 = vpop.f32.mrb[10].mxu1  ;;  %v5553_v58 = vpop.f32.mrb[19].mxu0 }
 0x19b   : > { %3221 = vst.msk [vmem:[%s5520_s20 + $0x1c] sm:$0xf] %vm3213_vm5, %v3637_v1  ;;  %v2839_v57 = vadd.f32 %v4098_v17, %v5508_v35  ;;  %v4100_v47 = vadd.f32 %v5510_v28, %v3905_v40  ;;  %v1802_v36 = vpop.f32.mrb[11].mxu1 }
 0x19c   : > { %3219 = vst.msk [vmem:[%s5520_s20 + $0x14] sm:$0xf] %vm3213_vm5, %v3635_v27  ;;  %v2837_v39 = vadd.f32 %v4099_v3, %v5508_v35  ;;  %v4101_v53 = vadd.f32 %v5512_v43, %v1802_v36 }
 0x19d   : > { %v2903_v62 = vmax.f32 %v2839_v57, 0.0  ;;  %v2840_v4 = vadd.f32 %v4100_v47, %v5508_v35 }
 0x19e   : > { %v2901_v25 = vmax.f32 %v2837_v39, 0.0  ;;  %v2838_v23 = vadd.f32 %v4101_v53, %v5508_v35 }
 0x19f   : > { %v3640_v54 = vpack.c.bf16 %v2903_v62, %v2903_v62  ;;  %v2904_v31 = vmax.f32 %v2840_v4, 0.0  ;;  %v5565_v49 = vpop.f32.mrb[20].mxu0 }
 0x1a0   : > { %v3638_v28 = vpack.c.bf16 %v2901_v25, %v2901_v25  ;;  %v2902_v15 = vmax.f32 %v2838_v23, 0.0  ;;  %v3908_v11 = vpop.f32.mrb[12].mxu1  ;;  %v5567_v24 = vpop.f32.mrb[21].mxu0 }
 0x1a1   : > { %3224 = vst.msk [vmem:[%s5520_s20 + $0x28] sm:$0xf] %vm3213_vm5, %v3640_v54  ;;  %v3641_v43 = vpack.c.bf16 %v2904_v31, %v2904_v31  ;;  %v4102_v56 = vadd.f32 %v5523_v19, %v3908_v11  ;;  %v1815_v22 = vpop.f32.mrb[13].mxu1  ;;  %v5572_v2 = vpop.f32.mrb[22].mxu0 }
 0x1a2   : > { %3222 = vst.msk [vmem:[%s5520_s20 + $0x20] sm:$0xf] %vm3213_vm5, %v3638_v28  ;;  %v3639_v51 = vpack.c.bf16 %v2902_v15, %v2902_v15  ;;  %v4103_v48 = vadd.f32 %v5525_v37, %v1815_v22  ;;  %v3909_v61 = vpop.f32.mrb[14].mxu1  ;;  %v5577_v44 = vpop.f32.mrb[23].mxu0 }
 0x1a3   : > { %3225 = vst.msk [vmem:[%s5520_s20 + $0x2c] sm:$0xf] %vm3213_vm5, %v3641_v43  ;;  %v2843_v7 = vadd.f32 %v4102_v56, %v5508_v35  ;;  %v4104_v26 = vadd.f32 %v5529_v50, %v3909_v61  ;;  %v1818_v8 = vpop.f32.mrb[15].mxu1 }
 0x1a4   : > { %3223 = vst.msk [vmem:[%s5520_s20 + $0x24] sm:$0xf] %vm3213_vm5, %v3639_v51  ;;  %v2841_v19 = vadd.f32 %v4103_v48, %v5508_v35  ;;  %v4105_v14 = vadd.f32 %v5533_v33, %v1818_v8 }
 0x1a5   : > { %v2907_v29 = vmax.f32 %v2843_v7, 0.0  ;;  %v2844_v37 = vadd.f32 %v4104_v26, %v5508_v35 }
 0x1a6   : > { %v2905_v41 = vmax.f32 %v2841_v19, 0.0  ;;  %v2842_v45 = vadd.f32 %v4105_v14, %v5508_v35 }
 0x1a7   : > { %v3644_v6 = vpack.c.bf16 %v2907_v29, %v2907_v29  ;;  %v2908_v0 = vmax.f32 %v2844_v37, 0.0  ;;  %v5589_v30 = vpop.f32.mrb[24].mxu0 }
 0x1a8   : > { %v3642_v50 = vpack.c.bf16 %v2905_v41, %v2905_v41  ;;  %v2906_v38 = vmax.f32 %v2842_v45, 0.0  ;;  %v3912_v13 = vpop.f32.mrb[16].mxu1  ;;  %v5591_v52 = vpop.f32.mrb[25].mxu0 }
 0x1a9   : > { %3228 = vst.msk [vmem:[%s5520_s20 + $0x38] sm:$0xf] %vm3213_vm5, %v3644_v6  ;;  %v3645_v33 = vpack.c.bf16 %v2908_v0, %v2908_v0  ;;  %v4106_v10 = vadd.f32 %v5543_v9, %v3912_v13  ;;  %v1831_v5 = vpop.f32.mrb[17].mxu1  ;;  %v5596_v55 = vpop.f32.mrb[26].mxu0 }
 0x1aa   : > { %3226 = vst.msk [vmem:[%s5520_s20 + $0x30] sm:$0xf] %vm3213_vm5, %v3642_v50  ;;  %v3643_v42 = vpack.c.bf16 %v2906_v38, %v2906_v38  ;;  %v4107_v46 = vadd.f32 %v5545_v34, %v1831_v5  ;;  %v3913_v60 = vpop.f32.mrb[18].mxu1  ;;  %v5601_v21 = vpop.f32.mrb[27].mxu0 }
 0x1ab   : > { %3229 = vst.msk [vmem:[%s5520_s20 + $0x3c] sm:$0xf] %vm3213_vm5, %v3645_v33  ;;  %v2847_v12 = vadd.f32 %v4106_v10, %v5508_v35  ;;  %v4108_v16 = vadd.f32 %v5549_v20, %v3913_v60  ;;  %v1834_v18 = vpop.f32.mrb[19].mxu1 }
 0x1ac   : > { %3227 = vst.msk [vmem:[%s5520_s20 + $0x34] sm:$0xf] %vm3213_vm5, %v3643_v42  ;;  %v2845_v9 = vadd.f32 %v4107_v46, %v5508_v35  ;;  %v4109_v32 = vadd.f32 %v5553_v58, %v1834_v18 }
 0x1ad   : > { %v2911_v63 = vmax.f32 %v2847_v12, 0.0  ;;  %v2848_v34 = vadd.f32 %v4108_v16, %v5508_v35 }
 0x1ae   : > { %v2909_v1 = vmax.f32 %v2845_v9, 0.0  ;;  %v2846_v17 = vadd.f32 %v4109_v32, %v5508_v35 }
 0x1af   : > { %v3648_v59 = vpack.c.bf16 %v2911_v63, %v2911_v63  ;;  %v2912_v27 = vmax.f32 %v2848_v34, 0.0  ;;  %v5613_v3 = vpop.f32.mrb[28].mxu0 }
 0x1b0   : > { %v3646_v20 = vpack.c.bf16 %v2909_v1, %v2909_v1  ;;  %v2910_v40 = vmax.f32 %v2846_v17, 0.0  ;;  %v3916_v57 = vpop.f32.mrb[20].mxu1  ;;  %v5615_v47 = vpop.f32.mrb[29].mxu0 }
 0x1b1   : > { %3232 = vst.msk [vmem:[%s5520_s20 + $0x48] sm:$0xf] %vm3213_vm5, %v3648_v59  ;;  %v3649_v58 = vpack.c.bf16 %v2912_v27, %v2912_v27  ;;  %v4110_v36 = vadd.f32 %v5565_v49, %v3916_v57  ;;  %v1847_v39 = vpop.f32.mrb[21].mxu1  ;;  %v5620_v53 = vpop.f32.mrb[30].mxu0 }
 0x1b2   : > { %3230 = vst.msk [vmem:[%s5520_s20 + $0x40] sm:$0xf] %vm3213_vm5, %v3646_v20  ;;  %v3647_v62 = vpack.c.bf16 %v2910_v40, %v2910_v40  ;;  %v4111_v4 = vadd.f32 %v5567_v24, %v1847_v39  ;;  %v3917_v25 = vpop.f32.mrb[22].mxu1  ;;  %v5625_v23 = vpop.f32.mrb[31].mxu0 }
 0x1b3   : > { %3233 = vst.msk [vmem:[%s5520_s20 + $0x4c] sm:$0xf] %vm3213_vm5, %v3649_v58  ;;  %v2851_v54 = vadd.f32 %v4110_v36, %v5508_v35  ;;  %v4112_v31 = vadd.f32 %v5572_v2, %v3917_v25  ;;  %v1850_v28 = vpop.f32.mrb[23].mxu1 }
 0x1b4   : > { %3231 = vst.msk [vmem:[%s5520_s20 + $0x44] sm:$0xf] %vm3213_vm5, %v3647_v62  ;;  %v2849_v49 = vadd.f32 %v4111_v4, %v5508_v35  ;;  %v4113_v15 = vadd.f32 %v5577_v44, %v1850_v28 }
 0x1b5   : > { %v2915_v11 = vmax.f32 %v2851_v54, 0.0  ;;  %v2852_v24 = vadd.f32 %v4112_v31, %v5508_v35 }
 0x1b6   : > { %v2913_v43 = vmax.f32 %v2849_v49, 0.0  ;;  %v2850_v56 = vadd.f32 %v4113_v15, %v5508_v35 }
 0x1b7   : > { %v3652_v22 = vpack.c.bf16 %v2915_v11, %v2915_v11  ;;  %v2916_v51 = vmax.f32 %v2852_v24, 0.0  ;;  %v5637_v48 = vpop.f32.mrb[32].mxu0 }
 0x1b8   : > { %v3650_v2 = vpack.c.bf16 %v2913_v43, %v2913_v43  ;;  %v2914_v61 = vmax.f32 %v2850_v56, 0.0  ;;  %v3920_v7 = vpop.f32.mrb[24].mxu1  ;;  %v5639_v26 = vpop.f32.mrb[33].mxu0 }
 0x1b9   : > { %3236 = vst.msk [vmem:[%s5520_s20 + $0x58] sm:$0xf] %vm3213_vm5, %v3652_v22  ;;  %v3653_v44 = vpack.c.bf16 %v2916_v51, %v2916_v51  ;;  %v4114_v8 = vadd.f32 %v5589_v30, %v3920_v7  ;;  %v1863_v19 = vpop.f32.mrb[25].mxu1  ;;  %v5644_v14 = vpop.f32.mrb[34].mxu0 }
 0x1ba   : > { %3234 = vst.msk [vmem:[%s5520_s20 + $0x50] sm:$0xf] %vm3213_vm5, %v3650_v2  ;;  %v3651_v29 = vpack.c.bf16 %v2914_v61, %v2914_v61  ;;  %v4115_v37 = vadd.f32 %v5591_v52, %v1863_v19  ;;  %v3921_v41 = vpop.f32.mrb[26].mxu1  ;;  %v5649_v45 = vpop.f32.mrb[35].mxu0 }
 0x1bb   : > { %3237 = vst.msk [vmem:[%s5520_s20 + $0x5c] sm:$0xf] %vm3213_vm5, %v3653_v44  ;;  %v2855_v6 = vadd.f32 %v4114_v8, %v5508_v35  ;;  %v4116_v0 = vadd.f32 %v5596_v55, %v3921_v41  ;;  %v1866_v50 = vpop.f32.mrb[27].mxu1 }
 0x1bc   : > { %3235 = vst.msk [vmem:[%s5520_s20 + $0x54] sm:$0xf] %vm3213_vm5, %v3651_v29  ;;  %v2853_v30 = vadd.f32 %v4115_v37, %v5508_v35  ;;  %v4117_v38 = vadd.f32 %v5601_v21, %v1866_v50 }
 0x1bd   : > { %v2919_v13 = vmax.f32 %v2855_v6, 0.0  ;;  %v2856_v52 = vadd.f32 %v4116_v0, %v5508_v35 }
 0x1be   : > { %v2917_v33 = vmax.f32 %v2853_v30, 0.0  ;;  %v2854_v10 = vadd.f32 %v4117_v38, %v5508_v35 }
 0x1bf   : > { %v3656_v5 = vpack.c.bf16 %v2919_v13, %v2919_v13  ;;  %v2920_v42 = vmax.f32 %v2856_v52, 0.0  ;;  %v5661_v46 = vpop.f32.mrb[36].mxu0 }
 0x1c0   : > { %v3654_v55 = vpack.c.bf16 %v2917_v33, %v2917_v33  ;;  %v2918_v60 = vmax.f32 %v2854_v10, 0.0  ;;  %v3924_v12 = vpop.f32.mrb[28].mxu1  ;;  %v5663_v16 = vpop.f32.mrb[37].mxu0 }
 0x1c1   : > { %3240 = vst.msk [vmem:[%s5520_s20 + $0x68] sm:$0xf] %vm3213_vm5, %v3656_v5  ;;  %v3657_v21 = vpack.c.bf16 %v2920_v42, %v2920_v42  ;;  %v4118_v18 = vadd.f32 %v5613_v3, %v3924_v12  ;;  %v1879_v9 = vpop.f32.mrb[29].mxu1  ;;  %v5668_v32 = vpop.f32.mrb[38].mxu0 }
 0x1c2   : > { %3238 = vst.msk [vmem:[%s5520_s20 + $0x60] sm:$0xf] %vm3213_vm5, %v3654_v55  ;;  %v3655_v63 = vpack.c.bf16 %v2918_v60, %v2918_v60  ;;  %v4119_v34 = vadd.f32 %v5615_v47, %v1879_v9  ;;  %v3925_v1 = vpop.f32.mrb[30].mxu1  ;;  %v5673_v17 = vpop.f32.mrb[39].mxu0 }
 0x1c3   : > { %3241 = vst.msk [vmem:[%s5520_s20 + $0x6c] sm:$0xf] %vm3213_vm5, %v3657_v21  ;;  %v2859_v59 = vadd.f32 %v4118_v18, %v5508_v35  ;;  %v4120_v27 = vadd.f32 %v5620_v53, %v3925_v1  ;;  %v1882_v20 = vpop.f32.mrb[31].mxu1 }
 0x1c4   : > { %3239 = vst.msk [vmem:[%s5520_s20 + $0x64] sm:$0xf] %vm3213_vm5, %v3655_v63  ;;  %v2857_v3 = vadd.f32 %v4119_v34, %v5508_v35  ;;  %v4121_v40 = vadd.f32 %v5625_v23, %v1882_v20 }
 0x1c5   : > { %v2923_v57 = vmax.f32 %v2859_v59, 0.0  ;;  %v2860_v47 = vadd.f32 %v4120_v27, %v5508_v35 }
 0x1c6   : > { %v2921_v58 = vmax.f32 %v2857_v3, 0.0  ;;  %v2858_v36 = vadd.f32 %v4121_v40, %v5508_v35 }
 0x1c7   : > { %v3660_v39 = vpack.c.bf16 %v2923_v57, %v2923_v57  ;;  %v2924_v62 = vmax.f32 %v2860_v47, 0.0  ;;  %v5685_v4 = vpop.f32.mrb[40].mxu0 }
 0x1c8   : > { %v3658_v53 = vpack.c.bf16 %v2921_v58, %v2921_v58  ;;  %v2922_v25 = vmax.f32 %v2858_v36, 0.0  ;;  %v3928_v54 = vpop.f32.mrb[32].mxu1  ;;  %v5687_v31 = vpop.f32.mrb[41].mxu0 }
 0x1c9   : > { %3244 = vst.msk [vmem:[%s5520_s20 + $0x78] sm:$0xf] %vm3213_vm5, %v3660_v39  ;;  %v3661_v23 = vpack.c.bf16 %v2924_v62, %v2924_v62  ;;  %v4122_v28 = vadd.f32 %v5637_v48, %v3928_v54  ;;  %v1895_v49 = vpop.f32.mrb[33].mxu1  ;;  %v5692_v15 = vpop.f32.mrb[42].mxu0 }
 0x1ca   : > { %3242 = vst.msk [vmem:[%s5520_s20 + $0x70] sm:$0xf] %vm3213_vm5, %v3658_v53  ;;  %v3659_v11 = vpack.c.bf16 %v2922_v25, %v2922_v25  ;;  %v4123_v24 = vadd.f32 %v5639_v26, %v1895_v49  ;;  %v3929_v43 = vpop.f32.mrb[34].mxu1  ;;  %v5697_v56 = vpop.f32.mrb[43].mxu0 }
 0x1cb   : > { %3245 = vst.msk [vmem:[%s5520_s20 + $0x7c] sm:$0xf] %vm3213_vm5, %v3661_v23  ;;  %v2863_v22 = vadd.f32 %v4122_v28, %v5508_v35  ;;  %v4124_v51 = vadd.f32 %v5644_v14, %v3929_v43  ;;  %v1898_v2 = vpop.f32.mrb[35].mxu1 }
 0x1cc   : > { %3243 = vst.msk [vmem:[%s5520_s20 + $0x74] sm:$0xf] %vm3213_vm5, %v3659_v11  ;;  %v2861_v48 = vadd.f32 %v4123_v24, %v5508_v35  ;;  %v4125_v61 = vadd.f32 %v5649_v45, %v1898_v2 }
 0x1cd   : > { %v2927_v7 = vmax.f32 %v2863_v22, 0.0  ;;  %v2864_v26 = vadd.f32 %v4124_v51, %v5508_v35 }
 0x1ce   : > { %v2925_v44 = vmax.f32 %v2861_v48, 0.0  ;;  %v2862_v8 = vadd.f32 %v4125_v61, %v5508_v35 }
 0x1cf   : > { %v3664_v19 = vpack.c.bf16 %v2927_v7, %v2927_v7  ;;  %v2928_v29 = vmax.f32 %v2864_v26, 0.0  ;;  %v5709_v37 = vpop.f32.mrb[44].mxu0 }
 0x1d0   : > { %v3662_v14 = vpack.c.bf16 %v2925_v44, %v2925_v44  ;;  %v2926_v41 = vmax.f32 %v2862_v8, 0.0  ;;  %v3932_v6 = vpop.f32.mrb[36].mxu1  ;;  %v5711_v0 = vpop.f32.mrb[45].mxu0 }
 0x1d1   : > { %3248 = vst.msk [vmem:[%s5520_s20 + $0x88] sm:$0xf] %vm3213_vm5, %v3664_v19  ;;  %v3665_v45 = vpack.c.bf16 %v2928_v29, %v2928_v29  ;;  %v4126_v50 = vadd.f32 %v5661_v46, %v3932_v6  ;;  %v1911_v30 = vpop.f32.mrb[37].mxu1  ;;  %v5716_v38 = vpop.f32.mrb[46].mxu0 }
 0x1d2   : > { %3246 = vst.msk [vmem:[%s5520_s20 + $0x80] sm:$0xf] %vm3213_vm5, %v3662_v14  ;;  %v3663_v13 = vpack.c.bf16 %v2926_v41, %v2926_v41  ;;  %v4127_v52 = vadd.f32 %v5663_v16, %v1911_v30  ;;  %v3933_v33 = vpop.f32.mrb[38].mxu1  ;;  %v5721_v10 = vpop.f32.mrb[47].mxu0 }
 0x1d3   : > { %3249 = vst.msk [vmem:[%s5520_s20 + $0x8c] sm:$0xf] %vm3213_vm5, %v3665_v45  ;;  %v2867_v5 = vadd.f32 %v4126_v50, %v5508_v35  ;;  %v4128_v42 = vadd.f32 %v5668_v32, %v3933_v33  ;;  %v1914_v55 = vpop.f32.mrb[39].mxu1 }
 0x1d4   : > { %3247 = vst.msk [vmem:[%s5520_s20 + $0x84] sm:$0xf] %vm3213_vm5, %v3663_v13  ;;  %v2865_v46 = vadd.f32 %v4127_v52, %v5508_v35  ;;  %v4129_v60 = vadd.f32 %v5673_v17, %v1914_v55 }
 0x1d5   : > { %v2931_v12 = vmax.f32 %v2867_v5, 0.0  ;;  %v2868_v16 = vadd.f32 %v4128_v42, %v5508_v35 }
 0x1d6   : > { %v2929_v21 = vmax.f32 %v2865_v46, 0.0  ;;  %v2866_v18 = vadd.f32 %v4129_v60, %v5508_v35 }
 0x1d7   : > { %v3668_v9 = vpack.c.bf16 %v2931_v12, %v2931_v12  ;;  %v2932_v63 = vmax.f32 %v2868_v16, 0.0  ;;  %v5733_v34 = vpop.f32.mrb[48].mxu0 }
 0x1d8   : > { %v3666_v32 = vpack.c.bf16 %v2929_v21, %v2929_v21  ;;  %v2930_v1 = vmax.f32 %v2866_v18, 0.0  ;;  %v3936_v59 = vpop.f32.mrb[40].mxu1  ;;  %v5735_v27 = vpop.f32.mrb[49].mxu0 }
 0x1d9   : > { %3252 = vst.msk [vmem:[%s5520_s20 + $0x98] sm:$0xf] %vm3213_vm5, %v3668_v9  ;;  %v3669_v17 = vpack.c.bf16 %v2932_v63, %v2932_v63  ;;  %v4130_v20 = vadd.f32 %v5685_v4, %v3936_v59  ;;  %v1927_v3 = vpop.f32.mrb[41].mxu1  ;;  %v5740_v40 = vpop.f32.mrb[50].mxu0 }
 0x1da   : > { %3250 = vst.msk [vmem:[%s5520_s20 + $0x90] sm:$0xf] %vm3213_vm5, %v3666_v32  ;;  %v3667_v57 = vpack.c.bf16 %v2930_v1, %v2930_v1  ;;  %v4131_v47 = vadd.f32 %v5687_v31, %v1927_v3  ;;  %v3937_v58 = vpop.f32.mrb[42].mxu1  ;;  %v5745_v36 = vpop.f32.mrb[51].mxu0 }
 0x1db   : > { %3253 = vst.msk [vmem:[%s5520_s20 + $0x9c] sm:$0xf] %vm3213_vm5, %v3669_v17  ;;  %v2871_v39 = vadd.f32 %v4130_v20, %v5508_v35  ;;  %v4132_v62 = vadd.f32 %v5692_v15, %v3937_v58  ;;  %v1930_v53 = vpop.f32.mrb[43].mxu1 }
 0x1dc   : > { %3251 = vst.msk [vmem:[%s5520_s20 + $0x94] sm:$0xf] %vm3213_vm5, %v3667_v57  ;;  %v2869_v4 = vadd.f32 %v4131_v47, %v5508_v35  ;;  %v4133_v25 = vadd.f32 %v5697_v56, %v1930_v53 }
 0x1dd   : > { %v2935_v54 = vmax.f32 %v2871_v39, 0.0  ;;  %v2872_v31 = vadd.f32 %v4132_v62, %v5508_v35 }
 0x1de   : > { %v2933_v23 = vmax.f32 %v2869_v4, 0.0  ;;  %v2870_v28 = vadd.f32 %v4133_v25, %v5508_v35 }
 0x1df   : > { %v3672_v49 = vpack.c.bf16 %v2935_v54, %v2935_v54  ;;  %v2936_v11 = vmax.f32 %v2872_v31, 0.0  ;;  %v5757_v24 = vpop.f32.mrb[52].mxu0 }
 0x1e0   : > { %v3670_v15 = vpack.c.bf16 %v2933_v23, %v2933_v23  ;;  %v2934_v43 = vmax.f32 %v2870_v28, 0.0  ;;  %v3940_v22 = vpop.f32.mrb[44].mxu1  ;;  %v5759_v51 = vpop.f32.mrb[53].mxu0 }
 0x1e1   : > { %3256 = vst.msk [vmem:[%s5520_s20 + $0xa8] sm:$0xf] %vm3213_vm5, %v3672_v49  ;;  %v3673_v56 = vpack.c.bf16 %v2936_v11, %v2936_v11  ;;  %v4134_v2 = vadd.f32 %v5709_v37, %v3940_v22  ;;  %v1943_v48 = vpop.f32.mrb[45].mxu1  ;;  %v5764_v61 = vpop.f32.mrb[54].mxu0 }
 0x1e2   : > { %3254 = vst.msk [vmem:[%s5520_s20 + $0xa0] sm:$0xf] %vm3213_vm5, %v3670_v15  ;;  %v3671_v7 = vpack.c.bf16 %v2934_v43, %v2934_v43  ;;  %v4135_v26 = vadd.f32 %v5711_v0, %v1943_v48  ;;  %v3941_v44 = vpop.f32.mrb[46].mxu1  ;;  %v5769_v8 = vpop.f32.mrb[55].mxu0 }
 0x1e3   : > { %3257 = vst.msk [vmem:[%s5520_s20 + $0xac] sm:$0xf] %vm3213_vm5, %v3673_v56  ;;  %v2875_v19 = vadd.f32 %v4134_v2, %v5508_v35  ;;  %v4136_v29 = vadd.f32 %v5716_v38, %v3941_v44  ;;  %v1946_v14 = vpop.f32.mrb[47].mxu1 }
 0x1e4   : > { %3255 = vst.msk [vmem:[%s5520_s20 + $0xa4] sm:$0xf] %vm3213_vm5, %v3671_v7  ;;  %v2873_v37 = vadd.f32 %v4135_v26, %v5508_v35  ;;  %v4137_v41 = vadd.f32 %v5721_v10, %v1946_v14 }
 0x1e5   : > { %v2939_v6 = vmax.f32 %v2875_v19, 0.0  ;;  %v2876_v0 = vadd.f32 %v4136_v29, %v5508_v35 }
 0x1e6   : > { %v2937_v45 = vmax.f32 %v2873_v37, 0.0  ;;  %v2874_v50 = vadd.f32 %v4137_v41, %v5508_v35 }
 0x1e7   : > { %v3676_v30 = vpack.c.bf16 %v2939_v6, %v2939_v6  ;;  %v2940_v13 = vmax.f32 %v2876_v0, 0.0  ;;  %v4084_v52 = vpop.f32.mrb[56].mxu0 }
 0x1e8   : > { %v3674_v38 = vpack.c.bf16 %v2937_v45, %v2937_v45  ;;  %v2938_v33 = vmax.f32 %v2874_v50, 0.0  ;;  %v3944_v5 = vpop.f32.mrb[48].mxu1  ;;  %v2727_v42 = vpop.f32.mrb[57].mxu0 }
 0x1e9   : > { %3260 = vst.msk [vmem:[%s5520_s20 + $0xb8] sm:$0xf] %vm3213_vm5, %v3676_v30  ;;  %v3677_v55 = vpack.c.bf16 %v2940_v13, %v2940_v13  ;;  %v4138_v10 = vadd.f32 %v5733_v34, %v3944_v5  ;;  %v1959_v46 = vpop.f32.mrb[49].mxu1  ;;  %v4085_v60 = vpop.f32.mrb[58].mxu0 }
 0x1ea   : > { %3258 = vst.msk [vmem:[%s5520_s20 + $0xb0] sm:$0xf] %vm3213_vm5, %v3674_v38  ;;  %v3675_v12 = vpack.c.bf16 %v2938_v33, %v2938_v33  ;;  %v4139_v16 = vadd.f32 %v5735_v27, %v1959_v46  ;;  %v3945_v21 = vpop.f32.mrb[50].mxu1  ;;  %v2730_v18 = vpop.f32.mrb[59].mxu0 }
 0x1eb   : > { %3261 = vst.msk [vmem:[%s5520_s20 + $0xbc] sm:$0xf] %vm3213_vm5, %v3677_v55  ;;  %v2879_v9 = vadd.f32 %v4138_v10, %v5508_v35  ;;  %v4140_v63 = vadd.f32 %v5740_v40, %v3945_v21  ;;  %v1962_v32 = vpop.f32.mrb[51].mxu1 }
 0x1ec   : > { %3259 = vst.msk [vmem:[%s5520_s20 + $0xb4] sm:$0xf] %vm3213_vm5, %v3675_v12  ;;  %v2877_v34 = vadd.f32 %v4139_v16, %v5508_v35  ;;  %v4141_v1 = vadd.f32 %v5745_v36, %v1962_v32 }
 0x1ed   : > { %v2943_v59 = vmax.f32 %v2879_v9, 0.0  ;;  %v2880_v27 = vadd.f32 %v4140_v63, %v5508_v35 }
 0x1ee   : > { %v2941_v17 = vmax.f32 %v2877_v34, 0.0  ;;  %v2878_v20 = vadd.f32 %v4141_v1, %v5508_v35 }
 0x1ef   : > { %v3680_v3 = vpack.c.bf16 %v2943_v59, %v2943_v59  ;;  %v2944_v57 = vmax.f32 %v2880_v27, 0.0  ;;  %v4088_v47 = vpop.f32.mrb[60].mxu0 }
 0x1f0   : > { %v3678_v40 = vpack.c.bf16 %v2941_v17, %v2941_v17  ;;  %v2942_v58 = vmax.f32 %v2878_v20, 0.0  ;;  %v3948_v39 = vpop.f32.mrb[52].mxu1  ;;  %v2743_v62 = vpop.f32.mrb[61].mxu0 }
 0x1f1   : > { %3264 = vst.msk [vmem:[%s5520_s20 + $0xc8] sm:$0xf] %vm3213_vm5, %v3680_v3  ;;  %v3681_v53 = vpack.c.bf16 %v2944_v57, %v2944_v57  ;;  %v4142_v36 = vadd.f32 %v5757_v24, %v3948_v39  ;;  %v1975_v4 = vpop.f32.mrb[53].mxu1  ;;  %v4089_v25 = vpop.f32.mrb[62].mxu0 }
 0x1f2   : > { %3262 = vst.msk [vmem:[%s5520_s20 + $0xc0] sm:$0xf] %vm3213_vm5, %v3678_v40  ;;  %v3679_v54 = vpack.c.bf16 %v2942_v58, %v2942_v58  ;;  %v4143_v31 = vadd.f32 %v5759_v51, %v1975_v4  ;;  %v3949_v23 = vpop.f32.mrb[54].mxu1  ;;  %v2746_v28 = vpop.f32.mrb[63].mxu0 }
 0x1f3   : > { %3265 = vst.msk [vmem:[%s5520_s20 + $0xcc] sm:$0xf] %vm3213_vm5, %v3681_v53  ;;  %v2883_v49 = vadd.f32 %v4142_v36, %v5508_v35  ;;  %v4144_v11 = vadd.f32 %v5764_v61, %v3949_v23  ;;  %v1978_v15 = vpop.f32.mrb[55].mxu1 }
 0x1f4   : > { %3263 = vst.msk [vmem:[%s5520_s20 + $0xc4] sm:$0xf] %vm3213_vm5, %v3679_v54  ;;  %v2881_v24 = vadd.f32 %v4143_v31, %v5508_v35  ;;  %v4145_v43 = vadd.f32 %v5769_v8, %v1978_v15 }
 0x1f5   : > { %v2947_v22 = vmax.f32 %v2883_v49, 0.0  ;;  %v2884_v51 = vadd.f32 %v4144_v11, %v5508_v35 }
 0x1f6   : > { %v2945_v56 = vmax.f32 %v2881_v24, 0.0  ;;  %v2882_v2 = vadd.f32 %v4145_v43, %v5508_v35 }
 0x1f7   : > { %v3684_v48 = vpack.c.bf16 %v2947_v22, %v2947_v22  ;;  %v2948_v7 = vmax.f32 %v2884_v51, 0.0 }
 0x1f8   : > { %v3682_v26 = vpack.c.bf16 %v2945_v56, %v2945_v56  ;;  %v2946_v61 = vmax.f32 %v2882_v2, 0.0  ;;  %v3952_v44 = vpop.f32.mrb[56].mxu1 }
 0x1f9   : > { %3268 = vst.msk [vmem:[%s5520_s20 + $0xd8] sm:$0xf] %vm3213_vm5, %v3684_v48  ;;  %v3685_v19 = vpack.c.bf16 %v2948_v7, %v2948_v7  ;;  %v4146_v29 = vadd.f32 %v4084_v52, %v3952_v44  ;;  %v1991_v14 = vpop.f32.mrb[57].mxu1 }
 0x1fa   : > { %3266 = vst.msk [vmem:[%s5520_s20 + $0xd0] sm:$0xf] %vm3213_vm5, %v3682_v26  ;;  %v3683_v8 = vpack.c.bf16 %v2946_v61, %v2946_v61  ;;  %v4147_v37 = vadd.f32 %v2727_v42, %v1991_v14  ;;  %v3953_v41 = vpop.f32.mrb[58].mxu1 }
 0x1fb   : > { %3269 = vst.msk [vmem:[%s5520_s20 + $0xdc] sm:$0xf] %vm3213_vm5, %v3685_v19  ;;  %v2887_v6 = vadd.f32 %v4146_v29, %v5508_v35  ;;  %v4148_v0 = vadd.f32 %v4085_v60, %v3953_v41  ;;  %v1994_v45 = vpop.f32.mrb[59].mxu1 }
 0x1fc   : > { %3267 = vst.msk [vmem:[%s5520_s20 + $0xd4] sm:$0xf] %vm3213_vm5, %v3683_v8  ;;  %v2885_v50 = vadd.f32 %v4147_v37, %v5508_v35  ;;  %v4149_v30 = vadd.f32 %v2730_v18, %v1994_v45 }
 0x1fd   : > { %v2951_v13 = vmax.f32 %v2887_v6, 0.0  ;;  %v2888_v52 = vadd.f32 %v4148_v0, %v5508_v35 }
 0x1fe   : > { %v2949_v38 = vmax.f32 %v2885_v50, 0.0  ;;  %v2886_v33 = vadd.f32 %v4149_v30, %v5508_v35 }
 0x1ff   : > { %v3688_v5 = vpack.c.bf16 %v2951_v13, %v2951_v13  ;;  %v2952_v42 = vmax.f32 %v2888_v52, 0.0 }
 0x200   : > { %v3686_v55 = vpack.c.bf16 %v2949_v38, %v2949_v38  ;;  %v2950_v10 = vmax.f32 %v2886_v33, 0.0  ;;  %v3956_v46 = vpop.f32.mrb[60].mxu1 }
 0x201   : > { %3272 = vst.msk [vmem:[%s5520_s20 + $0xe8] sm:$0xf] %vm3213_vm5, %v3688_v5  ;;  %v3689_v60 = vpack.c.bf16 %v2952_v42, %v2952_v42  ;;  %v4150_v12 = vadd.f32 %v4088_v47, %v3956_v46  ;;  %v2007_v16 = vpop.f32.mrb[61].mxu1 }
 0x202   : > { %3270 = vst.msk [vmem:[%s5520_s20 + $0xe0] sm:$0xf] %vm3213_vm5, %v3686_v55  ;;  %v3687_v21 = vpack.c.bf16 %v2950_v10, %v2950_v10  ;;  %v4151_v18 = vadd.f32 %v2743_v62, %v2007_v16  ;;  %v3957_v9 = vpop.f32.mrb[62].mxu1 }
 0x203   : > { %3273 = vst.msk [vmem:[%s5520_s20 + $0xec] sm:$0xf] %vm3213_vm5, %v3689_v60  ;;  %v2891_v63 = vadd.f32 %v4150_v12, %v5508_v35  ;;  %v4152_v32 = vadd.f32 %v4089_v25, %v3957_v9  ;;  %v2010_v34 = vpop.f32.mrb[63].mxu1 }
 0x204   : > { %3271 = vst.msk [vmem:[%s5520_s20 + $0xe4] sm:$0xf] %vm3213_vm5, %v3687_v21  ;;  %v2889_v1 = vadd.f32 %v4151_v18, %v5508_v35  ;;  %v4153_v59 = vadd.f32 %v2746_v28, %v2010_v34 }
 0x205   : > { %v2955_v27 = vmax.f32 %v2891_v63, 0.0  ;;  %v2892_v17 = vadd.f32 %v4152_v32, %v5508_v35 }
 0x206   : > { %v2953_v20 = vmax.f32 %v2889_v1, 0.0  ;;  %v2890_v3 = vadd.f32 %v4153_v59, %v5508_v35 }
 0x207   : > { %v3692_v57 = vpack.c.bf16 %v2955_v27, %v2955_v27  ;;  %v2956_v47 = vmax.f32 %v2892_v17, 0.0 }
 0x208   : > { %v3690_v40 = vpack.c.bf16 %v2953_v20, %v2953_v20  ;;  %v2954_v58 = vmax.f32 %v2890_v3, 0.0 }
 0x209   : > { %3276 = vst.msk [vmem:[%s5520_s20 + $0xf8] sm:$0xf] %vm3213_vm5, %v3692_v57  ;;  %v3693_v39 = vpack.c.bf16 %v2956_v47, %v2956_v47 }
 0x20a   : > { %3274 = vst.msk [vmem:[%s5520_s20 + $0xf0] sm:$0xf] %vm3213_vm5, %v3690_v40  ;;  %v3691_v62 = vpack.c.bf16 %v2954_v58, %v2954_v58 }
 0x20b   : > { %3277 = vst.msk [vmem:[%s5520_s20 + $0xfc] sm:$0xf] %vm3213_vm5, %v3693_v39 }
 0x20c   : > { %3275 = vst.msk [vmem:[%s5520_s20 + $0xf4] sm:$0xf] %vm3213_vm5, %v3691_v62 }
 0x20d PF: > { %s13_s16 = sadd.s32 1, %s4404_s16   ;;  %s5966_s12 = smov %s4396_s14 }
 0x20e   : > { %p10_p6 = scmp.ge.s32.totalorder %s13_s16, 6   ;;  %s5967_s13 = smov %s4400_s15 }
 0x20f   : > { %s5968_s14 = smov %s5971_s17  ;;  %s5969_s15 = smov %s5975_s18 }
 0x210   :  { %12 = sbr.rel (!%p10_p6) target bundleno = 3 (0x3), region = 63 }

// kernel: image_encoder_forward.5
= control target key start
LH: loop header
LB: loop body
LE: loop exit
PB: predicated region body
PF: predicated region fallthrough
CT: control target
= control target key end

     0   :  { %s1909_s12 = smov 0   ;;  %s1911_s13 = smov 0   ;;  %s2248_s0 = inlined_call_operand.vmem [shape: bf16[2,17,17,128], index: 0, kind: input, shape index: {}]   ;;  %s2249_s1 = inlined_call_operand.vmem [shape: bf16[4,128,64], index: 1, kind: input, shape index: {}]   ;;  %s2250_s2 = inlined_call_operand.vmem [shape: f32[1,64], index: 2, kind: input, shape index: {}]   ;;  %s2251_s3 = inlined_call_operand.vmem [shape: bf16[512,64], index: 3, kind: output, shape index: {}]  }
   0x1   :  { %s1913_s14 = smov 0   ;;  %s1915_s15 = smov 0  }
   0x2   :  { %s1917_s16 = smov 0  }
   0x3 LB: > { %s22_s17 = sadd.s32 1, %s1879_s14  ;;  %s25_s18 = sadd.s32 1, %s1883_s15  ;;  %s1887_s16 = sphi %s1917_s16, %s13_s16   ;;  %s1883_s15 = sphi %s1915_s15, %s2257_s15   ;;  %s1879_s14 = sphi %s1913_s14, %s2256_s14   ;;  %s1875_s13 = sphi %s1911_s13, %s2255_s13   ;;  %s1871_s12 = sphi %s1909_s12, %s2254_s12  }
   0x4   : > { %p23_p0 = scmp.ge.s32.totalorder %s22_s17, 2  ;;  %p1388_p1 = scmp.ge.s32.totalorder %s1887_s16, 1 }
   0x5   : > { %p143_p2 = scmp.lt.s32.totalorder %s1887_s16, 5 }
   0x6   : > { %s2259_s17 = smov (%p23_p0, %s22_s17), 0  ;;  %s2261_s18 = smov (!%p23_p0, %s25_s18), %s1883_s15 }
   0x7   : > { %p144_p3 = pnand %p1388_p1, %p143_p2  ;;  %p27_p4 = scmp.ge.s32.totalorder %s2261_s18, 2 }
   0x8   : > { %v1808_v0 = vld [vmem:[%s2249_s1 + $0x40] sm:$0xff] (!%p144_p3)   ;;  %v1810_v2 = vld [vmem:[%s2249_s1 + $0x48] sm:$0xff] (!%p144_p3)   ;;  %s1393_s25 = smul.u32 (!%p144_p3), 24, %s1871_s12  ;;  %v1812_v4 = vld [vmem:[%s2249_s1 + $0x50] sm:$0xff] (!%p144_p3)   ;;  %vm224_vm0 = vsmask.f32 (!%p144_p3), 3328 }
   0x9   : > { %s2263_s18 = smov (%p27_p4, %s2261_s18), 0  ;;  %147 = sbr.rel (%p144_p3) target bundleno = 323 (0x143), region = 32 }
   0xa   : > { %v1809_v1 = vld [vmem:[%s2249_s1 + $0x80] sm:$0xff] (!%p144_p3)   ;;  %1592 = vmatprep.subr.bf16.mxu1 (!%p144_p3), %v1808_v0  ;;  %v1811_v3 = vld [vmem:[%s2249_s1 + $0x88] sm:$0xff] (!%p144_p3)   ;;  %s177_s28 = smul.u32 (!%p144_p3), 51, %s1875_s13  ;;  %v1813_v5 = vld [vmem:[%s2249_s1 + $0x90] sm:$0xff] (!%p144_p3)   ;;  %vm225_vm1 = vsmask.f32 (!%p144_p3), 7440 }
   0xb   : > { %1656 = vmatprep.subr.bf16.mxu0 (!%p144_p3), %v1809_v1  ;;  %1593 = vmatpush3.bf16.msra.mxu1 (!%p144_p3), %v1808_v0  ;;  %v1814_v6 = vld [vmem:[%s2249_s1 + $0x58] sm:$0xff] (!%p144_p3)   ;;  %v1816_v8 = vld [vmem:[%s2249_s1 + $0x60] sm:$0xff] (!%p144_p3)   ;;  %v1818_v10 = vld [vmem:[%s2249_s1 + $0x68] sm:$0xff] (!%p144_p3)   ;;  %vm1299_vm3 = vcmask (!%p144_p3), 519168  }
   0xc   : > { %1657 = vmatpush3.bf16.msra.mxu0 (!%p144_p3), %v1809_v1  ;;  %1594 = vmatprep.subr.bf16.mxu1 (!%p144_p3), %v1810_v2  ;;  %s178_s6 = sadd.s32 (!%p144_p3), %s1393_s25, %s177_s28  ;;  %v1815_v7 = vld [vmem:[%s2249_s1 + $0x98] sm:$0xff] (!%p144_p3)   ;;  %v1817_v9 = vld [vmem:[%s2249_s1 + $0xa0] sm:$0xff] (!%p144_p3)   ;;  %v1819_v11 = vld [vmem:[%s2249_s1 + $0xa8] sm:$0xff] (!%p144_p3)  }
   0xd   : > { %1658 = vmatprep.subr.bf16.mxu0 (!%p144_p3), %v1811_v3  ;;  %s1394_s11 = sshll.u32 (!%p144_p3), %s178_s6, 2  ;;  %v1820_v17 = vld [vmem:[%s2249_s1 + $0x70] sm:$0xff] (!%p144_p3)   ;;  %v1822_v37 = vld [vmem:[%s2249_s1 + $0x78] sm:$0xff] (!%p144_p3)   ;;  %vm2011_vm2 = vmor (!%p144_p3), %vm224_vm0, %vm225_vm1 }
   0xe   : > { %s1978_s25 = scalar_lea.vmem (!%p144_p3), %s2248_s0, %s1394_s11  ;;  %v1821_v32 = vld [vmem:[%s2249_s1 + $0xb0] sm:$0xff] (!%p144_p3)   ;;  %v1823_v44 = vld [vmem:[%s2249_s1 + $0xb8] sm:$0xff] (!%p144_p3)   ;;  %v1825_v1 = vld [vmem:[%s2249_s1] sm:$0xff] (!%p144_p3)  }
   0xf   : > { %1595 = vmatpush3.bf16.msra.mxu1 (!%p144_p3), %v1810_v2  ;;  %v1987_v12 = vld [vmem:[%s1978_s25] sm:$0xf] (!%p144_p3)  ;;  %v1990_v13 = vld [vmem:[%s1978_s25 + $0x4] sm:$0xf] (!%p144_p3)  ;;  %v183_v14 = vld [vmem:[%s1978_s25 + $0x8] sm:$0x1] (!%p144_p3) }
  0x10   : > { %1659 = vmatpush3.bf16.msra.mxu0 %v1811_v3  ;;  %1596 = vmatprep.subr.bf16.mxu1 %v1812_v4  ;;  %v228_v15 = vshrl.u32 %v1987_v12, 16  ;;  %v231_v16 = vshll.u32 %v1987_v12, 16  ;;  %v237_v18 = vshll.u32 %v1990_v13, 16  ;;  %v241_v19 = vshrl.u32 %v1990_v13, 16  ;;  %v184_v21 = vld [vmem:[%s1978_s25 + $0xc] sm:$0xf] }
  0x11   : > { %1660 = vmatprep.subr.bf16.mxu0 %v1813_v5  ;;  %v247_v20 = vshll.u32 %v183_v14, 16  ;;  %v185_v24 = vld [vmem:[%s1978_s25 + $0x10] sm:$0xf]  ;;  %v252_v25 = vshrl.u32 %v184_v21, 16  ;;  %v255_v26 = vshll.u32 %v184_v21, 16 }
  0x12   : > { %v230_v22 = vrot.slane %v228_v15, 4  ;;  %v233_v23 = vrot.slane %v231_v16, 5  ;;  %v239_v27 = vrot.slane %v237_v18, 5  ;;  %v243_v28 = vrot.slane %v241_v19, 4  ;;  %v186_v31 = vld [vmem:[%s1978_s25 + $0x14] sm:$0x1] }
  0x13   : > { %1597 = vmatpush3.bf16.msra.mxu1 %v1812_v4  ;;  %v249_v29 = vrot.slane %v247_v20, 5  ;;  %v261_v30 = vshll.u32 %v185_v24, 16  ;;  %v254_v34 = vrot.slane %v252_v25, 4  ;;  %v257_v35 = vrot.slane %v255_v26, 5  ;;  %v187_v43 = vld [vmem:[%s1978_s25 + $0x18] sm:$0xf] }
  0x14   : > { %1661 = vmatpush3.bf16.msra.mxu0 %v1813_v5  ;;  %1598 = vmatprep.subr.bf16.mxu1 %v1814_v6  ;;  %v234_v33 = vor.u32 %v233_v23, %v230_v22  ;;  %v265_v36 = vshrl.u32 %v185_v24, 16  ;;  %v244_v39 = vor.u32 %v243_v28, %v239_v27  ;;  %v2015_v41 = vcombine.low %v184_v21, %v185_v24  ;;  %v188_v48 = vld [vmem:[%s1978_s25 + $0x1c] sm:$0xf]  ;;  %v189_v4 = vld [vmem:[%s1978_s25 + $0x20] sm:$0x1]  ;;  %v1828_v16 = vld [vmem:[%s2249_s1 + $0x8] sm:$0xff]  }
  0x15   : > { %1662 = vmatprep.subr.bf16.mxu0 %v1815_v7  ;;  %v263_v40 = vrot.slane %v261_v30, 5  ;;  %v271_v42 = vshll.u32 %v186_v31, 16  ;;  %v258_v46 = vor.u32 %v257_v35, %v254_v34  ;;  %v276_v49 = vshrl.u32 %v187_v43, 16  ;;  %v192_v20 = vld [vmem:[%s1978_s25 + $0x2c] sm:$0x1] }
  0x16   : > { %v235_v45 = vrot.slane %v234_v33, 4  ;;  %v267_v47 = vrot.slane %v265_v36, 4  ;;  %v245_v50 = vrot.slane %v244_v39, 4  ;;  %v279_v52 = vshll.u32 %v187_v43, 16  ;;  %1672 = vmatprep.mubr.bf16.mxu0 %v2015_v41  ;;  %v194_v30 = vld [vmem:[%s1978_s25 + $0x34] sm:$0xf] }
  0x17   : > { %1599 = vmatpush3.bf16.msra.mxu1 %v1814_v6  ;;  %v273_v51 = vrot.slane %v271_v42, 5  ;;  %v285_v53 = vshll.u32 %v188_v48, 16  ;;  %v259_v55 = vrot.slane %v258_v46, 4  ;;  %v278_v57 = vrot.slane %v276_v49, 4  ;;  %v190_v6 = vld [vmem:[%s1978_s25 + $0x24] sm:$0xf] }
  0x18   : > { %1663 = vmatpush3.bf16.msra.mxu0 %v1815_v7  ;;  %1600 = vmatprep.subr.bf16.mxu1 %v1816_v8  ;;  %v240_v54 = vsel %vm2011_vm2, %v235_v45, %v239_v27  ;;  %v268_v56 = vor.u32 %v267_v47, %v263_v40  ;;  %v250_v58 = vsel %vm2011_vm2, %v245_v50, %v249_v29  ;;  %v281_v59 = vrot.slane %v279_v52, 5  ;;  %v193_v29 = vld [vmem:[%s1978_s25 + $0x30] sm:$0xf]  ;;  %v1829_v31 = vld [vmem:[%s2249_s1 + $0xc8] sm:$0xff]  }
  0x19   : > { %1664 = vmatprep.subr.bf16.mxu0 %v1817_v9  ;;  %v287_v60 = vrot.slane %v285_v53, 5  ;;  %v289_v61 = vshrl.u32 %v188_v48, 16  ;;  %v1411_v62 = vcombine.low %v240_v54, %v250_v58  ;;  %v264_v0 = vsel %vm2011_vm2, %v259_v55, %v263_v40  ;;  %v1833_v53 = vld [vmem:[%s2249_s1 + $0xd0] sm:$0xff]   ;;  %v195_v54 = vld [vmem:[%s1978_s25 + $0x38] sm:$0x1] }
  0x1a   : > { %v269_v63 = vrot.slane %v268_v56, 4  ;;  %v2032_v3 = vcombine.low %v187_v43, %v188_v48  ;;  %v282_v5 = vor.u32 %v281_v59, %v278_v57  ;;  %v303_v14 = vshll.u32 %v190_v6, 16  ;;  %v196_v59 = vld [vmem:[%s1978_s25 + $0x3c] sm:$0xf] }
  0x1b   : > { %1601 = vmatpush3.bf16.msra.mxu1 %v1816_v8  ;;  %v291_v2 = vrot.slane %v289_v61, 4  ;;  %1608 = vmatprep.mubr.bf16.mxu1 %v1411_v62  ;;  %v1827_v8 = vld [vmem:[%s2249_s1 + $0xc0] sm:$0xff]   ;;  %v319_v34 = vshll.u32 %v192_v20, 16  ;;  %v324_v35 = vshrl.u32 %v193_v29, 16  ;;  %v327_v39 = vshll.u32 %v193_v29, 16  ;;  %v1834_v62 = vld [vmem:[%s2249_s1 + $0x18] sm:$0xff]  }
  0x1c   : > { %1665 = vmatpush3.bf16.msra.mxu0 %v1817_v9  ;;  %1602 = vmatprep.subr.bf16.mxu1 %v1818_v10  ;;  %v274_v7 = vsel %vm2011_vm2, %v269_v63, %v273_v51  ;;  %v295_v9 = vshll.u32 %v189_v4, 16  ;;  %v305_v23 = vrot.slane %v303_v14, 5  ;;  %v333_v40 = vshll.u32 %v194_v30, 16  ;;  %v1837_v20 = vld [vmem:[%s2249_s1 + $0x20] sm:$0xff]  }
  0x1d   : > { %1666 = vmatprep.subr.bf16.mxu0 %v1819_v11  ;;  %v2042_v15 = vcombine.low %v264_v0, %v274_v7  ;;  %v292_v18 = vor.u32 %v291_v2, %v287_v60  ;;  %v337_v42 = vshrl.u32 %v194_v30, 16  ;;  %v321_v46 = vrot.slane %v319_v34, 5  ;;  %v198_v2 = vld [vmem:[%s1978_s25 + $0x44] sm:$0x1] }
  0x1e   : > { %v297_v21 = vrot.slane %v295_v9, 5  ;;  %v326_v47 = vrot.slane %v324_v35, 4  ;;  %v329_v48 = vrot.slane %v327_v39, 5  ;;  %v335_v49 = vrot.slane %v333_v40, 5 }
  0x1f   : > { %1603 = vmatpush3.bf16.msra.mxu1 %v1818_v10  ;;  %v191_v10 = vld [vmem:[%s1978_s25 + $0x28] sm:$0xf]  ;;  %v293_v26 = vrot.slane %v292_v18, 4  ;;  %v339_v50 = vrot.slane %v337_v42, 4  ;;  %v2074_v55 = vcombine.low %v193_v29, %v194_v30  ;;  %v343_v58 = vshll.u32 %v195_v54, 16 }
  0x20   : > { %1667 = vmatpush3.bf16.msra.mxu0 %v1819_v11  ;;  %1604 = vmatprep.subr.bf16.mxu1 %v1820_v17  ;;  %v300_v11 = vshrl.u32 %v190_v6, 16  ;;  %v309_v19 = vshll.u32 %v191_v10, 16  ;;  %v313_v24 = vshrl.u32 %v191_v10, 16  ;;  %v2050_v28 = vcombine.low %v190_v6, %v191_v10 }
  0x21   : > { %1668 = vmatprep.subr.bf16.mxu0 %v1821_v32  ;;  %v298_v36 = vsel %vm2011_vm2, %v293_v26, %v297_v21  ;;  %v330_v56 = vor.u32 %v329_v48, %v326_v47  ;;  %v340_v57 = vor.u32 %v339_v50, %v335_v49  ;;  %v348_v63 = vshrl.u32 %v196_v59, 16  ;;  %v199_v21 = vld [vmem:[%s1978_s25 + $0x48] sm:$0xf]  ;;  %v202_v47 = vld [vmem:[%s1978_s25 + $0x54] sm:$0xf] }
  0x22   : > { %v302_v22 = vrot.slane %v300_v11, 4  ;;  %v311_v27 = vrot.slane %v309_v19, 5  ;;  %v351_v0 = vshll.u32 %v196_v59, 16  ;;  %v367_v19 = vshll.u32 %v198_v2, 16 }
  0x23   : > { %1605 = vmatpush3.bf16.msra.mxu1 %v1820_v17  ;;  %v283_v17 = vrot.slane %v282_v5, 4  ;;  %v1835_v5 = vld [vmem:[%s2249_s1 + $0xd8] sm:$0xff]   ;;  %v331_v6 = vrot.slane %v330_v56, 4  ;;  %v341_v7 = vrot.slane %v340_v57, 4  ;;  %v350_v9 = vrot.slane %v348_v63, 4  ;;  %v1841_v56 = vld [vmem:[%s2249_s1 + $0xe8] sm:$0xff]  }
  0x24   : > { %1669 = vmatpush3.bf16.msra.mxu0 %v1821_v32  ;;  %1606 = vmatprep.subr.bf16.mxu1 %v1822_v37  ;;  %v315_v32 = vrot.slane %v313_v24, 4  ;;  %v306_v33 = vor.u32 %v305_v23, %v302_v22  ;;  %v353_v10 = vrot.slane %v351_v0, 5  ;;  %v200_v22 = vld [vmem:[%s1978_s25 + $0x4c] sm:$0xf]  ;;  %v372_v26 = vshrl.u32 %v199_v21, 16 }
  0x25   : > { %1670 = vmatprep.subr.bf16.mxu0 %v1823_v44  ;;  %v288_v25 = vsel %vm2011_vm2, %v283_v17, %v287_v60  ;;  %v197_v60 = vld [vmem:[%s1978_s25 + $0x40] sm:$0xf]  ;;  %v369_v29 = vrot.slane %v367_v19, 5  ;;  %v375_v30 = vshll.u32 %v199_v21, 16  ;;  %v399_v57 = vshll.u32 %v202_v47, 16 }
  0x26   : > { %v2064_v43 = vcombine.low %v288_v25, %v298_v36  ;;  %v316_v45 = vor.u32 %v315_v32, %v311_v27  ;;  %v361_v14 = vshrl.u32 %v197_v60, 16  ;;  %v2094_v18 = vcombine.low %v196_v59, %v197_v60 }
  0x27   : > { %1607 = vmatpush3.bf16.msra.mxu1 %v1822_v37  ;;  %v1831_v37 = vld [vmem:[%s2249_s1 + $0x10] sm:$0xff]   ;;  %v354_v25 = vor.u32 %v353_v10, %v350_v9  ;;  %v385_v32 = vshrl.u32 %v200_v22, 16  ;;  %v374_v35 = vrot.slane %v372_v26, 4  ;;  %v377_v36 = vrot.slane %v375_v30, 5  ;;  %v1847_v30 = vld [vmem:[%s2249_s1 + $0xf8] sm:$0xff]  }
  0x28   : > { %1671 = vmatpush3.bf16.msra.mxu0 %v1823_v44  ;;  %1624 = vmatprep.subr.bf16.mxu1 %v1825_v1  ;;  %v307_v44 = vrot.slane %v306_v33, 4  ;;  %v317_v52 = vrot.slane %v316_v45, 4  ;;  %v363_v24 = vrot.slane %v361_v14, 4  ;;  %v1840_v45 = vld [vmem:[%s2249_s1 + $0x28] sm:$0xff]   ;;  %v206_v14 = vld [vmem:[%s1978_s25 + $0x64] sm:$0xf] }
  0x29   : > { %1688 = vmatprep.subr.bf16.mxu0 %v1827_v8  ;;  %v355_v33 = vrot.slane %v354_v25, 4  ;;  %v387_v39 = vrot.slane %v385_v32, 4  ;;  %v378_v48 = vor.u32 %v377_v36, %v374_v35  ;;  %v1427_v32 = vcombine.low %v1987_v12, %v1990_v13 }
  0x2a   : > { %1609 = vmatmul.mubr.bf16.vlgmr.msra.gmra.mrb[0].mxu1 %v2042_v15  ;;  %v312_v51 = vsel %vm2011_vm2, %v307_v44, %v311_v27  ;;  %v322_v61 = vsel %vm2011_vm2, %v317_v52, %v321_v46  ;;  %v1839_v27 = vld [vmem:[%s2249_s1 + $0xe0] sm:$0xff]   ;;  %v2111_v44 = vcombine.low %v199_v21, %v200_v22  ;;  %v201_v46 = vld [vmem:[%s1978_s25 + $0x50] sm:$0x1]  ;;  %v396_v52 = vshrl.u32 %v202_v47, 16 }
  0x2b   : > { %1673 = vmatmul.mubr.bf16.vlgmr.msra.gmra.mrb[0].mxu0 %v2032_v3  ;;  %1625 = vmatpush3.bf16.msra.mxu1 %v1825_v1  ;;  %v357_v1 = vshll.u32 %v197_v60, 16  ;;  %v2084_v4 = vcombine.low %v312_v51, %v322_v61  ;;  %v391_v50 = vshll.u32 %v201_v46, 16  ;;  %v203_v51 = vld [vmem:[%s1978_s25 + $0x58] sm:$0xf]  ;;  %v379_v61 = vrot.slane %v378_v48, 4 }
  0x2c   : > { %1689 = vmatpush3.bf16.msra.mxu0 %v1827_v8  ;;  %1626 = vmatprep.subr.bf16.mxu1 %v1828_v16  ;;  %v345_v8 = vrot.slane %v343_v58, 5  ;;  %v405_v58 = vshll.u32 %v203_v51, 16  ;;  %v409_v59 = vshrl.u32 %v203_v51, 16  ;;  %v398_v0 = vrot.slane %v396_v52, 4  ;;  %v2178_v46 = vld [vmem:[%s2250_s2] ss:$0 sm:$0xff] }
  0x2d   : > { %1690 = vmatprep.subr.bf16.mxu0 %v1829_v31  ;;  %1612 = vmatprep.mubr.bf16.mxu1 %v2064_v43  ;;  %v359_v11 = vrot.slane %v357_v1, 5  ;;  %v393_v63 = vrot.slane %v391_v50, 5  ;;  %v401_v1 = vrot.slane %v399_v57, 5  ;;  %v2134_v9 = vcombine.low %v202_v47, %v203_v51 }
  0x2e   : > { %1676 = vmatprep.mubr.bf16.mxu0 %v2050_v28  ;;  %v346_v17 = vsel %vm2011_vm2, %v341_v7, %v345_v8  ;;  %v407_v2 = vrot.slane %v405_v58, 5  ;;  %v1000_v35 = vshll.u32 %v206_v14, 16  ;;  %v1004_v36 = vshrl.u32 %v206_v14, 16 }
  0x2f   : > { %1627 = vmatpush3.bf16.msra.mxu1 %v1828_v16  ;;  %v336_v16 = vsel %vm2011_vm2, %v331_v6, %v335_v49  ;;  %v364_v34 = vor.u32 %v363_v24, %v359_v11  ;;  %v360_v40 = vsel %vm2011_vm2, %v355_v33, %v359_v11  ;;  %v205_v6 = vld [vmem:[%s1978_s25 + $0x60] sm:$0xf]  ;;  %v1843_v11 = vld [vmem:[%s2249_s1 + $0x30] sm:$0xff]  }
  0x30   : > { %1691 = vmatpush3.bf16.msra.mxu0 %v1829_v31  ;;  %1628 = vmatprep.subr.bf16.mxu1 %v1831_v37  ;;  %v2102_v23 = vcombine.low %v336_v16, %v346_v17  ;;  %v381_v31 = vshll.u32 %v200_v22, 16  ;;  %v402_v17 = vor.u32 %v401_v1, %v398_v0  ;;  %v1459_v25 = vcombine.low %v205_v6, %v206_v14 }
  0x31   : > { %1692 = vmatprep.subr.bf16.mxu0 %v1833_v53  ;;  %v365_v42 = vrot.slane %v364_v34, 4  ;;  %v991_v33 = vshrl.u32 %v205_v6, 16  ;;  %v994_v34 = vshll.u32 %v205_v6, 16 }
  0x32   : > { %1613 = vmatmul.mubr.bf16.gmra.mrb[4].mxu1 %v2084_v4  ;;  %v403_v22 = vrot.slane %v402_v17, 4 }
  0x33   : > { %1677 = vmatmul.mubr.bf16.gmra.mrb[4].mxu0 %v2074_v55  ;;  %1629 = vmatpush3.bf16.msra.mxu1 %v1831_v37  ;;  %v383_v37 = vrot.slane %v381_v31, 5  ;;  %v370_v54 = vsel %vm2011_vm2, %v365_v42, %v369_v29  ;;  %v1846_v29 = vld [vmem:[%s2249_s1 + $0x38] sm:$0xff]   ;;  %v993_v12 = vrot.slane %v991_v33, 4  ;;  %v996_v13 = vrot.slane %v994_v34, 5 }
  0x34   : > { %1693 = vmatpush3.bf16.msra.mxu0 %v1833_v53  ;;  %1630 = vmatprep.subr.bf16.mxu1 %v1834_v62  ;;  %v204_v53 = vld [vmem:[%s1978_s25 + $0x5c] sm:$0x1]  ;;  %v2125_v60 = vcombine.low %v360_v40, %v370_v54  ;;  %v408_v26 = vsel %vm2011_vm2, %v403_v22, %v407_v2  ;;  %v207_v40 = vld [vmem:[%s1978_s25 + $0x68] sm:$0x1]  ;;  %s1389_s25 = sshll.u32 %s1875_s13, 1 }
  0x35   : > { %1694 = vmatprep.subr.bf16.mxu0 %v1835_v5  ;;  %1616 = vmatprep.mubr.bf16.mxu1 %v2102_v23  ;;  %v388_v49 = vor.u32 %v387_v39, %v383_v37  ;;  %v384_v7 = vsel %vm2011_vm2, %v379_v61, %v383_v37  ;;  %v415_v10 = vshll.u32 %v204_v53, 16  ;;  %v1002_v37 = vrot.slane %v1000_v35, 5  ;;  %s165_s5 = sadd.s32 %s1871_s12, %s1389_s25 }
  0x36   : > { %1680 = vmatprep.mubr.bf16.mxu0 %v2094_v18  ;;  %v1006_v39 = vrot.slane %v1004_v36, 4  ;;  %s1390_s6 = sshll.u32 %s165_s5, 4 }
  0x37   : > { %1631 = vmatpush3.bf16.msra.mxu1 %v1834_v62  ;;  %v389_v62 = vrot.slane %v388_v49, 4  ;;  %v417_v21 = vrot.slane %v415_v10, 5  ;;  %p167_p5 = scmp.lt.s32.totalorder %s1390_s6, 63 }
  0x38   : > { %1695 = vmatpush3.bf16.msra.mxu0 %v1835_v5  ;;  %1632 = vmatprep.subr.bf16.mxu1 %v1837_v20  ;;  %v411_v5 = vrot.slane %v409_v59, 4 }
  0x39   : > { %1696 = vmatprep.subr.bf16.mxu0 %v1839_v27  ;;  %v394_v8 = vsel %vm2011_vm2, %v389_v62, %v393_v63  ;;  %s2265_s6 = smov (!%p167_p5, %s1390_s6), 63 }
  0x3a   : > { %1617 = vmatmul.mubr.bf16.gmra.mrb[8].mxu1 %v2125_v60  ;;  %v1417_v16 = vcombine.low %v384_v7, %v394_v8  ;;  %v412_v19 = vor.u32 %v411_v5, %v407_v2  ;;  %s1391_s9 = sshll.u32 %s2265_s6, 2 }
  0x3b   : > { %1681 = vmatmul.mubr.bf16.gmra.mrb[8].mxu0 %v2111_v44  ;;  %1633 = vmatpush3.bf16.msra.mxu1 %v1837_v20  ;;  %v1845_v20 = vld [vmem:[%s2249_s1 + $0xf0] sm:$0xff]   ;;  %s2186_s10 = scalar_lea.vmem %s2251_s3, %s1391_s9 }
  0x3c   : > { %1697 = vmatpush3.bf16.msra.mxu0 %v1839_v27  ;;  %1634 = vmatprep.subr.bf16.mxu1 %v1840_v45  ;;  %v413_v24 = vrot.slane %v412_v19, 4 }
  0x3d   : > { %1698 = vmatprep.subr.bf16.mxu0 %v1841_v56  ;;  %1684 = vmatprep.mubr.bf16.mxu0 %v2134_v9 }
  0x3e   : > { %1620 = vmatprep.mubr.bf16.mxu1 %v1417_v16  ;;  %v418_v27 = vsel %vm2011_vm2, %v413_v24, %v417_v21 }
  0x3f   : > { %1635 = vmatpush3.bf16.msra.mxu1 %v1840_v45  ;;  %v1418_v31 = vcombine.low %v408_v26, %v418_v27 }
  0x40   : > { %1699 = vmatpush3.bf16.msra.mxu0 %v1841_v56  ;;  %1636 = vmatprep.subr.bf16.mxu1 %v1843_v11 }
  0x41   : > { %1700 = vmatprep.subr.bf16.mxu0 %v1845_v20 }
  0x42   : > { %1621 = vmatmul.mubr.bf16.gmra.mrb[12].mxu1 %v1418_v31 }
  0x43   : > { %1685 = vmatmul.mubr.bf16.gmra.mrb[12].mxu0 %v1459_v25  ;;  %1637 = vmatpush3.bf16.msra.mxu1 %v1843_v11 }
  0x44   : > { %1701 = vmatpush3.bf16.msra.mxu0 %v1845_v20  ;;  %1638 = vmatprep.subr.bf16.mxu1 %v1846_v29 }
  0x45   : > { %1702 = vmatprep.subr.bf16.mxu0 %v1847_v30  ;;  %1640 = vmatprep.mubr.bf16.mxu1 %v1427_v32 }
  0x46   : > { %1704 = vmatprep.mubr.bf16.mxu0 %v2042_v15  ;;  %v997_v15 = vor.u32 %v996_v13, %v993_v12 }
  0x47   : > { %1639 = vmatpush3.bf16.msra.mxu1 %v1846_v29 }
  0x48   : > { %1703 = vmatpush3.bf16.msra.mxu0 %v1847_v30 }
  0x4a   : > { %1641 = vmatmul.mubr.bf16.vlgmr.msra.gmra.mrb[0].mxu1 %v2015_v41  ;;  %v1010_v41 = vshll.u32 %v207_v40, 16 }
  0x4b   : > { %1705 = vmatmul.mubr.bf16.vlgmr.msra.gmra.mrb[0].mxu0 %v2064_v43  ;;  %1644 = vmatprep.mubr.bf16.mxu1 %v2032_v3  ;;  %v1007_v43 = vor.u32 %v1006_v39, %v1002_v37 }
  0x4c   : > { %1708 = vmatprep.mubr.bf16.mxu0 %v2084_v4  ;;  %v998_v4 = vrot.slane %v997_v15, 4  ;;  %v1012_v42 = vrot.slane %v1010_v41, 5 }
  0x4d   : > { %v1008_v3 = vrot.slane %v1007_v43, 4 }
  0x52   : > { %1645 = vmatmul.mubr.bf16.gmra.mrb[4].mxu1 %v2050_v28  ;;  %v1013_v28 = vsel %vm2011_vm2, %v1008_v3, %v1012_v42 }
  0x53   : > { %1709 = vmatmul.mubr.bf16.gmra.mrb[4].mxu0 %v2102_v23  ;;  %1648 = vmatprep.mubr.bf16.mxu1 %v2074_v55  ;;  %v1003_v23 = vsel %vm2011_vm2, %v998_v4, %v1002_v37 }
  0x54   : > { %1712 = vmatprep.mubr.bf16.mxu0 %v2125_v60  ;;  %v1484_v45 = vcombine.low %v1003_v23, %v1013_v28 }
  0x5a   : > { %1649 = vmatmul.mubr.bf16.gmra.mrb[8].mxu1 %v2094_v18 }
  0x5b   : > { %1713 = vmatmul.mubr.bf16.gmra.mrb[8].mxu0 %v1417_v16  ;;  %1652 = vmatprep.mubr.bf16.mxu1 %v2111_v44 }
  0x5c   : > { %1716 = vmatprep.mubr.bf16.mxu0 %v1418_v31 }
  0x62   : > { %1653 = vmatmul.mubr.bf16.gmra.mrb[12].mxu1 %v2134_v9 }
  0x63   : > { %1717 = vmatmul.mubr.bf16.gmra.mrb[12].mxu0 %v1484_v45 }
 0x11d   : > { %v1642_v18 = vpop.f32.mrb[0].mxu1 }
 0x11e   : > { %v1706_v55 = vpop.f32.mrb[0].mxu0  ;;  %v743_v48 = vpop.f32.mrb[1].mxu1 }
 0x11f   : > { %v1117_v38 = vpop.f32.mrb[1].mxu0  ;;  %v1720_v47 = vadd.f32 %v1706_v55, %v1642_v18  ;;  %v1643_v50 = vpop.f32.mrb[2].mxu1 }
 0x120   : > { %v1707_v44 = vpop.f32.mrb[2].mxu0  ;;  %v1721_v49 = vadd.f32 %v1117_v38, %v743_v48  ;;  %v746_v54 = vpop.f32.mrb[3].mxu1 }
 0x121   : > { %v1120_v51 = vpop.f32.mrb[3].mxu0  ;;  %v1205_v52 = vadd.f32 %v1720_v47, %v2178_v46  ;;  %v1722_v53 = vadd.f32 %v1707_v44, %v1643_v50 }
 0x122   : > { %v1203_v56 = vadd.f32 %v1721_v49, %v2178_v46  ;;  %v1723_v57 = vadd.f32 %v1120_v51, %v746_v54 }
 0x123   : > { %v1221_v58 = vmax.f32 %v1205_v52, 0.0  ;;  %v1206_v59 = vadd.f32 %v1722_v53, %v2178_v46 }
 0x124   : > { %v1219_v60 = vmax.f32 %v1203_v56, 0.0  ;;  %v1204_v61 = vadd.f32 %v1723_v57, %v2178_v46 }
 0x125   : > { %v1514_v62 = vpack.c.bf16 %v1221_v58, %v1221_v58  ;;  %v1222_v63 = vmax.f32 %v1206_v59, 0.0  ;;  %v1646_v5 = vpop.f32.mrb[4].mxu1 }
 0x126   : > { %v1710_v0 = vpop.f32.mrb[4].mxu0  ;;  %v1512_v1 = vpack.c.bf16 %v1219_v60, %v1219_v60  ;;  %v1220_v2 = vmax.f32 %v1204_v61, 0.0  ;;  %v759_v9 = vpop.f32.mrb[5].mxu1 }
 0x127   : > { %v1133_v6 = vpop.f32.mrb[5].mxu0  ;;  %1302 = vst.msk [vmem:[%s2186_s10 + $0x8] sm:$0xf] %vm1299_vm3, %v1514_v62  ;;  %v1515_v7 = vpack.c.bf16 %v1222_v63, %v1222_v63  ;;  %v1724_v8 = vadd.f32 %v1710_v0, %v1646_v5  ;;  %v1647_v16 = vpop.f32.mrb[6].mxu1 }
 0x128   : > { %v1711_v10 = vpop.f32.mrb[6].mxu0  ;;  %1300 = vst.msk [vmem:[%s2186_s10] sm:$0xf] %vm1299_vm3, %v1512_v1  ;;  %v1513_v11 = vpack.c.bf16 %v1220_v2, %v1220_v2  ;;  %v1725_v14 = vadd.f32 %v1133_v6, %v759_v9  ;;  %v762_v21 = vpop.f32.mrb[7].mxu1 }
 0x129   : > { %v1136_v17 = vpop.f32.mrb[7].mxu0  ;;  %1303 = vst.msk [vmem:[%s2186_s10 + $0xc] sm:$0xf] %vm1299_vm3, %v1515_v7  ;;  %v1209_v19 = vadd.f32 %v1724_v8, %v2178_v46  ;;  %v1726_v20 = vadd.f32 %v1711_v10, %v1647_v16 }
 0x12a   : > { %1301 = vst.msk [vmem:[%s2186_s10 + $0x4] sm:$0xf] %vm1299_vm3, %v1513_v11  ;;  %v1207_v22 = vadd.f32 %v1725_v14, %v2178_v46  ;;  %v1727_v24 = vadd.f32 %v1136_v17, %v762_v21 }
 0x12b   : > { %v1225_v25 = vmax.f32 %v1209_v19, 0.0  ;;  %v1210_v26 = vadd.f32 %v1726_v20, %v2178_v46 }
 0x12c   : > { %v1223_v27 = vmax.f32 %v1207_v22, 0.0  ;;  %v1208_v29 = vadd.f32 %v1727_v24, %v2178_v46 }
 0x12d   : > { %v1518_v30 = vpack.c.bf16 %v1225_v25, %v1225_v25  ;;  %v1226_v31 = vmax.f32 %v1210_v26, 0.0  ;;  %v1650_v35 = vpop.f32.mrb[8].mxu1 }
 0x12e   : > { %v1714_v32 = vpop.f32.mrb[8].mxu0  ;;  %v1516_v33 = vpack.c.bf16 %v1223_v27, %v1223_v27  ;;  %v1224_v34 = vmax.f32 %v1208_v29, 0.0  ;;  %v775_v37 = vpop.f32.mrb[9].mxu1 }
 0x12f   : > { %v1149_v36 = vpop.f32.mrb[9].mxu0  ;;  %1306 = vst.msk [vmem:[%s2186_s10 + $0x18] sm:$0xf] %vm1299_vm3, %v1518_v30  ;;  %v1519_v12 = vpack.c.bf16 %v1226_v31, %v1226_v31  ;;  %v1728_v13 = vadd.f32 %v1714_v32, %v1650_v35  ;;  %v1651_v43 = vpop.f32.mrb[10].mxu1 }
 0x130   : > { %v1715_v39 = vpop.f32.mrb[10].mxu0  ;;  %1304 = vst.msk [vmem:[%s2186_s10 + $0x10] sm:$0xf] %vm1299_vm3, %v1516_v33  ;;  %v1517_v40 = vpack.c.bf16 %v1224_v34, %v1224_v34  ;;  %v1729_v15 = vadd.f32 %v1149_v36, %v775_v37  ;;  %v778_v42 = vpop.f32.mrb[11].mxu1 }
 0x131   : > { %v1152_v41 = vpop.f32.mrb[11].mxu0  ;;  %1307 = vst.msk [vmem:[%s2186_s10 + $0x1c] sm:$0xf] %vm1299_vm3, %v1519_v12  ;;  %v1213_v4 = vadd.f32 %v1728_v13, %v2178_v46  ;;  %v1730_v3 = vadd.f32 %v1715_v39, %v1651_v43 }
 0x132   : > { %1305 = vst.msk [vmem:[%s2186_s10 + $0x14] sm:$0xf] %vm1299_vm3, %v1517_v40  ;;  %v1211_v23 = vadd.f32 %v1729_v15, %v2178_v46  ;;  %v1731_v28 = vadd.f32 %v1152_v41, %v778_v42 }
 0x133   : > { %v1229_v45 = vmax.f32 %v1213_v4, 0.0  ;;  %v1214_v55 = vadd.f32 %v1730_v3, %v2178_v46 }
 0x134   : > { %v1227_v18 = vmax.f32 %v1211_v23, 0.0  ;;  %v1212_v38 = vadd.f32 %v1731_v28, %v2178_v46 }
 0x135   : > { %v1522_v47 = vpack.c.bf16 %v1229_v45, %v1229_v45  ;;  %v1230_v48 = vmax.f32 %v1214_v55, 0.0  ;;  %v1654_v51 = vpop.f32.mrb[12].mxu1 }
 0x136   : > { %v1718_v44 = vpop.f32.mrb[12].mxu0  ;;  %v1520_v49 = vpack.c.bf16 %v1227_v18, %v1227_v18  ;;  %v1228_v50 = vmax.f32 %v1212_v38, 0.0  ;;  %v791_v56 = vpop.f32.mrb[13].mxu1 }
 0x137   : > { %v1165_v52 = vpop.f32.mrb[13].mxu0  ;;  %1310 = vst.msk [vmem:[%s2186_s10 + $0x28] sm:$0xf] %vm1299_vm3, %v1522_v47  ;;  %v1523_v53 = vpack.c.bf16 %v1230_v48, %v1230_v48  ;;  %v1732_v54 = vadd.f32 %v1718_v44, %v1654_v51  ;;  %v1655_v60 = vpop.f32.mrb[14].mxu1 }
 0x138   : > { %v1719_v57 = vpop.f32.mrb[14].mxu0  ;;  %1308 = vst.msk [vmem:[%s2186_s10 + $0x20] sm:$0xf] %vm1299_vm3, %v1520_v49  ;;  %v1521_v58 = vpack.c.bf16 %v1228_v50, %v1228_v50  ;;  %v1733_v59 = vadd.f32 %v1165_v52, %v791_v56  ;;  %v794_v0 = vpop.f32.mrb[15].mxu1 }
 0x139   : > { %v1168_v61 = vpop.f32.mrb[15].mxu0  ;;  %1311 = vst.msk [vmem:[%s2186_s10 + $0x2c] sm:$0xf] %vm1299_vm3, %v1523_v53  ;;  %v1217_v62 = vadd.f32 %v1732_v54, %v2178_v46  ;;  %v1734_v63 = vadd.f32 %v1719_v57, %v1655_v60 }
 0x13a   : > { %1309 = vst.msk [vmem:[%s2186_s10 + $0x24] sm:$0xf] %vm1299_vm3, %v1521_v58  ;;  %v1215_v1 = vadd.f32 %v1733_v59, %v2178_v46  ;;  %v1735_v2 = vadd.f32 %v1168_v61, %v794_v0 }
 0x13b   : > { %v1233_v5 = vmax.f32 %v1217_v62, 0.0  ;;  %v1218_v6 = vadd.f32 %v1734_v63, %v2178_v46 }
 0x13c   : > { %v1231_v7 = vmax.f32 %v1215_v1, 0.0  ;;  %v1216_v8 = vadd.f32 %v1735_v2, %v2178_v46 }
 0x13d   : > { %v1526_v9 = vpack.c.bf16 %v1233_v5, %v1233_v5  ;;  %v1234_v10 = vmax.f32 %v1218_v6, 0.0 }
 0x13e   : > { %v1524_v11 = vpack.c.bf16 %v1231_v7, %v1231_v7  ;;  %v1232_v14 = vmax.f32 %v1216_v8, 0.0 }
 0x13f   : > { %1314 = vst.msk [vmem:[%s2186_s10 + $0x38] sm:$0xf] %vm1299_vm3, %v1526_v9  ;;  %v1527_v16 = vpack.c.bf16 %v1234_v10, %v1234_v10 }
 0x140   : > { %1312 = vst.msk [vmem:[%s2186_s10 + $0x30] sm:$0xf] %vm1299_vm3, %v1524_v11  ;;  %v1525_v17 = vpack.c.bf16 %v1232_v14, %v1232_v14 }
 0x141   : > { %1315 = vst.msk [vmem:[%s2186_s10 + $0x3c] sm:$0xf] %vm1299_vm3, %v1527_v16 }
 0x142   : > { %1313 = vst.msk [vmem:[%s2186_s10 + $0x34] sm:$0xf] %vm1299_vm3, %v1525_v17 }
 0x143 PF: > { %s13_s16 = sadd.s32 1, %s1887_s16   ;;  %s2254_s12 = smov %s1879_s14 }
 0x144   : > { %p10_p6 = scmp.ge.s32.totalorder %s13_s16, 6   ;;  %s2255_s13 = smov %s1883_s15 }
 0x145   : > { %s2256_s14 = smov %s2259_s17  ;;  %s2257_s15 = smov %s2263_s18 }
 0x146   :  { %12 = sbr.rel (!%p10_p6) target bundleno = 3 (0x3), region = 63 }

// kernel: image_encoder_forward.6
= control target key start
LH: loop header
LB: loop body
LE: loop exit
PB: predicated region body
PF: predicated region fallthrough
CT: control target
= control target key end

     0   :  { %s1637_s12 = smov 0   ;;  %s1639_s13 = smov 0   ;;  %s1954_s0 = inlined_call_operand.vmem [shape: bf16[2,9,9,256], index: 0, kind: input, shape index: {}]   ;;  %s1955_s1 = inlined_call_operand.vmem [shape: bf16[4,256,128], index: 1, kind: input, shape index: {}]   ;;  %s1956_s2 = inlined_call_operand.vmem [shape: f32[1,128], index: 2, kind: input, shape index: {}]   ;;  %s1957_s3 = inlined_call_operand.vmem [shape: bf16[128,128], index: 3, kind: output, shape index: {}]  }
   0x1   :  { %s1641_s14 = smov 0   ;;  %s1643_s15 = smov 0  }
   0x2   :  { %s1645_s16 = smov 0  }
   0x3 LB: > { %s22_s17 = sadd.s32 1, %s1607_s14  ;;  %s25_s18 = sadd.s32 1, %s1611_s15  ;;  %s1615_s16 = sphi %s1645_s16, %s13_s16   ;;  %s1611_s15 = sphi %s1643_s15, %s1963_s15   ;;  %s1607_s14 = sphi %s1641_s14, %s1962_s14   ;;  %s1603_s13 = sphi %s1639_s13, %s1961_s13   ;;  %s1599_s12 = sphi %s1637_s12, %s1960_s12  }
   0x4   : > { %p23_p0 = scmp.ge.s32.totalorder %s22_s17, 2  ;;  %p1147_p1 = scmp.ge.s32.totalorder %s1615_s16, 1 }
   0x5   : > { %p143_p2 = scmp.lt.s32.totalorder %s1615_s16, 5 }
   0x6   : > { %s1965_s17 = smov (%p23_p0, %s22_s17), 0  ;;  %s1967_s18 = smov (!%p23_p0, %s25_s18), %s1611_s15 }
   0x7   : > { %p144_p3 = pnand %p1147_p1, %p143_p2  ;;  %p27_p4 = scmp.ge.s32.totalorder %s1967_s18, 2 }
   0x8   : > { %v1505_v0 = vld [vmem:[%s1955_s1 + $0xc0] sm:$0xff] (!%p144_p3)   ;;  %v1509_v4 = vld [vmem:[%s1955_s1 + $0xc8] sm:$0xff] (!%p144_p3)   ;;  %v1513_v8 = vld [vmem:[%s1955_s1 + $0xd0] sm:$0xff] (!%p144_p3)   ;;  %s177_s19 = smul.u32 (!%p144_p3), 36, %s1603_s13  ;;  %s1337_s22 = sshll.u32 (!%p144_p3), %s1599_s12, 4 }
   0x9   : > { %s1969_s18 = smov (%p27_p4, %s1967_s18), 0  ;;  %147 = sbr.rel (%p144_p3) target bundleno = 311 (0x137), region = 32 }
   0xa   : > { %v1506_v1 = vld [vmem:[%s1955_s1 + $0x40] sm:$0xff] (!%p144_p3)   ;;  %1353 = vmatprep.subr.bf16.mxu0 (!%p144_p3), %v1505_v0  ;;  %v1510_v5 = vld [vmem:[%s1955_s1 + $0x48] sm:$0xff] (!%p144_p3)   ;;  %v1514_v9 = vld [vmem:[%s1955_s1 + $0x50] sm:$0xff] (!%p144_p3)   ;;  %s178_s29 = sadd.s32 (!%p144_p3), %s1337_s22, %s177_s19  ;;  %vm223_vm0 = vsmask.f32 (!%p144_p3), 3328 }
   0xb   : > { %v1507_v2 = vld [vmem:[%s1955_s1 + $0x80] sm:$0xff] (!%p144_p3)   ;;  %1381 = vmatprep.subr.bf16.mxu1 (!%p144_p3), %v1506_v1  ;;  %v1511_v6 = vld [vmem:[%s1955_s1 + $0x88] sm:$0xff] (!%p144_p3)   ;;  %v1515_v10 = vld [vmem:[%s1955_s1 + $0x90] sm:$0xff] (!%p144_p3)   ;;  %s1153_s9 = sshll.u32 (!%p144_p3), %s178_s29, 2  ;;  %vm224_vm1 = vsmask.f32 (!%p144_p3), 7440 }
   0xc   : > { %v1508_v3 = vld [vmem:[%s1955_s1] sm:$0xff] (!%p144_p3)   ;;  %1354 = vmatpush3.bf16.msra.mxu0 (!%p144_p3), %v1507_v2  ;;  %v1512_v7 = vld [vmem:[%s1955_s1 + $0x8] sm:$0xff] (!%p144_p3)   ;;  %v1516_v11 = vld [vmem:[%s1955_s1 + $0x10] sm:$0xff] (!%p144_p3)   ;;  %s1766_s25 = scalar_lea.vmem (!%p144_p3), %s1954_s0, %s1153_s9 }
   0xd   : > { %1382 = vmatpush3.bf16.msra.mxu1 (!%p144_p3), %v1508_v3  ;;  %1355 = vmatprep.subr.bf16.mxu0 (!%p144_p3), %v1509_v4  ;;  %v1517_v12 = vld [vmem:[%s1955_s1 + $0xd8] sm:$0xff] (!%p144_p3)   ;;  %v1521_v16 = vld [vmem:[%s1955_s1 + $0xe0] sm:$0xff] (!%p144_p3)   ;;  %v1525_v20 = vld [vmem:[%s1955_s1 + $0xe8] sm:$0xff] (!%p144_p3)  }
   0xe   : > { %1383 = vmatprep.subr.bf16.mxu1 (!%p144_p3), %v1510_v5  ;;  %v1518_v13 = vld [vmem:[%s1955_s1 + $0x58] sm:$0xff] (!%p144_p3)   ;;  %v1522_v17 = vld [vmem:[%s1955_s1 + $0x60] sm:$0xff] (!%p144_p3)   ;;  %v1526_v21 = vld [vmem:[%s1955_s1 + $0x68] sm:$0xff] (!%p144_p3)  }
   0xf   : > { %v1519_v14 = vld [vmem:[%s1955_s1 + $0x98] sm:$0xff] (!%p144_p3)   ;;  %v1523_v18 = vld [vmem:[%s1955_s1 + $0xa0] sm:$0xff] (!%p144_p3)   ;;  %v1527_v22 = vld [vmem:[%s1955_s1 + $0xa8] sm:$0xff] (!%p144_p3)  }
  0x10   : > { %1356 = vmatpush3.bf16.msra.mxu0 %v1511_v6  ;;  %v1520_v15 = vld [vmem:[%s1955_s1 + $0x18] sm:$0xff]   ;;  %v1524_v19 = vld [vmem:[%s1955_s1 + $0x20] sm:$0xff]   ;;  %v1528_v23 = vld [vmem:[%s1955_s1 + $0x28] sm:$0xff]  }
  0x11   : > { %1384 = vmatpush3.bf16.msra.mxu1 %v1512_v7  ;;  %1357 = vmatprep.subr.bf16.mxu0 %v1513_v8  ;;  %v1529_v24 = vld [vmem:[%s1955_s1 + $0xf0] sm:$0xff]   ;;  %v1533_v28 = vld [vmem:[%s1955_s1 + $0xf8] sm:$0xff]   ;;  %v181_v32 = vld [vmem:[%s1766_s25] sm:$0xff] }
  0x12   : > { %1385 = vmatprep.subr.bf16.mxu1 %v1514_v9  ;;  %v1530_v25 = vld [vmem:[%s1955_s1 + $0x70] sm:$0xff]   ;;  %v1534_v29 = vld [vmem:[%s1955_s1 + $0x78] sm:$0xff]   ;;  %v182_v33 = vld [vmem:[%s1766_s25 + $0x8] sm:$0x11]  ;;  %v227_v36 = vshrl.u32 %v181_v32, 16  ;;  %v230_v40 = vshll.u32 %v181_v32, 16 }
  0x13   : > { %v1531_v26 = vld [vmem:[%s1955_s1 + $0xb0] sm:$0xff]   ;;  %v1535_v30 = vld [vmem:[%s1955_s1 + $0xb8] sm:$0xff]   ;;  %v1783_v39 = vld [vmem:[%s1766_s25 + $0x20] sm:$0xff]  ;;  %v236_v41 = vshll.u32 %v182_v33, 16 }
  0x14   : > { %1358 = vmatpush3.bf16.msra.mxu0 %v1515_v10  ;;  %v1532_v27 = vld [vmem:[%s1955_s1 + $0x30] sm:$0xff]   ;;  %v1536_v31 = vld [vmem:[%s1955_s1 + $0x38] sm:$0xff]   ;;  %v1539_v43 = vld [vmem:[%s1955_s1 + $0x140] sm:$0xff]   ;;  %v229_v44 = vrot.slane %v227_v36, 4  ;;  %v232_v47 = vrot.slane %v230_v40, 5  ;;  %v255_v50 = vshrl.u32 %v1783_v39, 16 }
  0x15   : > { %1386 = vmatpush3.bf16.msra.mxu1 %v1516_v11  ;;  %1359 = vmatprep.subr.bf16.mxu0 %v1517_v12  ;;  %v1777_v34 = vld [vmem:[%s1766_s25 + $0x10] sm:$0xff]  ;;  %v184_v35 = vld [vmem:[%s1766_s25 + $0x18] sm:$0x11]  ;;  %v238_v52 = vrot.slane %v236_v41, 5  ;;  %v1540_v53 = vld [vmem:[%s1955_s1 + $0x1c0] sm:$0xff]   ;;  %v258_v57 = vshll.u32 %v1783_v39, 16 }
  0x16   : > { %1387 = vmatprep.subr.bf16.mxu1 %v1518_v13  ;;  %v1207_v37 = vcombine.high %v181_v32, %v1777_v34  ;;  %v1206_v38 = vcombine.low %v181_v32, %v1777_v34  ;;  %v241_v42 = vshrl.u32 %v1777_v34, 16  ;;  %v244_v45 = vshll.u32 %v1777_v34, 16  ;;  %vm1795_vm2 = vmor %vm223_vm0, %vm224_vm1  ;;  %v1542_v59 = vld [vmem:[%s1955_s1 + $0x180] sm:$0xff]   ;;  %v186_v61 = vld [vmem:[%s1766_s25 + $0x28] sm:$0x11] }
  0x17   : > { %v250_v46 = vshll.u32 %v184_v35, 16  ;;  %v233_v51 = vor.u32 %v232_v47, %v229_v44  ;;  %v1544_v63 = vld [vmem:[%s1955_s1 + $0x1c8] sm:$0xff]   ;;  %v257_v1 = vrot.slane %v255_v50, 4  ;;  %v1541_v2 = vld [vmem:[%s1955_s1 + $0x100] sm:$0xff]   ;;  %v260_v3 = vrot.slane %v258_v57, 5  ;;  %v1548_v8 = vld [vmem:[%s1955_s1 + $0x1d0] sm:$0xff]  }
  0x18   : > { %1360 = vmatpush3.bf16.msra.mxu0 %v1519_v14  ;;  %624 = vmatprep.mubr.bf16.mxu1 %v1207_v37  ;;  %v243_v48 = vrot.slane %v241_v42, 4  ;;  %v246_v49 = vrot.slane %v244_v45, 5  ;;  %v1546_v6 = vld [vmem:[%s1955_s1 + $0x188] sm:$0xff]   ;;  %v264_v9 = vshll.u32 %v186_v61, 16  ;;  %v1550_v12 = vld [vmem:[%s1955_s1 + $0x190] sm:$0xff]   ;;  %v1552_v14 = vld [vmem:[%s1955_s1 + $0x1d8] sm:$0xff]  }
  0x19   : > { %1388 = vmatpush3.bf16.msra.mxu1 %v1520_v15  ;;  %1361 = vmatprep.subr.bf16.mxu0 %v1521_v16  ;;  %v252_v56 = vrot.slane %v250_v46, 5  ;;  %v234_v58 = vrot.slane %v233_v51, 4  ;;  %v1543_v7 = vld [vmem:[%s1955_s1 + $0x148] sm:$0xff]   ;;  %v261_v11 = vor.u32 %v260_v3, %v257_v1  ;;  %v1547_v13 = vld [vmem:[%s1955_s1 + $0x150] sm:$0xff]   ;;  %v189_v57 = vld [vmem:[%s1766_s25 + $0x40] sm:$0xff] }
  0x1a   : > { %1389 = vmatprep.subr.bf16.mxu1 %v1522_v17  ;;  %v247_v55 = vor.u32 %v246_v49, %v243_v48  ;;  %v1545_v10 = vld [vmem:[%s1955_s1 + $0x108] sm:$0xff]   ;;  %v266_v15 = vrot.slane %v264_v9, 5  ;;  %v1549_v16 = vld [vmem:[%s1955_s1 + $0x110] sm:$0xff]  }
  0x1b   : > { %v239_v62 = vsel %vm1795_vm2, %v234_v58, %v238_v52  ;;  %v262_v17 = vrot.slane %v261_v11, 4  ;;  %v1560_v37 = vld [vmem:[%s1955_s1 + $0x168] sm:$0xff]   ;;  %v1566_v45 = vld [vmem:[%s1955_s1 + $0x1f0] sm:$0xff]   ;;  %v1259_v52 = vcombine.high %v1777_v34, %v1783_v39 }
  0x1c   : > { %1362 = vmatpush3.bf16.msra.mxu0 %v1523_v18  ;;  %v248_v60 = vrot.slane %v247_v55, 4  ;;  %v1554_v18 = vld [vmem:[%s1955_s1 + $0x198] sm:$0xff]   ;;  %v1564_v41 = vld [vmem:[%s1955_s1 + $0x1a8] sm:$0xff]   ;;  %v1565_v46 = vld [vmem:[%s1955_s1 + $0x170] sm:$0xff]  }
  0x1d   : > { %1390 = vmatpush3.bf16.msra.mxu1 %v1524_v19  ;;  %1363 = vmatprep.subr.bf16.mxu0 %v1525_v20  ;;  %v1551_v19 = vld [vmem:[%s1955_s1 + $0x158] sm:$0xff]   ;;  %v1568_v48 = vld [vmem:[%s1955_s1 + $0x1b0] sm:$0xff]   ;;  %v190_v61 = vld [vmem:[%s1766_s25 + $0x48] sm:$0x11] }
  0x1e   : > { %1391 = vmatprep.subr.bf16.mxu1 %v1526_v21  ;;  %v1811_v0 = vsel %vm1795_vm2, %v248_v60, %v252_v56  ;;  %v1553_v20 = vld [vmem:[%s1955_s1 + $0x118] sm:$0xff]   ;;  %v1556_v21 = vld [vmem:[%s1955_s1 + $0x1e0] sm:$0xff]   ;;  %v1567_v51 = vld [vmem:[%s1955_s1 + $0x130] sm:$0xff]   ;;  %v838_v60 = vshll.u32 %v189_v57, 16 }
  0x1f   : > { %v1186_v4 = vcombine.low %v239_v62, %v1811_v0  ;;  %v1187_v5 = vcombine.high %v239_v62, %v1811_v0  ;;  %v1569_v55 = vld [vmem:[%s1955_s1 + $0x178] sm:$0xff]   ;;  %v844_v62 = vshll.u32 %v190_v61, 16 }
  0x20   : > { %1364 = vmatpush3.bf16.msra.mxu0 %v1527_v22  ;;  %v1555_v22 = vld [vmem:[%s1955_s1 + $0x160] sm:$0xff]   ;;  %v1572_v56 = vld [vmem:[%s1955_s1 + $0x1b8] sm:$0xff]  }
  0x21   : > { %1392 = vmatpush3.bf16.msra.mxu1 %v1528_v23  ;;  %1365 = vmatprep.subr.bf16.mxu0 %v1529_v24  ;;  %v1859_v23 = vsel %vm1795_vm2, %v262_v17, %v266_v15  ;;  %v1558_v24 = vld [vmem:[%s1955_s1 + $0x1a0] sm:$0xff]  }
  0x22   : > { %1393 = vmatprep.subr.bf16.mxu1 %v1530_v25  ;;  %459 = vmatprep.mubr.bf16.mxu0 %v1187_v5  ;;  %v1865_v25 = vld [vmem:[%s1766_s25 + $0x30] sm:$0xff]  ;;  %v1311_v33 = vcombine.high %v1811_v0, %v1859_v23  ;;  %v1310_v58 = vcombine.low %v1811_v0, %v1859_v23  ;;  %v1258_v0 = vcombine.low %v1777_v34, %v1783_v39 }
  0x23   : > { %v1261_v5 = vcombine.high %v1865_v25, %v189_v57 }
  0x24   : > { %1366 = vmatpush3.bf16.msra.mxu0 %v1531_v26  ;;  %v188_v26 = vld [vmem:[%s1766_s25 + $0x38] sm:$0x11]  ;;  %s1148_s25 = sshll.u32 %s1603_s13, 1 }
  0x25   : > { %1394 = vmatpush3.bf16.msra.mxu1 %v1532_v27  ;;  %1367 = vmatprep.subr.bf16.mxu0 %v1533_v28  ;;  %v269_v27 = vshrl.u32 %v1865_v25, 16  ;;  %v272_v28 = vshll.u32 %v1865_v25, 16  ;;  %v278_v32 = vshll.u32 %v188_v26, 16  ;;  %s165_s10 = sadd.s32 %s1599_s12, %s1148_s25 }
  0x26   : > { %1395 = vmatprep.subr.bf16.mxu1 %v1534_v29  ;;  %v1209_v29 = vcombine.high %v1783_v39, %v1865_v25  ;;  %s1149_s11 = sshll.u32 %s165_s10, 2 }
  0x27   : > { %v271_v35 = vrot.slane %v269_v27, 4  ;;  %v274_v36 = vrot.slane %v272_v28, 5  ;;  %v280_v40 = vrot.slane %v278_v32, 5  ;;  %p167_p5 = scmp.lt.s32.totalorder %s1149_s11, 15 }
  0x28   : > { %1368 = vmatpush3.bf16.msra.mxu0 %v1535_v30  ;;  %v1208_v30 = vcombine.low %v1783_v39, %v1865_v25 }
  0x29   : > { %1396 = vmatpush3.bf16.msra.mxu1 %v1536_v31  ;;  %1409 = vmatprep.subr.bf16.mxu0 %v1539_v43  ;;  %v1557_v31 = vld [vmem:[%s1955_s1 + $0x120] sm:$0xff]   ;;  %v275_v42 = vor.u32 %v274_v36, %v271_v35  ;;  %v1563_v43 = vld [vmem:[%s1955_s1 + $0x128] sm:$0xff]   ;;  %s1971_s11 = smov (!%p167_p5, %s1149_s11), 15 }
  0x2a   : > { %1437 = vmatprep.subr.bf16.mxu1 %v1540_v53  ;;  %v1570_v53 = vld [vmem:[%s1955_s1 + $0x1f8] sm:$0xff]   ;;  %s1150_s12 = sshll.u32 %s1971_s11, 2 }
  0x2b   : > { %460 = vmatmul.mubr.bf16.vlgmr.msra.gmra.mrb[0].mxu0 %v1186_v4  ;;  %v276_v44 = vrot.slane %v275_v42, 4  ;;  %v846_v4 = vrot.slane %v844_v62, 5  ;;  %s170_s22 = scalar_lea.vmem %s1957_s3, %s1150_s12 }
  0x2c   : > { %625 = vmatmul.mubr.bf16.vlgmr.msra.gmra.mrb[0].mxu1 %v1206_v38  ;;  %1410 = vmatpush3.bf16.msra.mxu0 %v1541_v2  ;;  %v1561_v38 = vld [vmem:[%s1955_s1 + $0x1e8] sm:$0xff]   ;;  %v840_v2 = vrot.slane %v838_v60, 5 }
  0x2d   : > { %1438 = vmatpush3.bf16.msra.mxu1 %v1542_v59  ;;  %1411 = vmatprep.subr.bf16.mxu0 %v1543_v7  ;;  %v281_v47 = vsel %vm1795_vm2, %v276_v44, %v280_v40  ;;  %v835_v59 = vshrl.u32 %v189_v57, 16 }
  0x2e   : > { %1439 = vmatprep.subr.bf16.mxu1 %v1544_v63  ;;  %632 = vmatprep.mubr.bf16.mxu1 %v1209_v29  ;;  %v1189_v49 = vcombine.high %v1859_v23, %v281_v47  ;;  %v1188_v50 = vcombine.low %v1859_v23, %v281_v47  ;;  %v1571_v63 = vld [vmem:[%s1955_s1 + $0x138] sm:$0xff]  }
  0x2f   : > { %v837_v1 = vrot.slane %v835_v59, 4 }
  0x30   : > { %1412 = vmatpush3.bf16.msra.mxu0 %v1545_v10  ;;  %467 = vmatprep.mubr.bf16.mxu0 %v1189_v49  ;;  %v1260_v10 = vcombine.low %v1865_v25, %v189_v57 }
  0x31   : > { %1440 = vmatpush3.bf16.msra.mxu1 %v1546_v6  ;;  %1413 = vmatprep.subr.bf16.mxu0 %v1547_v13  ;;  %v841_v3 = vor.u32 %v840_v2, %v837_v1 }
  0x32   : > { %1441 = vmatprep.subr.bf16.mxu1 %v1548_v8 }
  0x33   : > { %468 = vmatmul.mubr.bf16.gmra.mrb[4].mxu0 %v1188_v50  ;;  %v842_v6 = vrot.slane %v841_v3, 4 }
  0x34   : > { %1414 = vmatpush3.bf16.msra.mxu0 %v1549_v16  ;;  %633 = vmatmul.mubr.bf16.gmra.mrb[4].mxu1 %v1208_v30 }
  0x35   : > { %1442 = vmatpush3.bf16.msra.mxu1 %v1550_v12  ;;  %1415 = vmatprep.subr.bf16.mxu0 %v1551_v19  ;;  %v847_v7 = vsel %vm1795_vm2, %v842_v6, %v846_v4 }
  0x36   : > { %1443 = vmatprep.subr.bf16.mxu1 %v1552_v14  ;;  %1019 = vmatprep.mubr.bf16.mxu1 %v1311_v33  ;;  %v1313_v8 = vcombine.high %v281_v47, %v847_v7  ;;  %v1312_v9 = vcombine.low %v281_v47, %v847_v7 }
  0x37   : > { %813 = vmatprep.mubr.bf16.mxu0 %v1259_v52 }
  0x38   : > { %1416 = vmatpush3.bf16.msra.mxu0 %v1553_v20 }
  0x39   : > { %1444 = vmatpush3.bf16.msra.mxu1 %v1554_v18  ;;  %1417 = vmatprep.subr.bf16.mxu0 %v1555_v22 }
  0x3a   : > { %1445 = vmatprep.subr.bf16.mxu1 %v1556_v21 }
  0x3c   : > { %1418 = vmatpush3.bf16.msra.mxu0 %v1557_v31 }
  0x3d   : > { %1446 = vmatpush3.bf16.msra.mxu1 %v1558_v24  ;;  %1419 = vmatprep.subr.bf16.mxu0 %v1560_v37 }
  0x3e   : > { %1447 = vmatprep.subr.bf16.mxu1 %v1561_v38 }
  0x40   : > { %1420 = vmatpush3.bf16.msra.mxu0 %v1563_v43 }
  0x41   : > { %1448 = vmatpush3.bf16.msra.mxu1 %v1564_v41  ;;  %1421 = vmatprep.subr.bf16.mxu0 %v1565_v46 }
  0x42   : > { %1449 = vmatprep.subr.bf16.mxu1 %v1566_v45 }
  0x44   : > { %1422 = vmatpush3.bf16.msra.mxu0 %v1567_v51 }
  0x45   : > { %1450 = vmatpush3.bf16.msra.mxu1 %v1568_v48  ;;  %1423 = vmatprep.subr.bf16.mxu0 %v1569_v55 }
  0x46   : > { %1451 = vmatprep.subr.bf16.mxu1 %v1570_v53  ;;  %v1330_v53 = vld [vmem:[%s1956_s2] ss:$0 sm:$0xff] }
  0x48   : > { %1424 = vmatpush3.bf16.msra.mxu0 %v1571_v63 }
  0x49   : > { %1452 = vmatpush3.bf16.msra.mxu1 %v1572_v56 }
  0x4b   : > { %814 = vmatmul.mubr.bf16.vlgmr.msra.gmra.mrb[8].mxu0 %v1258_v0 }
  0x4c   : > { %1020 = vmatmul.mubr.bf16.vlgmr.msra.gmra.mrb[8].mxu1 %v1310_v58  ;;  %821 = vmatprep.mubr.bf16.mxu0 %v1261_v5 }
  0x4d   : > { %1027 = vmatprep.mubr.bf16.mxu1 %v1313_v8 }
  0x53   : > { %822 = vmatmul.mubr.bf16.gmra.mrb[12].mxu0 %v1260_v10 }
  0x54   : > { %1028 = vmatmul.mubr.bf16.gmra.mrb[12].mxu1 %v1312_v9 }
  0xfe   : > { %v1369_v15 = vpop.f32.mrb[0].mxu0 }
  0xff   : > { %v1397_v11 = vpop.f32.mrb[0].mxu1  ;;  %v1370_v16 = vpop.f32.mrb[1].mxu0 }
 0x100   : > { %v1398_v12 = vpop.f32.mrb[1].mxu1  ;;  %v1371_v17 = vadd.f32 %v1370_v16, %v1369_v15  ;;  %v1372_v54 = vpop.f32.mrb[2].mxu0 }
 0x101   : > { %v1399_v13 = vadd.f32 %v1398_v12, %v1397_v11  ;;  %v1400_v34 = vpop.f32.mrb[2].mxu1  ;;  %v1373_v18 = vpop.f32.mrb[3].mxu0 }
 0x102   : > { %v1401_v39 = vpop.f32.mrb[3].mxu1  ;;  %v1374_v20 = vadd.f32 %v1373_v18, %v1372_v54 }
 0x103   : > { %v1402_v14 = vadd.f32 %v1401_v39, %v1400_v34  ;;  %v627_v19 = vadd.f32 %v1399_v13, %v1371_v17 }
 0x105   : > { %v630_v21 = vadd.f32 %v1402_v14, %v1374_v20 }
 0x106   : > { %v1375_v28 = vpop.f32.mrb[4].mxu0 }
 0x107   : > { %v1403_v22 = vpop.f32.mrb[4].mxu1  ;;  %v1376_v29 = vpop.f32.mrb[5].mxu0 }
 0x108   : > { %v1404_v23 = vpop.f32.mrb[5].mxu1  ;;  %v1377_v30 = vadd.f32 %v1376_v29, %v1375_v28  ;;  %v1378_v31 = vpop.f32.mrb[6].mxu0 }
 0x109   : > { %v1405_v24 = vadd.f32 %v1404_v23, %v1403_v22  ;;  %v1406_v25 = vpop.f32.mrb[6].mxu1  ;;  %v1379_v32 = vpop.f32.mrb[7].mxu0 }
 0x10a   : > { %v1407_v26 = vpop.f32.mrb[7].mxu1  ;;  %v1380_v35 = vadd.f32 %v1379_v32, %v1378_v31 }
 0x10b   : > { %v1408_v27 = vadd.f32 %v1407_v26, %v1406_v25  ;;  %v635_v33 = vadd.f32 %v1405_v24, %v1377_v30 }
 0x10d   : > { %v638_v37 = vadd.f32 %v1408_v27, %v1380_v35 }
 0x11e   : > { %v1425_v44 = vpop.f32.mrb[8].mxu0 }
 0x11f   : > { %v1453_v36 = vpop.f32.mrb[8].mxu1  ;;  %v1426_v45 = vpop.f32.mrb[9].mxu0 }
 0x120   : > { %v1454_v38 = vpop.f32.mrb[9].mxu1  ;;  %v1427_v46 = vadd.f32 %v1426_v45, %v1425_v44  ;;  %v1428_v47 = vpop.f32.mrb[10].mxu0 }
 0x121   : > { %v1455_v40 = vadd.f32 %v1454_v38, %v1453_v36  ;;  %v1456_v41 = vpop.f32.mrb[10].mxu1  ;;  %v1429_v48 = vpop.f32.mrb[11].mxu0 }
 0x122   : > { %v1457_v42 = vpop.f32.mrb[11].mxu1  ;;  %v830_v50 = vadd.f32 %v1427_v46, %v627_v19  ;;  %v1430_v51 = vadd.f32 %v1429_v48, %v1428_v47 }
 0x123   : > { %v1458_v43 = vadd.f32 %v1457_v42, %v1456_v41 }
 0x124   : > { %v1036_v57 = vadd.f32 %v1455_v40, %v830_v50  ;;  %v831_v58 = vadd.f32 %v1430_v51, %v630_v21 }
 0x126   : > { %v1047_v61 = vadd.f32 %v1330_v53, %v1036_v57  ;;  %v1037_v62 = vadd.f32 %v1458_v43, %v831_v58  ;;  %v1431_v63 = vpop.f32.mrb[12].mxu0 }
 0x127   : > { %v1459_v49 = vpop.f32.mrb[12].mxu1  ;;  %v1432_v1 = vpop.f32.mrb[13].mxu0 }
 0x128   : > { %v1460_v52 = vpop.f32.mrb[13].mxu1  ;;  %v1048_v2 = vadd.f32 %v1330_v53, %v1037_v62  ;;  %v1433_v3 = vadd.f32 %v1432_v1, %v1431_v63  ;;  %v1434_v4 = vpop.f32.mrb[14].mxu0  ;;  %v1051_v5 = vmax.f32 %v1047_v61, 0.0 }
 0x129   : > { %v1461_v55 = vadd.f32 %v1460_v52, %v1459_v49  ;;  %v1462_v56 = vpop.f32.mrb[14].mxu1  ;;  %v1435_v0 = vpop.f32.mrb[15].mxu0 }
 0x12a   : > { %v1463_v59 = vpop.f32.mrb[15].mxu1  ;;  %v1052_v6 = vmax.f32 %v1048_v2, 0.0  ;;  %v832_v7 = vadd.f32 %v1433_v3, %v635_v33  ;;  %v1436_v8 = vadd.f32 %v1435_v0, %v1434_v4 }
 0x12b   : > { %v1464_v60 = vadd.f32 %v1463_v59, %v1462_v56 }
 0x12c   : > { %v1345_v9 = vpack.c.bf16 %v1052_v6, %v1051_v5  ;;  %v1038_v10 = vadd.f32 %v1461_v55, %v832_v7  ;;  %v833_v11 = vadd.f32 %v1436_v8, %v638_v37 }
 0x12e   : > { %1346 = vst [vmem:[%s170_s22] sm:$0xff] %v1345_v9   ;;  %v1049_v12 = vadd.f32 %v1330_v53, %v1038_v10  ;;  %v1039_v13 = vadd.f32 %v1464_v60, %v833_v11 }
 0x130   : > { %v1050_v34 = vadd.f32 %v1330_v53, %v1039_v13  ;;  %v1053_v39 = vmax.f32 %v1049_v12, 0.0 }
 0x132   : > { %v1054_v14 = vmax.f32 %v1050_v34, 0.0 }
 0x134   : > { %v1350_v15 = vpack.c.bf16 %v1054_v14, %v1053_v39 }
 0x136   : > { %1352 = vst [vmem:[%s170_s22 + $0x8] sm:$0xff] %v1350_v15  }
 0x137 PF: > { %s13_s16 = sadd.s32 1, %s1615_s16   ;;  %s1960_s12 = smov %s1607_s14 }
 0x138   : > { %p10_p6 = scmp.ge.s32.totalorder %s13_s16, 6   ;;  %s1961_s13 = smov %s1611_s15 }
 0x139   : > { %s1962_s14 = smov %s1965_s17  ;;  %s1963_s15 = smov %s1969_s18 }
 0x13a   :  { %12 = sbr.rel (!%p10_p6) target bundleno = 3 (0x3), region = 63 }

// kernel: image_encoder_forward.7
= control target key start
LH: loop header
LB: loop body
LE: loop exit
PB: predicated region body
PF: predicated region fallthrough
CT: control target
= control target key end

     0   :  { %8 = vsyncpa [#allocation4], 0  ;;  %s2328_s12 = smov 0   ;;  %s2330_s13 = smov 0   ;;  %s2557_s0 = inlined_call_operand.vmem [shape: bf16[2,8192], index: 0, kind: input, shape index: {}]   ;;  %s2558_s1 = inlined_call_operand.vmem [shape: bf16[8192,32], index: 1, kind: input, shape index: {}]   ;;  %s2559_s2 = inlined_call_operand.vmem [shape: f32[1,32], index: 2, kind: input, shape index: {}]   ;;  %s2560_s3 = inlined_call_operand.hbm [shape: f32[2,32], index: 3, kind: output, shape index: {}]  }
   0x1   :  { %s2332_s14 = smov 0  }
   0x2 LB: > { %s1770_s15 = sadd.s32 4294967295, %s2303_s14   ;;  %s23_s16 = sadd.s32 1, %s2299_s13  ;;  %s2303_s14 = sphi %s2332_s14, %s14_s14   ;;  %s2299_s13 = sphi %s2330_s13, %s2563_s13   ;;  %s2295_s12 = sphi %s2328_s12, %s2562_s12  }
   0x3   : > { %p24_p0 = scmp.ge.s32.totalorder %s23_s16, 4  ;;  %p1773_p1 = scmp.ge.s32.totalorder %s2303_s14, 1 }
   0x4   : > { %p167_p2 = scmp.lt.s32.totalorder %s2303_s14, 5 }
   0x5   : > { %s2565_s16 = smov (%p24_p0, %s23_s16), 0 }
   0x6   : > { %p168_p3 = pnand %p1773_p1, %p167_p2 }
   0x7   : > { %s1774_s17 = sshll.u32 (!%p168_p3), %s2295_s12, 4  ;;  %s1775_s18 = sshll.u32 (!%p168_p3), %s2295_s12, 8 }
   0x8   : > { %171 = sbr.rel (%p168_p3) target bundleno = 411 (0x19b), region = 32  ;;  %p197_p4 = scmp.lt.s32.totalorder (!%p168_p3), %s1774_s17, 63 }
   0x9   : > { %p204_p5 = scmp.lt.s32.totalorder (!%p168_p3), %s1775_s18, 1023  ;;  %p1777_p6 = scmp.ne.s32.totalorder (!%p168_p3), %s2295_s12, 0 }
   0xf   : > { %s2567_s17 = smov (!%p197_p4, %s1774_s17), 63  ;;  %s2569_s18 = smov (!%p204_p5, %s1775_s18), 1023 }
  0x10   : > { %s2354_s21 = scalar_lea.vmem %s2557_s0, %s2567_s17  ;;  %s1776_s22 = sshll.u32 %s2569_s18, 2  ;;  %vm214_vm0 = vcmask (!%p1777_p6), 254976   ;;  %v2305_v0 = vmov (!%p1777_p6), 0.0  }
  0x11   : > { %s2359_s25 = scalar_lea.vmem %s2558_s1, %s1776_s22  ;;  %213 = sbr.rel (%p1777_p6) target bundleno = 24 (0x18), region = 36  ;;  %215 = vst.msk [vmem:[#allocation2] sm:$0x3] (!%p1777_p6), %vm214_vm0, %v2305_v0 }
  0x18 PF: > { %v2121_v1 = vld [vmem:[%s2359_s25 + $0x40] sm:$0xff]   ;;  %v2125_v5 = vld [vmem:[%s2359_s25 + $0x48] sm:$0xff]   ;;  %v2129_v9 = vld [vmem:[%s2359_s25 + $0x50] sm:$0xff]   ;;  %v481_v29 = vlaneseq  ;;  %v2306_v37 = vmov 1966171168   ;;  %vm1680_vm1 = vcmask 254976  }
  0x19   : > { %v2122_v2 = vld [vmem:[%s2359_s25 + $0xc0] sm:$0xff]   ;;  %1912 = vmatprep.subr.bf16.mxu0 %v2121_v1  ;;  %v2126_v6 = vld [vmem:[%s2359_s25 + $0xc8] sm:$0xff]   ;;  %v2130_v10 = vld [vmem:[%s2359_s25 + $0xd0] sm:$0xff]   ;;  %v479_v38 = vunpack.c.l.s4 %v2306_v37  ;;  %p1906_p7 = scmp.ne.s32.totalorder %s2295_s12, 3 }
  0x1a   : > { %v2123_v3 = vld [vmem:[%s2359_s25] sm:$0xff]   ;;  %1934 = vmatprep.subr.bf16.mxu1 %v2122_v2  ;;  %v2127_v7 = vld [vmem:[%s2359_s25 + $0x8] sm:$0xff]   ;;  %v2131_v11 = vld [vmem:[%s2359_s25 + $0x10] sm:$0xff]   ;;  %v482_v34 = vshrl.u32 %v481_v29, 7 }
  0x1b   : > { %v2124_v4 = vld [vmem:[%s2359_s25 + $0x80] sm:$0xff]   ;;  %1913 = vmatpush3.bf16.msra.mxu0 %v2123_v3  ;;  %v2128_v8 = vld [vmem:[%s2359_s25 + $0x88] sm:$0xff]   ;;  %v2132_v12 = vld [vmem:[%s2359_s25 + $0x90] sm:$0xff]   ;;  %v480_v41 = vunpack.c.0.s8 %v479_v38 }
  0x1c   : > { %1935 = vmatpush3.bf16.msra.mxu1 %v2124_v4  ;;  %1914 = vmatprep.subr.bf16.mxu0 %v2125_v5  ;;  %v2133_v13 = vld [vmem:[%s2359_s25 + $0x58] sm:$0xff]   ;;  %v2137_v17 = vld [vmem:[%s2359_s25 + $0x60] sm:$0xff]   ;;  %v2141_v21 = vld [vmem:[%s2359_s25 + $0x68] sm:$0xff]  }
  0x1d   : > { %1936 = vmatprep.subr.bf16.mxu1 %v2126_v6  ;;  %v2134_v14 = vld [vmem:[%s2359_s25 + $0xd8] sm:$0xff]   ;;  %v2138_v18 = vld [vmem:[%s2359_s25 + $0xe0] sm:$0xff]   ;;  %v2142_v22 = vld [vmem:[%s2359_s25 + $0xe8] sm:$0xff]   ;;  %v2397_v42 = vsub.s32 %v480_v41, %v482_v34 }
  0x1e   : > { %v2135_v15 = vld [vmem:[%s2359_s25 + $0x18] sm:$0xff]   ;;  %v2139_v19 = vld [vmem:[%s2359_s25 + $0x20] sm:$0xff]   ;;  %v2143_v23 = vld [vmem:[%s2359_s25 + $0x28] sm:$0xff]  }
  0x1f   : > { %1915 = vmatpush3.bf16.msra.mxu0 %v2127_v7  ;;  %v2136_v16 = vld [vmem:[%s2359_s25 + $0x98] sm:$0xff]   ;;  %v2140_v20 = vld [vmem:[%s2359_s25 + $0xa0] sm:$0xff]   ;;  %v2144_v24 = vld [vmem:[%s2359_s25 + $0xa8] sm:$0xff]  }
  0x20   : > { %1937 = vmatpush3.bf16.msra.mxu1 %v2128_v8  ;;  %1916 = vmatprep.subr.bf16.mxu0 %v2129_v9  ;;  %v2145_v25 = vld [vmem:[%s2359_s25 + $0x70] sm:$0xff]   ;;  %v2149_v30 = vld [vmem:[%s2359_s25 + $0x78] sm:$0xff]   ;;  %v217_v35 = vld [vmem:[%s2354_s21] sm:$0xff] }
  0x21   : > { %1938 = vmatprep.subr.bf16.mxu1 %v2130_v10  ;;  %v2146_v26 = vld [vmem:[%s2359_s25 + $0xf0] sm:$0xff]   ;;  %v2150_v31 = vld [vmem:[%s2359_s25 + $0xf8] sm:$0xff]   ;;  %v2154_v36 = vld [vmem:[%s2359_s25 + $0x140] sm:$0xff]   ;;  %v477_v40 = vcombine.high %v217_v35, %v217_v35  ;;  %v484_v43 = vrot.slane %v217_v35, %v2397_v42 }
  0x22   : > { %v2147_v27 = vld [vmem:[%s2359_s25 + $0x30] sm:$0xff]   ;;  %v2151_v32 = vld [vmem:[%s2359_s25 + $0x38] sm:$0xff]   ;;  %v2155_v39 = vld [vmem:[%s2359_s25 + $0x1c0] sm:$0xff]  }
  0x23   : > { %1917 = vmatpush3.bf16.msra.mxu0 %v2131_v11  ;;  %v2148_v28 = vld [vmem:[%s2359_s25 + $0xb0] sm:$0xff]   ;;  %v2152_v33 = vld [vmem:[%s2359_s25 + $0xb8] sm:$0xff]   ;;  %v2401_v44 = vrot.slane %v477_v40, %v2397_v42  ;;  %v492_v45 = vcombine.high %v484_v43, %v484_v43  ;;  %v500_v46 = vrot.slane %v484_v43, %v2397_v42  ;;  %v2156_v49 = vld [vmem:[%s2359_s25 + $0x100] sm:$0xff]  }
  0x24   : > { %1939 = vmatpush3.bf16.msra.mxu1 %v2132_v12  ;;  %1918 = vmatprep.subr.bf16.mxu0 %v2133_v13  ;;  %v2158_v52 = vld [vmem:[%s2359_s25 + $0x148] sm:$0xff]   ;;  %v2157_v54 = vld [vmem:[%s2359_s25 + $0x180] sm:$0xff]   ;;  %v2162_v58 = vld [vmem:[%s2359_s25 + $0x150] sm:$0xff]  }
  0x25   : > { %1940 = vmatprep.subr.bf16.mxu1 %v2134_v14  ;;  %v493_v47 = vcombine.high %v2401_v44, %v2401_v44  ;;  %v514_v48 = vrot.slane %v492_v45, %v2397_v42  ;;  %v522_v51 = vcombine.high %v500_v46, %v500_v46  ;;  %v2159_v55 = vld [vmem:[%s2359_s25 + $0x1c8] sm:$0xff]   ;;  %v2163_v60 = vld [vmem:[%s2359_s25 + $0x1d0] sm:$0xff]   ;;  %v2166_v62 = vld [vmem:[%s2359_s25 + $0x158] sm:$0xff]  }
  0x26   : > { %v2160_v57 = vld [vmem:[%s2359_s25 + $0x108] sm:$0xff]   ;;  %v2164_v61 = vld [vmem:[%s2359_s25 + $0x110] sm:$0xff]   ;;  %v2167_v0 = vld [vmem:[%s2359_s25 + $0x1d8] sm:$0xff]  }
  0x27   : > { %1919 = vmatpush3.bf16.msra.mxu0 %v2135_v15  ;;  %v521_v50 = vrot.slane %v493_v47, %v2397_v42  ;;  %1391 = vmatprep.mubr.bf16.mxu0 %v514_v48  ;;  %v524_v53 = vcombine.high %v514_v48, %v514_v48  ;;  %v2161_v59 = vld [vmem:[%s2359_s25 + $0x188] sm:$0xff]   ;;  %v2165_v63 = vld [vmem:[%s2359_s25 + $0x190] sm:$0xff]   ;;  %v2168_v1 = vld [vmem:[%s2359_s25 + $0x118] sm:$0xff]  }
  0x28   : > { %1941 = vmatpush3.bf16.msra.mxu1 %v2136_v16  ;;  %1920 = vmatprep.subr.bf16.mxu0 %v2137_v17  ;;  %v2170_v2 = vld [vmem:[%s2359_s25 + $0x160] sm:$0xff]   ;;  %v2169_v3 = vld [vmem:[%s2359_s25 + $0x198] sm:$0xff]   ;;  %v2174_v6 = vld [vmem:[%s2359_s25 + $0x168] sm:$0xff]  }
  0x29   : > { %1942 = vmatprep.subr.bf16.mxu1 %v2138_v18  ;;  %v525_v56 = vcombine.high %v521_v50, %v521_v50  ;;  %1431 = vmatprep.mubr.bf16.mxu1 %v524_v53  ;;  %v2171_v4 = vld [vmem:[%s2359_s25 + $0x1e0] sm:$0xff]   ;;  %v2175_v8 = vld [vmem:[%s2359_s25 + $0x1e8] sm:$0xff]   ;;  %v2178_v10 = vld [vmem:[%s2359_s25 + $0x170] sm:$0xff]   ;;  %v507_v18 = vrot.slane %v2401_v44, %v2397_v42 }
  0x2a   : > { %v2172_v5 = vld [vmem:[%s2359_s25 + $0x120] sm:$0xff]   ;;  %v2176_v9 = vld [vmem:[%s2359_s25 + $0x128] sm:$0xff]   ;;  %v2179_v12 = vld [vmem:[%s2359_s25 + $0x1f0] sm:$0xff]  }
  0x2b   : > { %1921 = vmatpush3.bf16.msra.mxu0 %v2139_v19  ;;  %v2173_v7 = vld [vmem:[%s2359_s25 + $0x1a0] sm:$0xff]   ;;  %v2177_v11 = vld [vmem:[%s2359_s25 + $0x1a8] sm:$0xff]   ;;  %v2180_v13 = vld [vmem:[%s2359_s25 + $0x130] sm:$0xff]  }
  0x2c   : > { %1943 = vmatpush3.bf16.msra.mxu1 %v2140_v20  ;;  %1922 = vmatprep.subr.bf16.mxu0 %v2141_v21  ;;  %v2182_v14 = vld [vmem:[%s2359_s25 + $0x178] sm:$0xff]   ;;  %v2181_v15 = vld [vmem:[%s2359_s25 + $0x1b0] sm:$0xff]   ;;  %v2186_v19 = vld [vmem:[%s2359_s25 + $0x240] sm:$0xff]  }
  0x2d   : > { %1944 = vmatprep.subr.bf16.mxu1 %v2142_v22  ;;  %v2183_v16 = vld [vmem:[%s2359_s25 + $0x1f8] sm:$0xff]   ;;  %v2187_v21 = vld [vmem:[%s2359_s25 + $0x2c0] sm:$0xff]   ;;  %v2193_v29 = vld [vmem:[%s2359_s25 + $0x288] sm:$0xff]  }
  0x2e   : > { %v2184_v17 = vld [vmem:[%s2359_s25 + $0x138] sm:$0xff]   ;;  %v2188_v22 = vld [vmem:[%s2359_s25 + $0x200] sm:$0xff]   ;;  %v2206_v40 = vld [vmem:[%s2359_s25 + $0x268] sm:$0xff]  }
  0x2f   : > { %1923 = vmatpush3.bf16.msra.mxu0 %v2143_v23  ;;  %v2185_v20 = vld [vmem:[%s2359_s25 + $0x1b8] sm:$0xff]   ;;  %v523_v23 = vcombine.high %v507_v18, %v507_v18  ;;  %v2203_v38 = vld [vmem:[%s2359_s25 + $0x2e0] sm:$0xff]   ;;  %v2207_v43 = vld [vmem:[%s2359_s25 + $0x2e8] sm:$0xff]  }
  0x30   : > { %1945 = vmatpush3.bf16.msra.mxu1 %v2144_v24  ;;  %1924 = vmatprep.subr.bf16.mxu0 %v2145_v25  ;;  %v2190_v24 = vld [vmem:[%s2359_s25 + $0x248] sm:$0xff]   ;;  %v2189_v25 = vld [vmem:[%s2359_s25 + $0x280] sm:$0xff]   ;;  %v2199_v34 = vld [vmem:[%s2359_s25 + $0x2d8] sm:$0xff]  }
  0x31   : > { %1946 = vmatprep.subr.bf16.mxu1 %v2146_v26  ;;  %v2191_v26 = vld [vmem:[%s2359_s25 + $0x2c8] sm:$0xff]   ;;  %v2200_v35 = vld [vmem:[%s2359_s25 + $0x218] sm:$0xff]   ;;  %v2205_v41 = vld [vmem:[%s2359_s25 + $0x2a0] sm:$0xff]  }
  0x32   : > { %v2201_v37 = vld [vmem:[%s2359_s25 + $0x298] sm:$0xff]   ;;  %v2208_v44 = vld [vmem:[%s2359_s25 + $0x228] sm:$0xff]   ;;  %v2210_v45 = vld [vmem:[%s2359_s25 + $0x270] sm:$0xff]  }
  0x33   : > { %1925 = vmatpush3.bf16.msra.mxu0 %v2147_v27  ;;  %v2192_v27 = vld [vmem:[%s2359_s25 + $0x208] sm:$0xff]  }
  0x34   : > { %1947 = vmatpush3.bf16.msra.mxu1 %v2148_v28  ;;  %1926 = vmatprep.subr.bf16.mxu0 %v2149_v30  ;;  %v2194_v28 = vld [vmem:[%s2359_s25 + $0x250] sm:$0xff]   ;;  %v2209_v47 = vld [vmem:[%s2359_s25 + $0x2a8] sm:$0xff]  }
  0x35   : > { %1948 = vmatprep.subr.bf16.mxu1 %v2150_v31  ;;  %v2195_v30 = vld [vmem:[%s2359_s25 + $0x2d0] sm:$0xff]  }
  0x36   : > { %v2196_v31 = vld [vmem:[%s2359_s25 + $0x210] sm:$0xff]  }
  0x37   : > { %1927 = vmatpush3.bf16.msra.mxu0 %v2151_v32  ;;  %v2198_v32 = vld [vmem:[%s2359_s25 + $0x258] sm:$0xff]  }
  0x38   : > { %1949 = vmatpush3.bf16.msra.mxu1 %v2152_v33  ;;  %1956 = vmatprep.subr.bf16.mxu0 %v2154_v36  ;;  %v2197_v33 = vld [vmem:[%s2359_s25 + $0x290] sm:$0xff]   ;;  %v2202_v36 = vld [vmem:[%s2359_s25 + $0x260] sm:$0xff]  }
  0x39   : > { %1978 = vmatprep.subr.bf16.mxu1 %v2155_v39  ;;  %v2204_v39 = vld [vmem:[%s2359_s25 + $0x220] sm:$0xff]  }
  0x3a   : > { %1392 = vmatmul.mubr.bf16.vlgmr.msra.gmra.mrb[0].mxu0 %v500_v46  ;;  %v218_v46 = vld [vmem:[%s2354_s21 + $0x8] sm:$0xff] }
  0x3b   : > { %1957 = vmatpush3.bf16.msra.mxu0 %v2156_v49  ;;  %1432 = vmatmul.mubr.bf16.vlgmr.msra.gmra.mrb[0].mxu1 %v522_v51  ;;  %v533_v48 = vrot.slane %v218_v46, %v2397_v42  ;;  %v526_v49 = vcombine.high %v218_v46, %v218_v46  ;;  %v2212_v51 = vld [vmem:[%s2359_s25 + $0x230] sm:$0xff]  }
  0x3c   : > { %1958 = vmatprep.subr.bf16.mxu0 %v2158_v52  ;;  %1979 = vmatpush3.bf16.msra.mxu1 %v2157_v54  ;;  %v2214_v54 = vld [vmem:[%s2359_s25 + $0x278] sm:$0xff]  }
  0x3d   : > { %1471 = vmatprep.mubr.bf16.mxu0 %v521_v50  ;;  %1980 = vmatprep.subr.bf16.mxu1 %v2159_v55  ;;  %v2211_v50 = vld [vmem:[%s2359_s25 + $0x2f0] sm:$0xff]   ;;  %v541_v52 = vcombine.high %v533_v48, %v533_v48  ;;  %v2470_v53 = vrot.slane %v526_v49, %v2397_v42 }
  0x3e   : > { %1511 = vmatprep.mubr.bf16.mxu1 %v525_v56  ;;  %v2213_v55 = vld [vmem:[%s2359_s25 + $0x2b0] sm:$0xff]  }
  0x3f   : > { %1959 = vmatpush3.bf16.msra.mxu0 %v2160_v57  ;;  %v563_v56 = vrot.slane %v541_v52, %v2397_v42  ;;  %v542_v57 = vcombine.high %v2470_v53, %v2470_v53 }
  0x40   : > { %1960 = vmatprep.subr.bf16.mxu0 %v2162_v58  ;;  %1981 = vmatpush3.bf16.msra.mxu1 %v2161_v59  ;;  %v2215_v58 = vld [vmem:[%s2359_s25 + $0x2f8] sm:$0xff]  }
  0x41   : > { %1982 = vmatprep.subr.bf16.mxu1 %v2163_v60  ;;  %v2216_v59 = vld [vmem:[%s2359_s25 + $0x238] sm:$0xff]   ;;  %v573_v60 = vcombine.high %v563_v56, %v563_v56 }
  0x43   : > { %1961 = vmatpush3.bf16.msra.mxu0 %v2164_v61  ;;  %v549_v61 = vrot.slane %v533_v48, %v2397_v42 }
  0x44   : > { %1962 = vmatprep.subr.bf16.mxu0 %v2166_v62  ;;  %1983 = vmatpush3.bf16.msra.mxu1 %v2165_v63  ;;  %v2218_v62 = vld [vmem:[%s2359_s25 + $0x340] sm:$0xff]   ;;  %v2217_v63 = vld [vmem:[%s2359_s25 + $0x2b8] sm:$0xff]  }
  0x45   : > { %1984 = vmatprep.subr.bf16.mxu1 %v2167_v0  ;;  %v570_v0 = vrot.slane %v542_v57, %v2397_v42 }
  0x47   : > { %1963 = vmatpush3.bf16.msra.mxu0 %v2168_v1  ;;  %v2219_v1 = vld [vmem:[%s2359_s25 + $0x3c0] sm:$0xff]  }
  0x48   : > { %1964 = vmatprep.subr.bf16.mxu0 %v2170_v2  ;;  %1985 = vmatpush3.bf16.msra.mxu1 %v2169_v3  ;;  %v2220_v2 = vld [vmem:[%s2359_s25 + $0x300] sm:$0xff]   ;;  %v571_v3 = vcombine.high %v549_v61, %v549_v61 }
  0x49   : > { %1986 = vmatprep.subr.bf16.mxu1 %v2171_v4  ;;  %v2222_v4 = vld [vmem:[%s2359_s25 + $0x348] sm:$0xff]  }
  0x4b   : > { %1965 = vmatpush3.bf16.msra.mxu0 %v2172_v5  ;;  %v2221_v5 = vld [vmem:[%s2359_s25 + $0x380] sm:$0xff]  }
  0x4c   : > { %1966 = vmatprep.subr.bf16.mxu0 %v2174_v6  ;;  %1987 = vmatpush3.bf16.msra.mxu1 %v2173_v7  ;;  %v574_v6 = vcombine.high %v570_v0, %v570_v0  ;;  %v2223_v7 = vld [vmem:[%s2359_s25 + $0x3c8] sm:$0xff]  }
  0x4d   : > { %1988 = vmatprep.subr.bf16.mxu1 %v2175_v8  ;;  %v2224_v8 = vld [vmem:[%s2359_s25 + $0x308] sm:$0xff]  }
  0x4f   : > { %1967 = vmatpush3.bf16.msra.mxu0 %v2176_v9  ;;  %v2226_v9 = vld [vmem:[%s2359_s25 + $0x350] sm:$0xff]  }
  0x50   : > { %1968 = vmatprep.subr.bf16.mxu0 %v2178_v10  ;;  %1989 = vmatpush3.bf16.msra.mxu1 %v2177_v11  ;;  %v2225_v10 = vld [vmem:[%s2359_s25 + $0x388] sm:$0xff]   ;;  %v2227_v11 = vld [vmem:[%s2359_s25 + $0x3d0] sm:$0xff]  }
  0x51   : > { %1990 = vmatprep.subr.bf16.mxu1 %v2179_v12  ;;  %v2228_v12 = vld [vmem:[%s2359_s25 + $0x310] sm:$0xff]  }
  0x53   : > { %1969 = vmatpush3.bf16.msra.mxu0 %v2180_v13  ;;  %v2230_v13 = vld [vmem:[%s2359_s25 + $0x358] sm:$0xff]  }
  0x54   : > { %1970 = vmatprep.subr.bf16.mxu0 %v2182_v14  ;;  %1991 = vmatpush3.bf16.msra.mxu1 %v2181_v15  ;;  %v2229_v14 = vld [vmem:[%s2359_s25 + $0x390] sm:$0xff]   ;;  %v2231_v15 = vld [vmem:[%s2359_s25 + $0x3d8] sm:$0xff]  }
  0x55   : > { %1992 = vmatprep.subr.bf16.mxu1 %v2183_v16  ;;  %v2232_v16 = vld [vmem:[%s2359_s25 + $0x318] sm:$0xff]  }
  0x57   : > { %1971 = vmatpush3.bf16.msra.mxu0 %v2184_v17  ;;  %v2234_v17 = vld [vmem:[%s2359_s25 + $0x360] sm:$0xff]  }
  0x58   : > { %2000 = vmatprep.subr.bf16.mxu0 %v2186_v19  ;;  %1993 = vmatpush3.bf16.msra.mxu1 %v2185_v20  ;;  %v2235_v19 = vld [vmem:[%s2359_s25 + $0x3e0] sm:$0xff]  }
  0x59   : > { %2022 = vmatprep.subr.bf16.mxu1 %v2187_v21  ;;  %v2236_v20 = vld [vmem:[%s2359_s25 + $0x320] sm:$0xff]   ;;  %v2238_v21 = vld [vmem:[%s2359_s25 + $0x368] sm:$0xff]  }
  0x5a   : > { %1472 = vmatmul.mubr.bf16.vlgmr.msra.gmra.mrb[4].mxu0 %v507_v18  ;;  %v2233_v18 = vld [vmem:[%s2359_s25 + $0x398] sm:$0xff]  }
  0x5b   : > { %2001 = vmatpush3.bf16.msra.mxu0 %v2188_v22  ;;  %1512 = vmatmul.mubr.bf16.vlgmr.msra.gmra.mrb[4].mxu1 %v523_v23  ;;  %v2237_v22 = vld [vmem:[%s2359_s25 + $0x3a0] sm:$0xff]   ;;  %v2239_v23 = vld [vmem:[%s2359_s25 + $0x3e8] sm:$0xff]  }
  0x5c   : > { %2002 = vmatprep.subr.bf16.mxu0 %v2190_v24  ;;  %2023 = vmatpush3.bf16.msra.mxu1 %v2189_v25  ;;  %v2240_v24 = vld [vmem:[%s2359_s25 + $0x328] sm:$0xff]   ;;  %v2242_v25 = vld [vmem:[%s2359_s25 + $0x370] sm:$0xff]  }
  0x5d   : > { %2024 = vmatprep.subr.bf16.mxu1 %v2191_v26  ;;  %1551 = vmatprep.mubr.bf16.mxu0 %v563_v56  ;;  %v2241_v26 = vld [vmem:[%s2359_s25 + $0x3a8] sm:$0xff]  }
  0x5e   : > { %1591 = vmatprep.mubr.bf16.mxu1 %v573_v60 }
  0x5f   : > { %2003 = vmatpush3.bf16.msra.mxu0 %v2192_v27  ;;  %v2243_v27 = vld [vmem:[%s2359_s25 + $0x3f0] sm:$0xff]  }
  0x60   : > { %2004 = vmatprep.subr.bf16.mxu0 %v2194_v28  ;;  %2025 = vmatpush3.bf16.msra.mxu1 %v2193_v29  ;;  %v2244_v28 = vld [vmem:[%s2359_s25 + $0x330] sm:$0xff]   ;;  %v2246_v29 = vld [vmem:[%s2359_s25 + $0x378] sm:$0xff]  }
  0x61   : > { %2026 = vmatprep.subr.bf16.mxu1 %v2195_v30  ;;  %v2245_v30 = vld [vmem:[%s2359_s25 + $0x3b0] sm:$0xff]  }
  0x63   : > { %2005 = vmatpush3.bf16.msra.mxu0 %v2196_v31  ;;  %v2247_v31 = vld [vmem:[%s2359_s25 + $0x3f8] sm:$0xff]  }
  0x64   : > { %2006 = vmatprep.subr.bf16.mxu0 %v2198_v32  ;;  %2027 = vmatpush3.bf16.msra.mxu1 %v2197_v33  ;;  %v2248_v32 = vld [vmem:[%s2359_s25 + $0x338] sm:$0xff]   ;;  %v556_v33 = vrot.slane %v2470_v53, %v2397_v42 }
  0x65   : > { %2028 = vmatprep.subr.bf16.mxu1 %v2199_v34  ;;  %v2249_v34 = vld [vmem:[%s2359_s25 + $0x3b8] sm:$0xff]  }
  0x67   : > { %2007 = vmatpush3.bf16.msra.mxu0 %v2200_v35  ;;  %v572_v35 = vcombine.high %v556_v33, %v556_v33 }
  0x68   : > { %2008 = vmatprep.subr.bf16.mxu0 %v2202_v36  ;;  %2029 = vmatpush3.bf16.msra.mxu1 %v2201_v37 }
  0x69   : > { %2030 = vmatprep.subr.bf16.mxu1 %v2203_v38 }
  0x6b   : > { %2009 = vmatpush3.bf16.msra.mxu0 %v2204_v39 }
  0x6c   : > { %2010 = vmatprep.subr.bf16.mxu0 %v2206_v40  ;;  %2031 = vmatpush3.bf16.msra.mxu1 %v2205_v41 }
  0x6d   : > { %2032 = vmatprep.subr.bf16.mxu1 %v2207_v43 }
  0x6f   : > { %2011 = vmatpush3.bf16.msra.mxu0 %v2208_v44 }
  0x70   : > { %2012 = vmatprep.subr.bf16.mxu0 %v2210_v45  ;;  %2033 = vmatpush3.bf16.msra.mxu1 %v2209_v47 }
  0x71   : > { %2034 = vmatprep.subr.bf16.mxu1 %v2211_v50 }
  0x73   : > { %2013 = vmatpush3.bf16.msra.mxu0 %v2212_v51 }
  0x74   : > { %2014 = vmatprep.subr.bf16.mxu0 %v2214_v54  ;;  %2035 = vmatpush3.bf16.msra.mxu1 %v2213_v55 }
  0x75   : > { %2036 = vmatprep.subr.bf16.mxu1 %v2215_v58 }
  0x77   : > { %2015 = vmatpush3.bf16.msra.mxu0 %v2216_v59 }
  0x78   : > { %2044 = vmatprep.subr.bf16.mxu0 %v2218_v62  ;;  %2037 = vmatpush3.bf16.msra.mxu1 %v2217_v63 }
  0x79   : > { %2066 = vmatprep.subr.bf16.mxu1 %v2219_v1 }
  0x7a   : > { %1552 = vmatmul.mubr.bf16.vlgmr.msra.gmra.mrb[8].mxu0 %v549_v61 }
  0x7b   : > { %2045 = vmatpush3.bf16.msra.mxu0 %v2220_v2  ;;  %1631 = vmatprep.mubr.bf16.mxu0 %v570_v0 }
  0x7c   : > { %1592 = vmatmul.mubr.bf16.vlgmr.msra.gmra.mrb[8].mxu1 %v571_v3  ;;  %2046 = vmatprep.subr.bf16.mxu0 %v2222_v4 }
  0x7d   : > { %2067 = vmatpush3.bf16.msra.mxu1 %v2221_v5  ;;  %1671 = vmatprep.mubr.bf16.mxu1 %v574_v6 }
  0x7e   : > { %2068 = vmatprep.subr.bf16.mxu1 %v2223_v7 }
  0x7f   : > { %2047 = vmatpush3.bf16.msra.mxu0 %v2224_v8 }
  0x80   : > { %2048 = vmatprep.subr.bf16.mxu0 %v2226_v9 }
  0x81   : > { %2069 = vmatpush3.bf16.msra.mxu1 %v2225_v10 }
  0x82   : > { %2070 = vmatprep.subr.bf16.mxu1 %v2227_v11 }
  0x83   : > { %2049 = vmatpush3.bf16.msra.mxu0 %v2228_v12 }
  0x84   : > { %2050 = vmatprep.subr.bf16.mxu0 %v2230_v13 }
  0x85   : > { %2071 = vmatpush3.bf16.msra.mxu1 %v2229_v14 }
  0x86   : > { %2072 = vmatprep.subr.bf16.mxu1 %v2231_v15 }
  0x87   : > { %2051 = vmatpush3.bf16.msra.mxu0 %v2232_v16 }
  0x88   : > { %2052 = vmatprep.subr.bf16.mxu0 %v2234_v17  ;;  %v216_v17 = vld [vmem:[#allocation2] sm:$0x3] }
  0x89   : > { %2073 = vmatpush3.bf16.msra.mxu1 %v2233_v18 }
  0x8a   : > { %2074 = vmatprep.subr.bf16.mxu1 %v2235_v19 }
  0x8b   : > { %2053 = vmatpush3.bf16.msra.mxu0 %v2236_v20 }
  0x8c   : > { %2054 = vmatprep.subr.bf16.mxu0 %v2238_v21 }
  0x8d   : > { %2075 = vmatpush3.bf16.msra.mxu1 %v2237_v22  ;;  %v1907_v22 = vld [vmem:[%s2559_s2] ss:$0 sm:$0xff] (!%p1906_p7) }
  0x8e   : > { %2076 = vmatprep.subr.bf16.mxu1 %v2239_v23 }
  0x8f   : > { %2055 = vmatpush3.bf16.msra.mxu0 %v2240_v24 }
  0x90   : > { %2056 = vmatprep.subr.bf16.mxu0 %v2242_v25 }
  0x91   : > { %2077 = vmatpush3.bf16.msra.mxu1 %v2241_v26 }
  0x92   : > { %2078 = vmatprep.subr.bf16.mxu1 %v2243_v27 }
  0x93   : > { %2057 = vmatpush3.bf16.msra.mxu0 %v2244_v28 }
  0x94   : > { %2058 = vmatprep.subr.bf16.mxu0 %v2246_v29 }
  0x95   : > { %2079 = vmatpush3.bf16.msra.mxu1 %v2245_v30 }
  0x96   : > { %2080 = vmatprep.subr.bf16.mxu1 %v2247_v31 }
  0x97   : > { %2059 = vmatpush3.bf16.msra.mxu0 %v2248_v32 }
  0x99   : > { %2081 = vmatpush3.bf16.msra.mxu1 %v2249_v34 }
  0x9a   : > { %1632 = vmatmul.mubr.bf16.vlgmr.msra.gmra.mrb[12].mxu0 %v556_v33 }
  0x9c   : > { %1672 = vmatmul.mubr.bf16.vlgmr.msra.gmra.mrb[12].mxu1 %v572_v35 }
 0x10d   : > { %v1928_v36 = vpop.f32.mrb[0].mxu0 }
 0x10e   : > { %v1929_v37 = vpop.f32.mrb[1].mxu0  ;;  %v1950_v38 = vpop.f32.mrb[0].mxu1 }
 0x10f   : > { %v1930_v39 = vadd.f32 %v1929_v37, %v1928_v36  ;;  %v1931_v40 = vpop.f32.mrb[2].mxu0  ;;  %v1951_v41 = vpop.f32.mrb[1].mxu1 }
 0x110   : > { %v1932_v43 = vpop.f32.mrb[3].mxu0  ;;  %v1952_v44 = vadd.f32 %v1951_v41, %v1950_v38  ;;  %v1953_v45 = vpop.f32.mrb[2].mxu1 }
 0x111   : > { %v1954_v46 = vpop.f32.mrb[3].mxu1 }
 0x112   : > { %v1434_v47 = vadd.f32 %v1952_v44, %v1930_v39 }
 0x12d   : > { %v1972_v42 = vpop.f32.mrb[4].mxu0 }
 0x12e   : > { %v1973_v48 = vpop.f32.mrb[5].mxu0  ;;  %v1994_v49 = vpop.f32.mrb[4].mxu1 }
 0x12f   : > { %v1974_v50 = vadd.f32 %v1973_v48, %v1972_v42  ;;  %v1975_v51 = vpop.f32.mrb[6].mxu0  ;;  %v1995_v52 = vpop.f32.mrb[5].mxu1 }
 0x130   : > { %v1976_v53 = vpop.f32.mrb[7].mxu0  ;;  %v1996_v55 = vadd.f32 %v1995_v52, %v1994_v49  ;;  %v1997_v56 = vpop.f32.mrb[6].mxu1 }
 0x131   : > { %v1474_v54 = vadd.f32 %v1974_v50, %v1434_v47  ;;  %v1998_v57 = vpop.f32.mrb[7].mxu1 }
 0x133   : > { %v1514_v58 = vadd.f32 %v1996_v55, %v1474_v54 }
 0x14d   : > { %v2016_v59 = vpop.f32.mrb[8].mxu0 }
 0x14e   : > { %v2017_v60 = vpop.f32.mrb[9].mxu0 }
 0x14f   : > { %v2038_v61 = vpop.f32.mrb[8].mxu1  ;;  %v2018_v62 = vadd.f32 %v2017_v60, %v2016_v59  ;;  %v2019_v63 = vpop.f32.mrb[10].mxu0 }
 0x150   : > { %v2039_v0 = vpop.f32.mrb[9].mxu1  ;;  %v2020_v1 = vpop.f32.mrb[11].mxu0 }
 0x151   : > { %v1554_v2 = vadd.f32 %v2018_v62, %v1514_v58  ;;  %v2040_v3 = vadd.f32 %v2039_v0, %v2038_v61  ;;  %v2041_v4 = vpop.f32.mrb[10].mxu1 }
 0x152   : > { %v2042_v5 = vpop.f32.mrb[11].mxu1 }
 0x153   : > { %v1594_v6 = vadd.f32 %v2040_v3, %v1554_v2 }
 0x16d   : > { %v2060_v7 = vpop.f32.mrb[12].mxu0 }
 0x16e   : > { %v2061_v8 = vpop.f32.mrb[13].mxu0 }
 0x16f   : > { %v2082_v9 = vpop.f32.mrb[12].mxu1  ;;  %v2062_v10 = vadd.f32 %v2061_v8, %v2060_v7  ;;  %v2063_v11 = vpop.f32.mrb[14].mxu0 }
 0x170   : > { %v2083_v12 = vpop.f32.mrb[13].mxu1  ;;  %v2064_v13 = vpop.f32.mrb[15].mxu0 }
 0x171   : > { %v1634_v14 = vadd.f32 %v2062_v10, %v1594_v6  ;;  %v2084_v15 = vadd.f32 %v2083_v12, %v2082_v9  ;;  %v2085_v16 = vpop.f32.mrb[14].mxu1  ;;  %1685 = sbr.rel (%p1906_p7) target bundleno = 386 (0x182), region = 40 }
 0x172   : > { %v2086_v18 = vpop.f32.mrb[15].mxu1 }
 0x173   : > { %v1674_v19 = vadd.f32 %v2084_v15, %v1634_v14 }
 0x175   : > { %v1679_v20 = vadd.f32 %v1674_v19, %v216_v17 }
 0x177   : > { %1681 = vst.msk [vmem:[#allocation2] sm:$0x3] %vm1680_vm1, %v1679_v20 }
 0x17e   : > { %v1686_v21 = vld [vmem:[#allocation2] sm:$0x3] }
 0x17f   : > { %v1694_v23 = vadd.f32 %v1907_v22, %v1686_v21 }
 0x181   : > { %1695 = vst.msk [vmem:[#allocation3] sm:$0x3] %vm1680_vm1, %v1694_v23 }
 0x182 PF: > { %p2522_p8 = scmp.eq.s32.totalorder %s1770_s15, 3  ;;  %s2307_s29 = smov [#allocation3]  }
 0x183   : > { %s1705_s30 = sshll.u32 %s2307_s29, 4  ;;  %s1706_s30 = int_to_ptr.vmem [resolvable:$true] %s1705_s30 }
 0x184   : > { %s2251_s4 = scalar_lea.vmem %s1706_s30, 32  ;;  %p2258_p12 = scmp.lt.s32.totalorder %s1706_s30, %s1706_s30 }
 0x185   : > { %p2252_p9 = scmp.ne.s32.totalorder %s1706_s30, %s2251_s4  ;;  %p2259_p13 = scmp.lt.s32.totalorder %s2251_s4, %s2251_s4 }
 0x187   : > { %p2253_p10 = pnand %p2252_p9, %p2522_p8  ;;  %p2260_p0 = por %p2259_p13, %p2258_p12 }
 0x189   : > { %p2254_p11 = pneg %p2253_p10 }
 0x18b   : > { %p2261_p1 = pnand %p2260_p0, %p2254_p11 }
 0x18d   : > { %2264 = shalt.err (!%p2261_p1)
}
 0x18e   : > { %s2265_s7 = scalar_lea.hbm %s2560_s3, 32 }
 0x18f   : > { %p2266_p2 = scmp.ne.s32.totalorder %s2560_s3, %s2265_s7  ;;  %p2271_p5 = scmp.lt.u32.totalorder %s2265_s7, %s2560_s3 }
 0x191   : > { %p2267_p3 = pnand %p2266_p2, %p2522_p8 }
 0x193   : > { %p2268_p4 = pneg %p2267_p3 }
 0x195   : > { %p2273_p6 = pnand %p2271_p5, %p2268_p4 }
 0x197   : > { %2276 = shalt.err (!%p2273_p6)
}
 0x198   : > { %2089 = dma.vmem_to_hbm [thread:$0]  (%p2522_p8), %s1706_s30, 32, %s2560_s3, [#allocation4]  }
 0x199   : > { %2290 = dma.done.wait (%p2522_p8), [#allocation4], 32  }
 0x19a   : > { %2292 = vsyncadd (%p2522_p8), [#allocation4], 4294967264 }
 0x19b PF: > { %s14_s14 = sadd.s32 1, %s2303_s14   ;;  %s2562_s12 = smov %s2299_s13 }
 0x19c   : > { %p11_p7 = scmp.ge.s32.totalorder %s14_s14, 6   ;;  %s2563_s13 = smov %s2565_s16 }
 0x19e   :  { %13 = sbr.rel (!%p11_p7) target bundleno = 2 (0x2), region = 71 }
 0x1a5   :  { %1718 = vsyncpa [#allocation4], 1 }
 0x1a6   :  { %1720 = vsyncpa [#allocation4 + $0x1], 1 }

</bundles_post_ra>
